<compile_context>
chip_gen: v6e
topology: v6e:2x2x1
jax: 0.10.0
libtpu: 0.0.40
codegen_flags: <defaults>
</compile_context>

<pallas_src>
import jax
import jax.numpy as jnp
import numpy as np
from jax import lax
from jax.experimental import pallas as pl
from jax.experimental.pallas import tpu as pltpu

# --- hyper-parameters from PlateDecoder.__init__ -----------------------------
NUM_TOKENS = 16          # data.num_tokens (synthetic choice)
EMB = 32                 # embedding_size
HID = 64                 # hidden_size
F_C = 512                # feature channels
WF_C = 128               # attention channels
F_W, F_H = 8, 3          # feature map spatial size
P = F_H * F_W            # 24 flattened spatial positions
PADC = F_W + F_H         # 11 positional-encoding channels
HEAD = WF_C + NUM_TOKENS # 144: fused [attention | token-head] output width


def _make_kernel(B, S, teacher_forcing):
    """Single-program kernel: whole decoder loop (LSTM + attention + heads)."""
    T = NUM_TOKENS

    def _prologue(f_ref, wproj_ref, biaspos_ref, wf_scr, fo_scr):
        # one fused bf16 matmul: (B*P, 512) @ [w_fattn_f | w_out_img] -> (B*P, 144)
        proj = jnp.dot(f_ref[...], wproj_ref[...],
                       preferred_element_type=jnp.float32)
        wf_all = proj[:, :WF_C]                          # (B*P, 128)
        fo_all = proj[:, WF_C:]                          # (B*P, 16)
        for b in range(B):                               # static; prologue only
            wf_scr[b] = wf_all[b * P:(b + 1) * P, :] + biaspos_ref[...]
            fo_scr[b] = fo_all[b * P:(b + 1) * P, :]

    def _lstm_cell(gates, c_prev):
        # PyTorch LSTM gate order: i, f, g, o
        i_g = jax.nn.sigmoid(gates[:, 0 * HID:1 * HID])
        f_g = jax.nn.sigmoid(gates[:, 1 * HID:2 * HID])
        g_g = jnp.tanh(gates[:, 2 * HID:3 * HID])
        o_g = jax.nn.sigmoid(gates[:, 3 * HID:4 * HID])
        c_new = f_g * c_prev + i_g * g_g
        h_new = o_g * jnp.tanh(c_new)
        return h_new, c_new

    if teacher_forcing:
        def kernel(tok_ref, f_ref, biaspos_ref, whh_ref, blstm_ref,
                   wproj_ref, whead_ref, bhead_ref, wa_ref, ba_ref, boimg_ref,
                   out_ref, hout_ref, cout_ref,
                   wf_scr, fo_scr, hall_scr):
            _prologue(f_ref, wproj_ref, biaspos_ref, wf_scr, fo_scr)

            blstm = blstm_ref[...]                       # (1, 256), hoisted

            # ---- serial chain: LSTM only (heads/attention moved to epilogue) --
            h = jnp.zeros((B, HID), jnp.float32)
            c = jnp.zeros((B, HID), jnp.float32)
            for i in range(S):                           # trace-time unroll (S small)
                gates = (tok_ref[i]
                         + jnp.dot(h.astype(jnp.bfloat16), whh_ref[...],
                                   preferred_element_type=jnp.float32)
                         + blstm)
                h, c = _lstm_cell(gates, c)
                for b in range(B):                       # static row stores, b-major
                    hall_scr[b * S + i:b * S + i + 1, :] = h[b:b + 1, :]
            hout_ref[...] = h
            cout_ref[...] = c

            # ---- batched epilogue: heads + attention for all S*B rows at once -
            bhead = bhead_ref[...]                       # (1, 144)
            wa3 = wa_ref[...].reshape(1, 1, WF_C)        # (1, 1, 128)
            ba = ba_ref[...]                             # (1, 1)
            boimg = boimg_ref[...]                       # (1, T)

            hall = hall_scr[...].astype(jnp.bfloat16)    # (B*S, 64), b-major rows
            ho = (jnp.dot(hall, whead_ref[...],
                          preferred_element_type=jnp.float32) + bhead)  # (B*S, 144)

            for b in range(B):
                wh_b = ho[b * S:(b + 1) * S, :WF_C]      # (S, 128)
                wo_b = ho[b * S:(b + 1) * S, WF_C:]      # (S, 16)
                t = jnp.tanh(wh_b[:, None, :] + wf_scr[b][None, :, :])   # (S, P, 128)
                a = jnp.sum(t * wa3, axis=-1) + ba       # (S, P)
                a_max = jnp.max(a, axis=-1, keepdims=True)
                e = jnp.exp(a - a_max)
                alpha = e / jnp.sum(e, axis=-1, keepdims=True)           # exact: off chain
                wu = jnp.sum(alpha[:, :, None] * fo_scr[b][None, :, :],
                             axis=1) + boimg             # (S, T)
                out_ref[b] = wo_b + wu                   # out is (B, S, T)

        return kernel

    # ------------------------- feedback (argmax) mode -------------------------
    def kernel(op0_ref, f_ref, biaspos_ref, whh_ref, wtok_ref, blstm_ref,
               wproj_ref, whead_ref, bhead_ref, wa_ref, ba_ref, boimg_ref,
               out_ref, hout_ref, cout_ref,
               wf_scr, fo_scr):
        _prologue(f_ref, wproj_ref, biaspos_ref, wf_scr, fo_scr)

        # hoist loop-invariant bias/vector reads & broadcasts (not weight tiles)
        blstm = blstm_ref[...]
        bhead = bhead_ref[...]
        wa3 = wa_ref[...].reshape(1, 1, WF_C)
        ba = ba_ref[...]
        boimg = boimg_ref[...]
        iota_t = lax.broadcasted_iota(jnp.int32, (B, T), 1)

        def step(i, carry):
            h_prev, c_prev, op_prev = carry
            # first-occurrence argmax of previous logits -> one-hot feedback token
            maxv = jnp.max(op_prev, axis=1, keepdims=True)
            idx = jnp.min(jnp.where(op_prev >= maxv, iota_t, T),
                          axis=1, keepdims=True)
            onehot = (iota_t == idx).astype(jnp.bfloat16)

            # split gate matmuls: onehot @ (emb@w_ih) + h @ w_hh  (no lane concat)
            gates = (jnp.dot(onehot, wtok_ref[...],
                             preferred_element_type=jnp.float32)
                     + jnp.dot(h_prev.astype(jnp.bfloat16), whh_ref[...],
                               preferred_element_type=jnp.float32)
                     + blstm)
            h_new, c_new = _lstm_cell(gates, c_prev)

            # fused heads: h_new @ [w_hattn | w_out_rnn]
            ho = (jnp.dot(h_new.astype(jnp.bfloat16), whead_ref[...],
                          preferred_element_type=jnp.float32) + bhead)   # (B, 144)
            wh = ho[:, :WF_C]
            wo = ho[:, WF_C:]

            # attention over the P spatial positions
            t = jnp.tanh(wh[:, None, :] + wf_scr[...])   # (B, P, 128)
            a = jnp.sum(t * wa3, axis=-1) + ba           # (B, P)
            a_max = jnp.max(a, axis=-1, keepdims=True)
            e = jnp.exp(a - a_max)
            alpha = e * pl.reciprocal(jnp.sum(e, axis=-1, keepdims=True),
                                      approx=True)       # on the serial chain here
            wu = jnp.sum(alpha[:, :, None] * fo_scr[...], axis=1) + boimg
            op = wo + wu                                 # (B, T)
            out_ref[i] = op
            return h_new, c_new, op

        h0 = jnp.zeros((B, HID), jnp.float32)
        c0 = jnp.zeros((B, HID), jnp.float32)
        h_f, c_f, _ = lax.fori_loop(0, S, step, (h0, c0, op0_ref[...]),
                                    unroll=True)
        hout_ref[...] = h_f
        cout_ref[...] = c_f

    return kernel


def _pos_pad_rows():
    """pos_pad(): first F_W channels are (c == w), next F_H channels are (c == h)."""
    pad_x = jnp.broadcast_to(jnp.eye(F_W, dtype=jnp.float32)[None, :, :], (F_H, F_W, F_W))
    pad_y = jnp.broadcast_to(jnp.eye(F_H, dtype=jnp.float32)[:, None, :], (F_H, F_W, F_H))
    return jnp.concatenate([pad_x, pad_y], axis=-1).reshape(P, PADC)     # (P, PADC)


def fuse_decoder_params(params):
    """One-time wrapper-side weight fusions / bf16 casts (off the per-call path)."""
    bias_pos = _pos_pad_rows() @ params["w_fattn_p"] + params["b_fattn"]  # (P, 128)
    wproj = jnp.concatenate([params["w_fattn_f"], params["w_out_img"]], axis=1)  # (512,144)
    whead = jnp.concatenate([params["w_hattn"], params["w_out_rnn"]], axis=1)    # (64,144)
    bhead = jnp.concatenate([params["b_hattn"], params["b_out_rnn"]], axis=1)    # (1,144)
    tok_gates = params["emb"] @ params["w_ih"]                                   # (T, 256)
    return dict(
        bias_pos=bias_pos.astype(jnp.float32),
        wproj=wproj.astype(jnp.bfloat16),
        whead=whead.astype(jnp.bfloat16),
        bhead=bhead.astype(jnp.float32),
        w_hh=params["w_hh"].astype(jnp.bfloat16),
        tok_gates_f32=tok_gates.astype(jnp.float32),     # TF additive table (exact f32)
        tok_gates_bf16=tok_gates.astype(jnp.bfloat16),   # feedback MXU operand
        b_lstm=params["b_lstm"].astype(jnp.float32),
        w_attn=params["w_attn"].astype(jnp.float32),
        b_attn=params["b_attn"].astype(jnp.float32),
        b_out_img=params["b_out_img"].astype(jnp.float32),
    )


def _plate_decoder_forward(x, f_nchw, fused, teacher_forcing=False):
    """Pallas implementation of PlateDecoder.forward(x, f, h=None, teacher_forcing)."""
    B, C, fh, fw = f_nchw.shape
    _, S = x.shape
    assert C == F_C and fh == F_H and fw == F_W

    # per-call layout glue only (everything else is pre-fused)
    f2 = jnp.transpose(f_nchw, (0, 2, 3, 1)).reshape(B * P, C).astype(jnp.bfloat16)

    if teacher_forcing:
        # all-step input-side gate contributions via the fused (T, 256) table
        tok = jnp.transpose(jnp.take(fused["tok_gates_f32"], x, axis=0), (1, 0, 2))
        args = (tok, f2, fused["bias_pos"], fused["w_hh"], fused["b_lstm"],
                fused["wproj"], fused["whead"], fused["bhead"],
                fused["w_attn"], fused["b_attn"], fused["b_out_img"])
        out0_shape = jax.ShapeDtypeStruct((B, S, NUM_TOKENS), jnp.float32)
        scratch = [pltpu.VMEM((B, P, WF_C), jnp.float32),
                   pltpu.VMEM((B, P, NUM_TOKENS), jnp.float32),
                   pltpu.VMEM((B * S, HID), jnp.float32)]
    else:
        op0 = jax.nn.one_hot(x[:, 0], NUM_TOKENS, dtype=jnp.float32)     # (B, 16)
        args = (op0, f2, fused["bias_pos"], fused["w_hh"], fused["tok_gates_bf16"],
                fused["b_lstm"], fused["wproj"], fused["whead"], fused["bhead"],
                fused["w_attn"], fused["b_attn"], fused["b_out_img"])
        out0_shape = jax.ShapeDtypeStruct((S, B, NUM_TOKENS), jnp.float32)
        scratch = [pltpu.VMEM((B, P, WF_C), jnp.float32),
                   pltpu.VMEM((B, P, NUM_TOKENS), jnp.float32)]

    kernel = _make_kernel(B, S, teacher_forcing)
    out, h_f, c_f = pl.pallas_call(
        kernel,
        out_shape=(out0_shape,
                   jax.ShapeDtypeStruct((B, HID), jnp.float32),
                   jax.ShapeDtypeStruct((B, HID), jnp.float32)),
        in_specs=[pl.BlockSpec(memory_space=pltpu.MemorySpace.VMEM) for _ in args],
        out_specs=(pl.BlockSpec(memory_space=pltpu.MemorySpace.VMEM),) * 3,
        scratch_shapes=scratch,
    )(*args)

    o = out if teacher_forcing else jnp.transpose(out, (1, 0, 2))  # (B, S, T)
    return o, (h_f[None], c_f[None])                               # hidden as (1, B, HID)


plate_decoder_forward = jax.jit(_plate_decoder_forward,
                                static_argnames=("teacher_forcing",))


# --- deterministic synthetic parameters (weights stored as (in, out)) ---------
def init_params(key):
    ks = jax.random.split(key, 15)

    def u(k, shape, fan_in):
        bound = 1.0 / np.sqrt(fan_in)
        return jax.random.uniform(k, shape, jnp.float32, -bound, bound)

    return dict(
        emb=jax.random.normal(ks[0], (NUM_TOKENS, EMB), jnp.float32) * 0.1,
        w_ih=u(ks[1], (EMB, 4 * HID), EMB),
        w_hh=u(ks[2], (HID, 4 * HID), HID),
        b_lstm=u(ks[3], (1, 4 * HID), HID),               # b_ih + b_hh folded together
        w_hattn=u(ks[4], (HID, WF_C), HID),
        b_hattn=u(ks[5], (1, WF_C), HID),
        w_fattn_f=u(ks[6], (F_C, WF_C), F_C + PADC),      # 1x1 conv weight, feature channels
        w_fattn_p=u(ks[7], (PADC, WF_C), F_C + PADC),     # 1x1 conv weight, pos-pad channels
        b_fattn=u(ks[8], (1, WF_C), F_C + PADC),
        w_attn=u(ks[9], (1, WF_C), WF_C),                 # 1x1 conv (WF_C -> 1)
        b_attn=u(ks[10], (1, 1), WF_C),
        w_out_rnn=u(ks[11], (HID, NUM_TOKENS), HID),
        b_out_rnn=u(ks[12], (1, NUM_TOKENS), HID),
        w_out_img=u(ks[13], (F_C, NUM_TOKENS), F_C),
        b_out_img=u(ks[14], (1, NUM_TOKENS), F_C),
    )


# --- pure-JAX f32 reference (mirrors the PyTorch forward) ---------------------
def reference_forward(x, f_nchw, params, teacher_forcing=False):
    B, C, fh, fw = f_nchw.shape
    _, S = x.shape
    f = jnp.transpose(f_nchw, (0, 2, 3, 1)).reshape(B, P, C).astype(jnp.float32)
    pad = jnp.broadcast_to(_pos_pad_rows()[None], (B, P, PADC))
    wf = (jnp.einsum('bpc,ck->bpk', f, params["w_fattn_f"])
          + jnp.einsum('bpc,ck->bpk', pad, params["w_fattn_p"])
          + params["b_fattn"][None])
    h = jnp.zeros((B, HID), jnp.float32)
    c = jnp.zeros((B, HID), jnp.float32)
    ops = []
    for i in range(S):
        tok = x[:, i] if (i == 0 or teacher_forcing) else jnp.argmax(ops[-1], axis=1)
        xe = params["emb"][tok]
        gates = xe @ params["w_ih"] + h @ params["w_hh"] + params["b_lstm"]
        i_g = jax.nn.sigmoid(gates[:, :HID])
        f_g = jax.nn.sigmoid(gates[:, HID:2 * HID])
        g_g = jnp.tanh(gates[:, 2 * HID:3 * HID])
        o_g = jax.nn.sigmoid(gates[:, 3 * HID:])
        c = f_g * c + i_g * g_g
        h = o_g * jnp.tanh(c)
        wh = h @ params["w_hattn"] + params["b_hattn"]
        t = jnp.tanh(wh[:, None, :] + wf)
        a = jnp.sum(t * params["w_attn"][None], axis=-1) + params["b_attn"][0, 0]
        alpha = jax.nn.softmax(a, axis=1)
        u = jnp.sum(f * alpha[:, :, None], axis=1)
        op = (h @ params["w_out_rnn"] + params["b_out_rnn"]
              + u @ params["w_out_img"] + params["b_out_img"])
        ops.append(op)
    return jnp.stack(ops, axis=1), (h[None], c[None])


# TODO(synk): is_dbg_attn attention-map image dump (PIL) has no kernel equivalent; omitted.

if __name__ == "__main__":
    key = jax.random.PRNGKey(0)
    kp, kx, kf = jax.random.split(key, 3)
    params = init_params(kp)
    fused = fuse_decoder_params(params)    # one-time fusion, off the per-call path

    B, S = 2, 8
    x = jax.random.randint(kx, (B, S), 0, NUM_TOKENS, dtype=jnp.int32)
    f = jax.random.normal(kf, (B, F_C, F_H, F_W), jnp.float32)

    # default forward path (teacher_forcing=False -> argmax feedback)
    out_fb, (h_n, c_n) = plate_decoder_forward(x, f, fused, teacher_forcing=False)
    out_fb = jax.block_until_ready(out_fb)
    jax.block_until_ready((h_n, c_n))
    assert out_fb.shape == (B, S, NUM_TOKENS)
    assert h_n.shape == (1, B, HID) and c_n.shape == (1, B, HID)
    assert bool(jnp.all(jnp.isfinite(out_fb)))

    # teacher-forcing path + pure-JAX f32 reference comparison
    out_tf, (h_tf, c_tf) = plate_decoder_forward(x, f, fused, teacher_forcing=True)
    out_tf = jax.block_until_ready(out_tf)
    assert out_tf.shape == (B, S, NUM_TOKENS)
    assert bool(jnp.all(jnp.isfinite(out_tf)))

    ref_tf, (rh_tf, rc_tf) = reference_forward(x, f, params, teacher_forcing=True)
    ref_fb, _ = reference_forward(x, f, params, teacher_forcing=False)
    err_tf = float(jnp.max(jnp.abs(out_tf - ref_tf)))
    err_h = float(jnp.max(jnp.abs(h_tf - rh_tf)))
    err_fb = float(jnp.max(jnp.abs(out_fb - ref_fb)))
    print(f"max|pallas - ref| (teacher forcing, logits) = {err_tf:.3e}")
    print(f"max|pallas - ref| (teacher forcing, hidden) = {err_h:.3e}")
    print(f"max|pallas - ref| (argmax feedback, logits) = {err_fb:.3e}")
    # bf16 MXU operands with f32 accumulation: tolerance reflects bf16 rounding;
    # the fusions themselves are exact. Feedback mode is reported only (an fp
    # tie-flip in argmax legitimately changes the decoded trajectory).
    assert err_tf < 5e-2
    assert err_h < 5e-2

    print("KERNEL_OK")
</pallas_src>

<mosaic_0001>
module attributes {stable_mosaic.version = 11 : i64} {
  func.func @kernel(%arg0: memref<2x16xf32, #tpu.memory_space<vmem>>, %arg1: memref<48x512xbf16, #tpu.memory_space<vmem>>, %arg2: memref<24x128xf32, #tpu.memory_space<vmem>>, %arg3: memref<64x256xbf16, #tpu.memory_space<vmem>>, %arg4: memref<16x256xbf16, #tpu.memory_space<vmem>>, %arg5: memref<1x256xf32, #tpu.memory_space<vmem>>, %arg6: memref<512x144xbf16, #tpu.memory_space<vmem>>, %arg7: memref<64x144xbf16, #tpu.memory_space<vmem>>, %arg8: memref<1x144xf32, #tpu.memory_space<vmem>>, %arg9: memref<1x128xf32, #tpu.memory_space<vmem>>, %arg10: memref<1x1xf32, #tpu.memory_space<vmem>>, %arg11: memref<1x16xf32, #tpu.memory_space<vmem>>, %arg12: memref<8x2x16xf32, #tpu.memory_space<vmem>>, %arg13: memref<2x64xf32, #tpu.memory_space<vmem>>, %arg14: memref<2x64xf32, #tpu.memory_space<vmem>>, %arg15: memref<2x24x128xf32, #tpu.memory_space<vmem>>, %arg16: memref<2x24x16xf32, #tpu.memory_space<vmem>>) attributes {dimension_semantics = [], scalar_prefetch = 0 : i64, scratch_operands = 2 : i64, tpu.core_type = #tpu.core_type<tc>} {
    %c0 = arith.constant 0 : index
    %c0_0 = arith.constant 0 : index
    %0 = vector.load %arg1[%c0, %c0_0] : memref<48x512xbf16, #tpu.memory_space<vmem>>, vector<48x512xbf16>
    %c0_1 = arith.constant 0 : index
    %c0_2 = arith.constant 0 : index
    %1 = vector.load %arg6[%c0_1, %c0_2] : memref<512x144xbf16, #tpu.memory_space<vmem>>, vector<512x144xbf16>
    %cst = arith.constant dense<0.000000e+00> : vector<48x144xf32>
    %2 = tpu.matmul %0, %1, %cst {dimension_numbers = #tpu.dot_dimension_numbers<[1], [0], [0], [1], [0, 0, 1, 1], [], []>} : vector<48x512xbf16>, vector<512x144xbf16>, vector<48x144xf32> -> vector<48x144xf32>
    %3 = vector.extract_strided_slice %2 {offsets = [0, 0], sizes = [48, 128], strides = [1, 1]} : vector<48x144xf32> to vector<48x128xf32>
    %4 = vector.extract_strided_slice %2 {offsets = [0, 128], sizes = [48, 16], strides = [1, 1]} : vector<48x144xf32> to vector<48x16xf32>
    %5 = vector.extract_strided_slice %3 {offsets = [0, 0], sizes = [24, 128], strides = [1, 1]} : vector<48x128xf32> to vector<24x128xf32>
    %c0_3 = arith.constant 0 : index
    %c0_4 = arith.constant 0 : index
    %6 = vector.load %arg2[%c0_3, %c0_4] : memref<24x128xf32, #tpu.memory_space<vmem>>, vector<24x128xf32>
    %7 = arith.addf %5, %6 : vector<24x128xf32>
    %c0_5 = arith.constant 0 : index
    %c0_6 = arith.constant 0 : index
    %c0_7 = arith.constant 0 : index
    %8 = vector.load %arg15[%c0_5, %c0_6, %c0_7] : memref<2x24x128xf32, #tpu.memory_space<vmem>>, vector<1x24x128xf32>
    %9 = vector.shape_cast %8 : vector<1x24x128xf32> to vector<24x128xf32>
    %10 = vector.shape_cast %7 : vector<24x128xf32> to vector<1x24x128xf32>
    tpu.vector_store %arg15[%c0_5, %c0_6, %c0_7], %10 {strides = array<i32>} : memref<2x24x128xf32, #tpu.memory_space<vmem>>, vector<1x24x128xf32>,
    %11 = vector.extract_strided_slice %4 {offsets = [0, 0], sizes = [24, 16], strides = [1, 1]} : vector<48x16xf32> to vector<24x16xf32>
    %c0_8 = arith.constant 0 : index
    %c0_9 = arith.constant 0 : index
    %c0_10 = arith.constant 0 : index
    %12 = vector.load %arg16[%c0_8, %c0_9, %c0_10] : memref<2x24x16xf32, #tpu.memory_space<vmem>>, vector<1x24x16xf32>
    %13 = vector.shape_cast %12 : vector<1x24x16xf32> to vector<24x16xf32>
    %14 = vector.shape_cast %11 : vector<24x16xf32> to vector<1x24x16xf32>
    tpu.vector_store %arg16[%c0_8, %c0_9, %c0_10], %14 {strides = array<i32>} : memref<2x24x16xf32, #tpu.memory_space<vmem>>, vector<1x24x16xf32>,
    %15 = vector.extract_strided_slice %3 {offsets = [24, 0], sizes = [24, 128], strides = [1, 1]} : vector<48x128xf32> to vector<24x128xf32>
    %c0_11 = arith.constant 0 : index
    %c0_12 = arith.constant 0 : index
    %16 = vector.load %arg2[%c0_11, %c0_12] : memref<24x128xf32, #tpu.memory_space<vmem>>, vector<24x128xf32>
    %17 = arith.addf %15, %16 : vector<24x128xf32>
    %c1 = arith.constant 1 : index
    %c0_13 = arith.constant 0 : index
    %c0_14 = arith.constant 0 : index
    %18 = vector.load %arg15[%c1, %c0_13, %c0_14] : memref<2x24x128xf32, #tpu.memory_space<vmem>>, vector<1x24x128xf32>
    %19 = vector.shape_cast %18 : vector<1x24x128xf32> to vector<24x128xf32>
    %20 = vector.shape_cast %17 : vector<24x128xf32> to vector<1x24x128xf32>
    tpu.vector_store %arg15[%c1, %c0_13, %c0_14], %20 {strides = array<i32>} : memref<2x24x128xf32, #tpu.memory_space<vmem>>, vector<1x24x128xf32>,
    %21 = vector.extract_strided_slice %4 {offsets = [24, 0], sizes = [24, 16], strides = [1, 1]} : vector<48x16xf32> to vector<24x16xf32>
    %c1_15 = arith.constant 1 : index
    %c0_16 = arith.constant 0 : index
    %c0_17 = arith.constant 0 : index
    %22 = vector.load %arg16[%c1_15, %c0_16, %c0_17] : memref<2x24x16xf32, #tpu.memory_space<vmem>>, vector<1x24x16xf32>
    %23 = vector.shape_cast %22 : vector<1x24x16xf32> to vector<24x16xf32>
    %24 = vector.shape_cast %21 : vector<24x16xf32> to vector<1x24x16xf32>
    tpu.vector_store %arg16[%c1_15, %c0_16, %c0_17], %24 {strides = array<i32>} : memref<2x24x16xf32, #tpu.memory_space<vmem>>, vector<1x24x16xf32>,
    %c0_18 = arith.constant 0 : index
    %c0_19 = arith.constant 0 : index
    %25 = vector.load %arg5[%c0_18, %c0_19] : memref<1x256xf32, #tpu.memory_space<vmem>>, vector<1x256xf32>
    %c0_20 = arith.constant 0 : index
    %c0_21 = arith.constant 0 : index
    %26 = vector.load %arg8[%c0_20, %c0_21] : memref<1x144xf32, #tpu.memory_space<vmem>>, vector<1x144xf32>
    %c0_22 = arith.constant 0 : index
    %c0_23 = arith.constant 0 : index
    %27 = vector.load %arg9[%c0_22, %c0_23] : memref<1x128xf32, #tpu.memory_space<vmem>>, vector<1x128xf32>
    %28 = vector.shape_cast %27 : vector<1x128xf32> to vector<1x1x128xf32>
    %c0_24 = arith.constant 0 : index
    %c0_25 = arith.constant 0 : index
    %29 = vector.load %arg10[%c0_24, %c0_25] : memref<1x1xf32, #tpu.memory_space<vmem>>, vector<1x1xf32>
    %c0_26 = arith.constant 0 : index
    %c0_27 = arith.constant 0 : index
    %30 = vector.load %arg11[%c0_26, %c0_27] : memref<1x16xf32, #tpu.memory_space<vmem>>, vector<1x16xf32>
    %31 = tpu.iota {dimensions = array<i32: 1>} : vector<2x16xi32>
    %cst_28 = arith.constant 0.000000e+00 : f32
    %32 = vector.broadcast %cst_28 : f32 to vector<2x64xf32>
    %cst_29 = arith.constant 0.000000e+00 : f32
    %33 = vector.broadcast %cst_29 : f32 to vector<2x64xf32>
    %c0_30 = arith.constant 0 : index
    %c0_31 = arith.constant 0 : index
    %34 = vector.load %arg0[%c0_30, %c0_31] : memref<2x16xf32, #tpu.memory_space<vmem>>, vector<2x16xf32>
    %c0_i32 = arith.constant 0 : i32
    %cst_32 = arith.constant dense<0xFF800000> : vector<2xf32>
    %35 = vector.multi_reduction <maximumf>, %34, %cst_32 [1] : vector<2x16xf32> to vector<2xf32>
    %36 = vector.shape_cast %35 : vector<2xf32> to vector<2x1xf32>
    %37 = vector.broadcast %36 : vector<2x1xf32> to vector<2x16xf32>
    %38 = arith.cmpf oge, %34, %37 : vector<2x16xf32>
    %c16_i32 = arith.constant 16 : i32
    %39 = vector.broadcast %c16_i32 : i32 to vector<2x16xi32>
    %40 = arith.select %38, %31, %39 : vector<2x16xi1>, vector<2x16xi32>
    %cst_33 = arith.constant dense<2147483647> : vector<2xi32>
    %41 = vector.multi_reduction <minsi>, %40, %cst_33 [1] : vector<2x16xi32> to vector<2xi32>
    %42 = vector.shape_cast %41 : vector<2xi32> to vector<2x1xi32>
    %43 = vector.broadcast %42 : vector<2x1xi32> to vector<2x16xi32>
    %44 = arith.cmpi eq, %31, %43 : vector<2x16xi32>
    %45 = arith.extui %44 : vector<2x16xi1> to vector<2x16xi32>
    %46 = arith.sitofp %45 : vector<2x16xi32> to vector<2x16xf32>
    %47 = arith.truncf %46 : vector<2x16xf32> to vector<2x16xbf16>
    %c0_34 = arith.constant 0 : index
    %c0_35 = arith.constant 0 : index
    %48 = vector.load %arg4[%c0_34, %c0_35] : memref<16x256xbf16, #tpu.memory_space<vmem>>, vector<16x256xbf16>
    %cst_36 = arith.constant dense<0.000000e+00> : vector<2x256xf32>
    %49 = tpu.matmul %47, %48, %cst_36 {dimension_numbers = #tpu.dot_dimension_numbers<[1], [0], [0], [1], [0, 0, 1, 1], [], []>} : vector<2x16xbf16>, vector<16x256xbf16>, vector<2x256xf32> -> vector<2x256xf32>
    %50 = arith.truncf %32 : vector<2x64xf32> to vector<2x64xbf16>
    %c0_37 = arith.constant 0 : index
    %c0_38 = arith.constant 0 : index
    %51 = vector.load %arg3[%c0_37, %c0_38] : memref<64x256xbf16, #tpu.memory_space<vmem>>, vector<64x256xbf16>
    %cst_39 = arith.constant dense<0.000000e+00> : vector<2x256xf32>
    %52 = tpu.matmul %50, %51, %cst_39 {dimension_numbers = #tpu.dot_dimension_numbers<[1], [0], [0], [1], [0, 0, 1, 1], [], []>} : vector<2x64xbf16>, vector<64x256xbf16>, vector<2x256xf32> -> vector<2x256xf32>
    %53 = arith.addf %49, %52 : vector<2x256xf32>
    %54 = vector.broadcast %25 : vector<1x256xf32> to vector<2x256xf32>
    %55 = arith.addf %53, %54 : vector<2x256xf32>
    %56 = vector.extract_strided_slice %55 {offsets = [0, 0], sizes = [2, 64], strides = [1, 1]} : vector<2x256xf32> to vector<2x64xf32>
    %57 = arith.negf %56 : vector<2x64xf32>
    %58 = math.exp %57 : vector<2x64xf32>
    %cst_40 = arith.constant 1.000000e+00 : f32
    %59 = vector.broadcast %cst_40 : f32 to vector<2x64xf32>
    %60 = arith.addf %59, %58 : vector<2x64xf32>
    %61 = arith.divf %59, %60 : vector<2x64xf32>
    %62 = vector.extract_strided_slice %55 {offsets = [0, 64], sizes = [2, 64], strides = [1, 1]} : vector<2x256xf32> to vector<2x64xf32>
    %63 = arith.negf %62 : vector<2x64xf32>
    %64 = math.exp %63 : vector<2x64xf32>
    %cst_41 = arith.constant 1.000000e+00 : f32
    %65 = vector.broadcast %cst_41 : f32 to vector<2x64xf32>
    %66 = arith.addf %65, %64 : vector<2x64xf32>
    %67 = arith.divf %65, %66 : vector<2x64xf32>
    %68 = vector.extract_strided_slice %55 {offsets = [0, 128], sizes = [2, 64], strides = [1, 1]} : vector<2x256xf32> to vector<2x64xf32>
    %69 = math.tanh %68 : vector<2x64xf32>
    %70 = vector.extract_strided_slice %55 {offsets = [0, 192], sizes = [2, 64], strides = [1, 1]} : vector<2x256xf32> to vector<2x64xf32>
    %71 = arith.negf %70 : vector<2x64xf32>
    %72 = math.exp %71 : vector<2x64xf32>
    %cst_42 = arith.constant 1.000000e+00 : f32
    %73 = vector.broadcast %cst_42 : f32 to vector<2x64xf32>
    %74 = arith.addf %73, %72 : vector<2x64xf32>
    %75 = arith.divf %73, %74 : vector<2x64xf32>
    %76 = arith.mulf %67, %33 : vector<2x64xf32>
    %77 = arith.mulf %61, %69 : vector<2x64xf32>
    %78 = arith.addf %76, %77 : vector<2x64xf32>
    %79 = math.tanh %78 : vector<2x64xf32>
    %80 = arith.mulf %75, %79 : vector<2x64xf32>
    %81 = arith.truncf %80 : vector<2x64xf32> to vector<2x64xbf16>
    %c0_43 = arith.constant 0 : index
    %c0_44 = arith.constant 0 : index
    %82 = vector.load %arg7[%c0_43, %c0_44] : memref<64x144xbf16, #tpu.memory_space<vmem>>, vector<64x144xbf16>
    %cst_45 = arith.constant dense<0.000000e+00> : vector<2x144xf32>
    %83 = tpu.matmul %81, %82, %cst_45 {dimension_numbers = #tpu.dot_dimension_numbers<[1], [0], [0], [1], [0, 0, 1, 1], [], []>} : vector<2x64xbf16>, vector<64x144xbf16>, vector<2x144xf32> -> vector<2x144xf32>
    %84 = vector.broadcast %26 : vector<1x144xf32> to vector<2x144xf32>
    %85 = arith.addf %83, %84 : vector<2x144xf32>
    %86 = vector.extract_strided_slice %85 {offsets = [0, 0], sizes = [2, 128], strides = [1, 1]} : vector<2x144xf32> to vector<2x128xf32>
    %87 = vector.extract_strided_slice %85 {offsets = [0, 128], sizes = [2, 16], strides = [1, 1]} : vector<2x144xf32> to vector<2x16xf32>
    %88 = vector.shape_cast %86 : vector<2x128xf32> to vector<2x1x128xf32>
    %c0_46 = arith.constant 0 : index
    %c0_47 = arith.constant 0 : index
    %c0_48 = arith.constant 0 : index
    %89 = vector.load %arg15[%c0_46, %c0_47, %c0_48] : memref<2x24x128xf32, #tpu.memory_space<vmem>>, vector<2x24x128xf32>
    %90 = vector.broadcast %88 : vector<2x1x128xf32> to vector<2x24x128xf32>
    %91 = arith.addf %90, %89 : vector<2x24x128xf32>
    %92 = math.tanh %91 : vector<2x24x128xf32>
    %93 = vector.broadcast %28 : vector<1x1x128xf32> to vector<2x24x128xf32>
    %94 = arith.mulf %92, %93 : vector<2x24x128xf32>
    %cst_49 = arith.constant dense<0.000000e+00> : vector<2x24xf32>
    %95 = vector.multi_reduction <add>, %94, %cst_49 [2] : vector<2x24x128xf32> to vector<2x24xf32>
    %96 = vector.broadcast %29 : vector<1x1xf32> to vector<2x24xf32>
    %97 = arith.addf %95, %96 : vector<2x24xf32>
    %cst_50 = arith.constant dense<0xFF800000> : vector<2xf32>
    %98 = vector.multi_reduction <maximumf>, %97, %cst_50 [1] : vector<2x24xf32> to vector<2xf32>
    %99 = vector.shape_cast %98 : vector<2xf32> to vector<2x1xf32>
    %100 = vector.broadcast %99 : vector<2x1xf32> to vector<2x24xf32>
    %101 = arith.subf %97, %100 : vector<2x24xf32>
    %102 = math.exp %101 : vector<2x24xf32>
    %cst_51 = arith.constant dense<0.000000e+00> : vector<2xf32>
    %103 = vector.multi_reduction <add>, %102, %cst_51 [1] : vector<2x24xf32> to vector<2xf32>
    %104 = vector.shape_cast %103 : vector<2xf32> to vector<2x1xf32>
    %105 = tpu.reciprocal %104 {approx = true} : vector<2x1xf32> -> vector<2x1xf32>
    %106 = vector.broadcast %105 : vector<2x1xf32> to vector<2x24xf32>
    %107 = arith.mulf %102, %106 : vector<2x24xf32>
    %108 = vector.shape_cast %107 : vector<2x24xf32> to vector<2x24x1xf32>
    %c0_52 = arith.constant 0 : index
    %c0_53 = arith.constant 0 : index
    %c0_54 = arith.constant 0 : index
    %109 = vector.load %arg16[%c0_52, %c0_53, %c0_54] : memref<2x24x16xf32, #tpu.memory_space<vmem>>, vector<2x24x16xf32>
    %110 = vector.broadcast %108 : vector<2x24x1xf32> to vector<2x24x16xf32>
    %111 = arith.mulf %110, %109 : vector<2x24x16xf32>
    %cst_55 = arith.constant dense<0.000000e+00> : vector<2x16xf32>
    %112 = vector.multi_reduction <add>, %111, %cst_55 [1] : vector<2x24x16xf32> to vector<2x16xf32>
    %113 = vector.broadcast %30 : vector<1x16xf32> to vector<2x16xf32>
    %114 = arith.addf %112, %113 : vector<2x16xf32>
    %115 = arith.addf %87, %114 : vector<2x16xf32>
    %116 = arith.index_cast %c0_i32 : i32 to index
    %c0_56 = arith.constant 0 : index
    %c0_57 = arith.constant 0 : index
    %117 = vector.load %arg12[%116, %c0_56, %c0_57] : memref<8x2x16xf32, #tpu.memory_space<vmem>>, vector<1x2x16xf32>
    %118 = vector.shape_cast %117 : vector<1x2x16xf32> to vector<2x16xf32>
    %119 = vector.shape_cast %115 : vector<2x16xf32> to vector<1x2x16xf32>
    tpu.vector_store %arg12[%116, %c0_56, %c0_57], %119 {strides = array<i32>} : memref<8x2x16xf32, #tpu.memory_space<vmem>>, vector<1x2x16xf32>,
    %c1_i32 = arith.constant 1 : i32
    %cst_58 = arith.constant dense<0xFF800000> : vector<2xf32>
    %120 = vector.multi_reduction <maximumf>, %115, %cst_58 [1] : vector<2x16xf32> to vector<2xf32>
    %121 = vector.shape_cast %120 : vector<2xf32> to vector<2x1xf32>
    %122 = vector.broadcast %121 : vector<2x1xf32> to vector<2x16xf32>
    %123 = arith.cmpf oge, %115, %122 : vector<2x16xf32>
    %c16_i32_59 = arith.constant 16 : i32
    %124 = vector.broadcast %c16_i32_59 : i32 to vector<2x16xi32>
    %125 = arith.select %123, %31, %124 : vector<2x16xi1>, vector<2x16xi32>
    %cst_60 = arith.constant dense<2147483647> : vector<2xi32>
    %126 = vector.multi_reduction <minsi>, %125, %cst_60 [1] : vector<2x16xi32> to vector<2xi32>
    %127 = vector.shape_cast %126 : vector<2xi32> to vector<2x1xi32>
    %128 = vector.broadcast %127 : vector<2x1xi32> to vector<2x16xi32>
    %129 = arith.cmpi eq, %31, %128 : vector<2x16xi32>
    %130 = arith.extui %129 : vector<2x16xi1> to vector<2x16xi32>
    %131 = arith.sitofp %130 : vector<2x16xi32> to vector<2x16xf32>
    %132 = arith.truncf %131 : vector<2x16xf32> to vector<2x16xbf16>
    %c0_61 = arith.constant 0 : index
    %c0_62 = arith.constant 0 : index
    %133 = vector.load %arg4[%c0_61, %c0_62] : memref<16x256xbf16, #tpu.memory_space<vmem>>, vector<16x256xbf16>
    %cst_63 = arith.constant dense<0.000000e+00> : vector<2x256xf32>
    %134 = tpu.matmul %132, %133, %cst_63 {dimension_numbers = #tpu.dot_dimension_numbers<[1], [0], [0], [1], [0, 0, 1, 1], [], []>} : vector<2x16xbf16>, vector<16x256xbf16>, vector<2x256xf32> -> vector<2x256xf32>
    %135 = arith.truncf %80 : vector<2x64xf32> to vector<2x64xbf16>
    %c0_64 = arith.constant 0 : index
    %c0_65 = arith.constant 0 : index
    %136 = vector.load %arg3[%c0_64, %c0_65] : memref<64x256xbf16, #tpu.memory_space<vmem>>, vector<64x256xbf16>
    %cst_66 = arith.constant dense<0.000000e+00> : vector<2x256xf32>
    %137 = tpu.matmul %135, %136, %cst_66 {dimension_numbers = #tpu.dot_dimension_numbers<[1], [0], [0], [1], [0, 0, 1, 1], [], []>} : vector<2x64xbf16>, vector<64x256xbf16>, vector<2x256xf32> -> vector<2x256xf32>
    %138 = arith.addf %134, %137 : vector<2x256xf32>
    %139 = vector.broadcast %25 : vector<1x256xf32> to vector<2x256xf32>
    %140 = arith.addf %138, %139 : vector<2x256xf32>
    %141 = vector.extract_strided_slice %140 {offsets = [0, 0], sizes = [2, 64], strides = [1, 1]} : vector<2x256xf32> to vector<2x64xf32>
    %142 = arith.negf %141 : vector<2x64xf32>
    %143 = math.exp %142 : vector<2x64xf32>
    %cst_67 = arith.constant 1.000000e+00 : f32
    %144 = vector.broadcast %cst_67 : f32 to vector<2x64xf32>
    %145 = arith.addf %144, %143 : vector<2x64xf32>
    %146 = arith.divf %144, %145 : vector<2x64xf32>
    %147 = vector.extract_strided_slice %140 {offsets = [0, 64], sizes = [2, 64], strides = [1, 1]} : vector<2x256xf32> to vector<2x64xf32>
    %148 = arith.negf %147 : vector<2x64xf32>
    %149 = math.exp %148 : vector<2x64xf32>
    %cst_68 = arith.constant 1.000000e+00 : f32
    %150 = vector.broadcast %cst_68 : f32 to vector<2x64xf32>
    %151 = arith.addf %150, %149 : vector<2x64xf32>
    %152 = arith.divf %150, %151 : vector<2x64xf32>
    %153 = vector.extract_strided_slice %140 {offsets = [0, 128], sizes = [2, 64], strides = [1, 1]} : vector<2x256xf32> to vector<2x64xf32>
    %154 = math.tanh %153 : vector<2x64xf32>
    %155 = vector.extract_strided_slice %140 {offsets = [0, 192], sizes = [2, 64], strides = [1, 1]} : vector<2x256xf32> to vector<2x64xf32>
    %156 = arith.negf %155 : vector<2x64xf32>
    %157 = math.exp %156 : vector<2x64xf32>
    %cst_69 = arith.constant 1.000000e+00 : f32
    %158 = vector.broadcast %cst_69 : f32 to vector<2x64xf32>
    %159 = arith.addf %158, %157 : vector<2x64xf32>
    %160 = arith.divf %158, %159 : vector<2x64xf32>
    %161 = arith.mulf %152, %78 : vector<2x64xf32>
    %162 = arith.mulf %146, %154 : vector<2x64xf32>
    %163 = arith.addf %161, %162 : vector<2x64xf32>
    %164 = math.tanh %163 : vector<2x64xf32>
    %165 = arith.mulf %160, %164 : vector<2x64xf32>
    %166 = arith.truncf %165 : vector<2x64xf32> to vector<2x64xbf16>
    %c0_70 = arith.constant 0 : index
    %c0_71 = arith.constant 0 : index
    %167 = vector.load %arg7[%c0_70, %c0_71] : memref<64x144xbf16, #tpu.memory_space<vmem>>, vector<64x144xbf16>
    %cst_72 = arith.constant dense<0.000000e+00> : vector<2x144xf32>
    %168 = tpu.matmul %166, %167, %cst_72 {dimension_numbers = #tpu.dot_dimension_numbers<[1], [0], [0], [1], [0, 0, 1, 1], [], []>} : vector<2x64xbf16>, vector<64x144xbf16>, vector<2x144xf32> -> vector<2x144xf32>
    %169 = vector.broadcast %26 : vector<1x144xf32> to vector<2x144xf32>
    %170 = arith.addf %168, %169 : vector<2x144xf32>
    %171 = vector.extract_strided_slice %170 {offsets = [0, 0], sizes = [2, 128], strides = [1, 1]} : vector<2x144xf32> to vector<2x128xf32>
    %172 = vector.extract_strided_slice %170 {offsets = [0, 128], sizes = [2, 16], strides = [1, 1]} : vector<2x144xf32> to vector<2x16xf32>
    %173 = vector.shape_cast %171 : vector<2x128xf32> to vector<2x1x128xf32>
    %c0_73 = arith.constant 0 : index
    %c0_74 = arith.constant 0 : index
    %c0_75 = arith.constant 0 : index
    %174 = vector.load %arg15[%c0_73, %c0_74, %c0_75] : memref<2x24x128xf32, #tpu.memory_space<vmem>>, vector<2x24x128xf32>
    %175 = vector.broadcast %173 : vector<2x1x128xf32> to vector<2x24x128xf32>
    %176 = arith.addf %175, %174 : vector<2x24x128xf32>
    %177 = math.tanh %176 : vector<2x24x128xf32>
    %178 = vector.broadcast %28 : vector<1x1x128xf32> to vector<2x24x128xf32>
    %179 = arith.mulf %177, %178 : vector<2x24x128xf32>
    %cst_76 = arith.constant dense<0.000000e+00> : vector<2x24xf32>
    %180 = vector.multi_reduction <add>, %179, %cst_76 [2] : vector<2x24x128xf32> to vector<2x24xf32>
    %181 = vector.broadcast %29 : vector<1x1xf32> to vector<2x24xf32>
    %182 = arith.addf %180, %181 : vector<2x24xf32>
    %cst_77 = arith.constant dense<0xFF800000> : vector<2xf32>
    %183 = vector.multi_reduction <maximumf>, %182, %cst_77 [1] : vector<2x24xf32> to vector<2xf32>
    %184 = vector.shape_cast %183 : vector<2xf32> to vector<2x1xf32>
    %185 = vector.broadcast %184 : vector<2x1xf32> to vector<2x24xf32>
    %186 = arith.subf %182, %185 : vector<2x24xf32>
    %187 = math.exp %186 : vector<2x24xf32>
    %cst_78 = arith.constant dense<0.000000e+00> : vector<2xf32>
    %188 = vector.multi_reduction <add>, %187, %cst_78 [1] : vector<2x24xf32> to vector<2xf32>
    %189 = vector.shape_cast %188 : vector<2xf32> to vector<2x1xf32>
    %190 = tpu.reciprocal %189 {approx = true} : vector<2x1xf32> -> vector<2x1xf32>
    %191 = vector.broadcast %190 : vector<2x1xf32> to vector<2x24xf32>
    %192 = arith.mulf %187, %191 : vector<2x24xf32>
    %193 = vector.shape_cast %192 : vector<2x24xf32> to vector<2x24x1xf32>
    %c0_79 = arith.constant 0 : index
    %c0_80 = arith.constant 0 : index
    %c0_81 = arith.constant 0 : index
    %194 = vector.load %arg16[%c0_79, %c0_80, %c0_81] : memref<2x24x16xf32, #tpu.memory_space<vmem>>, vector<2x24x16xf32>
    %195 = vector.broadcast %193 : vector<2x24x1xf32> to vector<2x24x16xf32>
    %196 = arith.mulf %195, %194 : vector<2x24x16xf32>
    %cst_82 = arith.constant dense<0.000000e+00> : vector<2x16xf32>
    %197 = vector.multi_reduction <add>, %196, %cst_82 [1] : vector<2x24x16xf32> to vector<2x16xf32>
    %198 = vector.broadcast %30 : vector<1x16xf32> to vector<2x16xf32>
    %199 = arith.addf %197, %198 : vector<2x16xf32>
    %200 = arith.addf %172, %199 : vector<2x16xf32>
    %201 = arith.index_cast %c1_i32 : i32 to index
    %c0_83 = arith.constant 0 : index
    %c0_84 = arith.constant 0 : index
    %202 = vector.load %arg12[%201, %c0_83, %c0_84] : memref<8x2x16xf32, #tpu.memory_space<vmem>>, vector<1x2x16xf32>
    %203 = vector.shape_cast %202 : vector<1x2x16xf32> to vector<2x16xf32>
    %204 = vector.shape_cast %200 : vector<2x16xf32> to vector<1x2x16xf32>
    tpu.vector_store %arg12[%201, %c0_83, %c0_84], %204 {strides = array<i32>} : memref<8x2x16xf32, #tpu.memory_space<vmem>>, vector<1x2x16xf32>,
    %c2_i32 = arith.constant 2 : i32
    %cst_85 = arith.constant dense<0xFF800000> : vector<2xf32>
    %205 = vector.multi_reduction <maximumf>, %200, %cst_85 [1] : vector<2x16xf32> to vector<2xf32>
    %206 = vector.shape_cast %205 : vector<2xf32> to vector<2x1xf32>
    %207 = vector.broadcast %206 : vector<2x1xf32> to vector<2x16xf32>
    %208 = arith.cmpf oge, %200, %207 : vector<2x16xf32>
    %c16_i32_86 = arith.constant 16 : i32
    %209 = vector.broadcast %c16_i32_86 : i32 to vector<2x16xi32>
    %210 = arith.select %208, %31, %209 : vector<2x16xi1>, vector<2x16xi32>
    %cst_87 = arith.constant dense<2147483647> : vector<2xi32>
    %211 = vector.multi_reduction <minsi>, %210, %cst_87 [1] : vector<2x16xi32> to vector<2xi32>
    %212 = vector.shape_cast %211 : vector<2xi32> to vector<2x1xi32>
    %213 = vector.broadcast %212 : vector<2x1xi32> to vector<2x16xi32>
    %214 = arith.cmpi eq, %31, %213 : vector<2x16xi32>
    %215 = arith.extui %214 : vector<2x16xi1> to vector<2x16xi32>
    %216 = arith.sitofp %215 : vector<2x16xi32> to vector<2x16xf32>
    %217 = arith.truncf %216 : vector<2x16xf32> to vector<2x16xbf16>
    %c0_88 = arith.constant 0 : index
    %c0_89 = arith.constant 0 : index
    %218 = vector.load %arg4[%c0_88, %c0_89] : memref<16x256xbf16, #tpu.memory_space<vmem>>, vector<16x256xbf16>
    %cst_90 = arith.constant dense<0.000000e+00> : vector<2x256xf32>
    %219 = tpu.matmul %217, %218, %cst_90 {dimension_numbers = #tpu.dot_dimension_numbers<[1], [0], [0], [1], [0, 0, 1, 1], [], []>} : vector<2x16xbf16>, vector<16x256xbf16>, vector<2x256xf32> -> vector<2x256xf32>
    %220 = arith.truncf %165 : vector<2x64xf32> to vector<2x64xbf16>
    %c0_91 = arith.constant 0 : index
    %c0_92 = arith.constant 0 : index
    %221 = vector.load %arg3[%c0_91, %c0_92] : memref<64x256xbf16, #tpu.memory_space<vmem>>, vector<64x256xbf16>
    %cst_93 = arith.constant dense<0.000000e+00> : vector<2x256xf32>
    %222 = tpu.matmul %220, %221, %cst_93 {dimension_numbers = #tpu.dot_dimension_numbers<[1], [0], [0], [1], [0, 0, 1, 1], [], []>} : vector<2x64xbf16>, vector<64x256xbf16>, vector<2x256xf32> -> vector<2x256xf32>
    %223 = arith.addf %219, %222 : vector<2x256xf32>
    %224 = vector.broadcast %25 : vector<1x256xf32> to vector<2x256xf32>
    %225 = arith.addf %223, %224 : vector<2x256xf32>
    %226 = vector.extract_strided_slice %225 {offsets = [0, 0], sizes = [2, 64], strides = [1, 1]} : vector<2x256xf32> to vector<2x64xf32>
    %227 = arith.negf %226 : vector<2x64xf32>
    %228 = math.exp %227 : vector<2x64xf32>
    %cst_94 = arith.constant 1.000000e+00 : f32
    %229 = vector.broadcast %cst_94 : f32 to vector<2x64xf32>
    %230 = arith.addf %229, %228 : vector<2x64xf32>
    %231 = arith.divf %229, %230 : vector<2x64xf32>
    %232 = vector.extract_strided_slice %225 {offsets = [0, 64], sizes = [2, 64], strides = [1, 1]} : vector<2x256xf32> to vector<2x64xf32>
    %233 = arith.negf %232 : vector<2x64xf32>
    %234 = math.exp %233 : vector<2x64xf32>
    %cst_95 = arith.constant 1.000000e+00 : f32
    %235 = vector.broadcast %cst_95 : f32 to vector<2x64xf32>
    %236 = arith.addf %235, %234 : vector<2x64xf32>
    %237 = arith.divf %235, %236 : vector<2x64xf32>
    %238 = vector.extract_strided_slice %225 {offsets = [0, 128], sizes = [2, 64], strides = [1, 1]} : vector<2x256xf32> to vector<2x64xf32>
    %239 = math.tanh %238 : vector<2x64xf32>
    %240 = vector.extract_strided_slice %225 {offsets = [0, 192], sizes = [2, 64], strides = [1, 1]} : vector<2x256xf32> to vector<2x64xf32>
    %241 = arith.negf %240 : vector<2x64xf32>
    %242 = math.exp %241 : vector<2x64xf32>
    %cst_96 = arith.constant 1.000000e+00 : f32
    %243 = vector.broadcast %cst_96 : f32 to vector<2x64xf32>
    %244 = arith.addf %243, %242 : vector<2x64xf32>
    %245 = arith.divf %243, %244 : vector<2x64xf32>
    %246 = arith.mulf %237, %163 : vector<2x64xf32>
    %247 = arith.mulf %231, %239 : vector<2x64xf32>
    %248 = arith.addf %246, %247 : vector<2x64xf32>
    %249 = math.tanh %248 : vector<2x64xf32>
    %250 = arith.mulf %245, %249 : vector<2x64xf32>
    %251 = arith.truncf %250 : vector<2x64xf32> to vector<2x64xbf16>
    %c0_97 = arith.constant 0 : index
    %c0_98 = arith.constant 0 : index
    %252 = vector.load %arg7[%c0_97, %c0_98] : memref<64x144xbf16, #tpu.memory_space<vmem>>, vector<64x144xbf16>
    %cst_99 = arith.constant dense<0.000000e+00> : vector<2x144xf32>
    %253 = tpu.matmul %251, %252, %cst_99 {dimension_numbers = #tpu.dot_dimension_numbers<[1], [0], [0], [1], [0, 0, 1, 1], [], []>} : vector<2x64xbf16>, vector<64x144xbf16>, vector<2x144xf32> -> vector<2x144xf32>
    %254 = vector.broadcast %26 : vector<1x144xf32> to vector<2x144xf32>
    %255 = arith.addf %253, %254 : vector<2x144xf32>
    %256 = vector.extract_strided_slice %255 {offsets = [0, 0], sizes = [2, 128], strides = [1, 1]} : vector<2x144xf32> to vector<2x128xf32>
    %257 = vector.extract_strided_slice %255 {offsets = [0, 128], sizes = [2, 16], strides = [1, 1]} : vector<2x144xf32> to vector<2x16xf32>
    %258 = vector.shape_cast %256 : vector<2x128xf32> to vector<2x1x128xf32>
    %c0_100 = arith.constant 0 : index
    %c0_101 = arith.constant 0 : index
    %c0_102 = arith.constant 0 : index
    %259 = vector.load %arg15[%c0_100, %c0_101, %c0_102] : memref<2x24x128xf32, #tpu.memory_space<vmem>>, vector<2x24x128xf32>
    %260 = vector.broadcast %258 : vector<2x1x128xf32> to vector<2x24x128xf32>
    %261 = arith.addf %260, %259 : vector<2x24x128xf32>
    %262 = math.tanh %261 : vector<2x24x128xf32>
    %263 = vector.broadcast %28 : vector<1x1x128xf32> to vector<2x24x128xf32>
    %264 = arith.mulf %262, %263 : vector<2x24x128xf32>
    %cst_103 = arith.constant dense<0.000000e+00> : vector<2x24xf32>
    %265 = vector.multi_reduction <add>, %264, %cst_103 [2] : vector<2x24x128xf32> to vector<2x24xf32>
    %266 = vector.broadcast %29 : vector<1x1xf32> to vector<2x24xf32>
    %267 = arith.addf %265, %266 : vector<2x24xf32>
    %cst_104 = arith.constant dense<0xFF800000> : vector<2xf32>
    %268 = vector.multi_reduction <maximumf>, %267, %cst_104 [1] : vector<2x24xf32> to vector<2xf32>
    %269 = vector.shape_cast %268 : vector<2xf32> to vector<2x1xf32>
    %270 = vector.broadcast %269 : vector<2x1xf32> to vector<2x24xf32>
    %271 = arith.subf %267, %270 : vector<2x24xf32>
    %272 = math.exp %271 : vector<2x24xf32>
    %cst_105 = arith.constant dense<0.000000e+00> : vector<2xf32>
    %273 = vector.multi_reduction <add>, %272, %cst_105 [1] : vector<2x24xf32> to vector<2xf32>
    %274 = vector.shape_cast %273 : vector<2xf32> to vector<2x1xf32>
    %275 = tpu.reciprocal %274 {approx = true} : vector<2x1xf32> -> vector<2x1xf32>
    %276 = vector.broadcast %275 : vector<2x1xf32> to vector<2x24xf32>
    %277 = arith.mulf %272, %276 : vector<2x24xf32>
    %278 = vector.shape_cast %277 : vector<2x24xf32> to vector<2x24x1xf32>
    %c0_106 = arith.constant 0 : index
    %c0_107 = arith.constant 0 : index
    %c0_108 = arith.constant 0 : index
    %279 = vector.load %arg16[%c0_106, %c0_107, %c0_108] : memref<2x24x16xf32, #tpu.memory_space<vmem>>, vector<2x24x16xf32>
    %280 = vector.broadcast %278 : vector<2x24x1xf32> to vector<2x24x16xf32>
    %281 = arith.mulf %280, %279 : vector<2x24x16xf32>
    %cst_109 = arith.constant dense<0.000000e+00> : vector<2x16xf32>
    %282 = vector.multi_reduction <add>, %281, %cst_109 [1] : vector<2x24x16xf32> to vector<2x16xf32>
    %283 = vector.broadcast %30 : vector<1x16xf32> to vector<2x16xf32>
    %284 = arith.addf %282, %283 : vector<2x16xf32>
    %285 = arith.addf %257, %284 : vector<2x16xf32>
    %286 = arith.index_cast %c2_i32 : i32 to index
    %c0_110 = arith.constant 0 : index
    %c0_111 = arith.constant 0 : index
    %287 = vector.load %arg12[%286, %c0_110, %c0_111] : memref<8x2x16xf32, #tpu.memory_space<vmem>>, vector<1x2x16xf32>
    %288 = vector.shape_cast %287 : vector<1x2x16xf32> to vector<2x16xf32>
    %289 = vector.shape_cast %285 : vector<2x16xf32> to vector<1x2x16xf32>
    tpu.vector_store %arg12[%286, %c0_110, %c0_111], %289 {strides = array<i32>} : memref<8x2x16xf32, #tpu.memory_space<vmem>>, vector<1x2x16xf32>,
    %c3_i32 = arith.constant 3 : i32
    %cst_112 = arith.constant dense<0xFF800000> : vector<2xf32>
    %290 = vector.multi_reduction <maximumf>, %285, %cst_112 [1] : vector<2x16xf32> to vector<2xf32>
    %291 = vector.shape_cast %290 : vector<2xf32> to vector<2x1xf32>
    %292 = vector.broadcast %291 : vector<2x1xf32> to vector<2x16xf32>
    %293 = arith.cmpf oge, %285, %292 : vector<2x16xf32>
    %c16_i32_113 = arith.constant 16 : i32
    %294 = vector.broadcast %c16_i32_113 : i32 to vector<2x16xi32>
    %295 = arith.select %293, %31, %294 : vector<2x16xi1>, vector<2x16xi32>
    %cst_114 = arith.constant dense<2147483647> : vector<2xi32>
    %296 = vector.multi_reduction <minsi>, %295, %cst_114 [1] : vector<2x16xi32> to vector<2xi32>
    %297 = vector.shape_cast %296 : vector<2xi32> to vector<2x1xi32>
    %298 = vector.broadcast %297 : vector<2x1xi32> to vector<2x16xi32>
    %299 = arith.cmpi eq, %31, %298 : vector<2x16xi32>
    %300 = arith.extui %299 : vector<2x16xi1> to vector<2x16xi32>
    %301 = arith.sitofp %300 : vector<2x16xi32> to vector<2x16xf32>
    %302 = arith.truncf %301 : vector<2x16xf32> to vector<2x16xbf16>
    %c0_115 = arith.constant 0 : index
    %c0_116 = arith.constant 0 : index
    %303 = vector.load %arg4[%c0_115, %c0_116] : memref<16x256xbf16, #tpu.memory_space<vmem>>, vector<16x256xbf16>
    %cst_117 = arith.constant dense<0.000000e+00> : vector<2x256xf32>
    %304 = tpu.matmul %302, %303, %cst_117 {dimension_numbers = #tpu.dot_dimension_numbers<[1], [0], [0], [1], [0, 0, 1, 1], [], []>} : vector<2x16xbf16>, vector<16x256xbf16>, vector<2x256xf32> -> vector<2x256xf32>
    %305 = arith.truncf %250 : vector<2x64xf32> to vector<2x64xbf16>
    %c0_118 = arith.constant 0 : index
    %c0_119 = arith.constant 0 : index
    %306 = vector.load %arg3[%c0_118, %c0_119] : memref<64x256xbf16, #tpu.memory_space<vmem>>, vector<64x256xbf16>
    %cst_120 = arith.constant dense<0.000000e+00> : vector<2x256xf32>
    %307 = tpu.matmul %305, %306, %cst_120 {dimension_numbers = #tpu.dot_dimension_numbers<[1], [0], [0], [1], [0, 0, 1, 1], [], []>} : vector<2x64xbf16>, vector<64x256xbf16>, vector<2x256xf32> -> vector<2x256xf32>
    %308 = arith.addf %304, %307 : vector<2x256xf32>
    %309 = vector.broadcast %25 : vector<1x256xf32> to vector<2x256xf32>
    %310 = arith.addf %308, %309 : vector<2x256xf32>
    %311 = vector.extract_strided_slice %310 {offsets = [0, 0], sizes = [2, 64], strides = [1, 1]} : vector<2x256xf32> to vector<2x64xf32>
    %312 = arith.negf %311 : vector<2x64xf32>
    %313 = math.exp %312 : vector<2x64xf32>
    %cst_121 = arith.constant 1.000000e+00 : f32
    %314 = vector.broadcast %cst_121 : f32 to vector<2x64xf32>
    %315 = arith.addf %314, %313 : vector<2x64xf32>
    %316 = arith.divf %314, %315 : vector<2x64xf32>
    %317 = vector.extract_strided_slice %310 {offsets = [0, 64], sizes = [2, 64], strides = [1, 1]} : vector<2x256xf32> to vector<2x64xf32>
    %318 = arith.negf %317 : vector<2x64xf32>
    %319 = math.exp %318 : vector<2x64xf32>
    %cst_122 = arith.constant 1.000000e+00 : f32
    %320 = vector.broadcast %cst_122 : f32 to vector<2x64xf32>
    %321 = arith.addf %320, %319 : vector<2x64xf32>
    %322 = arith.divf %320, %321 : vector<2x64xf32>
    %323 = vector.extract_strided_slice %310 {offsets = [0, 128], sizes = [2, 64], strides = [1, 1]} : vector<2x256xf32> to vector<2x64xf32>
    %324 = math.tanh %323 : vector<2x64xf32>
    %325 = vector.extract_strided_slice %310 {offsets = [0, 192], sizes = [2, 64], strides = [1, 1]} : vector<2x256xf32> to vector<2x64xf32>
    %326 = arith.negf %325 : vector<2x64xf32>
    %327 = math.exp %326 : vector<2x64xf32>
    %cst_123 = arith.constant 1.000000e+00 : f32
    %328 = vector.broadcast %cst_123 : f32 to vector<2x64xf32>
    %329 = arith.addf %328, %327 : vector<2x64xf32>
    %330 = arith.divf %328, %329 : vector<2x64xf32>
    %331 = arith.mulf %322, %248 : vector<2x64xf32>
    %332 = arith.mulf %316, %324 : vector<2x64xf32>
    %333 = arith.addf %331, %332 : vector<2x64xf32>
    %334 = math.tanh %333 : vector<2x64xf32>
    %335 = arith.mulf %330, %334 : vector<2x64xf32>
    %336 = arith.truncf %335 : vector<2x64xf32> to vector<2x64xbf16>
    %c0_124 = arith.constant 0 : index
    %c0_125 = arith.constant 0 : index
    %337 = vector.load %arg7[%c0_124, %c0_125] : memref<64x144xbf16, #tpu.memory_space<vmem>>, vector<64x144xbf16>
    %cst_126 = arith.constant dense<0.000000e+00> : vector<2x144xf32>
    %338 = tpu.matmul %336, %337, %cst_126 {dimension_numbers = #tpu.dot_dimension_numbers<[1], [0], [0], [1], [0, 0, 1, 1], [], []>} : vector<2x64xbf16>, vector<64x144xbf16>, vector<2x144xf32> -> vector<2x144xf32>
    %339 = vector.broadcast %26 : vector<1x144xf32> to vector<2x144xf32>
    %340 = arith.addf %338, %339 : vector<2x144xf32>
    %341 = vector.extract_strided_slice %340 {offsets = [0, 0], sizes = [2, 128], strides = [1, 1]} : vector<2x144xf32> to vector<2x128xf32>
    %342 = vector.extract_strided_slice %340 {offsets = [0, 128], sizes = [2, 16], strides = [1, 1]} : vector<2x144xf32> to vector<2x16xf32>
    %343 = vector.shape_cast %341 : vector<2x128xf32> to vector<2x1x128xf32>
    %c0_127 = arith.constant 0 : index
    %c0_128 = arith.constant 0 : index
    %c0_129 = arith.constant 0 : index
    %344 = vector.load %arg15[%c0_127, %c0_128, %c0_129] : memref<2x24x128xf32, #tpu.memory_space<vmem>>, vector<2x24x128xf32>
    %345 = vector.broadcast %343 : vector<2x1x128xf32> to vector<2x24x128xf32>
    %346 = arith.addf %345, %344 : vector<2x24x128xf32>
    %347 = math.tanh %346 : vector<2x24x128xf32>
    %348 = vector.broadcast %28 : vector<1x1x128xf32> to vector<2x24x128xf32>
    %349 = arith.mulf %347, %348 : vector<2x24x128xf32>
    %cst_130 = arith.constant dense<0.000000e+00> : vector<2x24xf32>
    %350 = vector.multi_reduction <add>, %349, %cst_130 [2] : vector<2x24x128xf32> to vector<2x24xf32>
    %351 = vector.broadcast %29 : vector<1x1xf32> to vector<2x24xf32>
    %352 = arith.addf %350, %351 : vector<2x24xf32>
    %cst_131 = arith.constant dense<0xFF800000> : vector<2xf32>
    %353 = vector.multi_reduction <maximumf>, %352, %cst_131 [1] : vector<2x24xf32> to vector<2xf32>
    %354 = vector.shape_cast %353 : vector<2xf32> to vector<2x1xf32>
    %355 = vector.broadcast %354 : vector<2x1xf32> to vector<2x24xf32>
    %356 = arith.subf %352, %355 : vector<2x24xf32>
    %357 = math.exp %356 : vector<2x24xf32>
    %cst_132 = arith.constant dense<0.000000e+00> : vector<2xf32>
    %358 = vector.multi_reduction <add>, %357, %cst_132 [1] : vector<2x24xf32> to vector<2xf32>
    %359 = vector.shape_cast %358 : vector<2xf32> to vector<2x1xf32>
    %360 = tpu.reciprocal %359 {approx = true} : vector<2x1xf32> -> vector<2x1xf32>
    %361 = vector.broadcast %360 : vector<2x1xf32> to vector<2x24xf32>
    %362 = arith.mulf %357, %361 : vector<2x24xf32>
    %363 = vector.shape_cast %362 : vector<2x24xf32> to vector<2x24x1xf32>
    %c0_133 = arith.constant 0 : index
    %c0_134 = arith.constant 0 : index
    %c0_135 = arith.constant 0 : index
    %364 = vector.load %arg16[%c0_133, %c0_134, %c0_135] : memref<2x24x16xf32, #tpu.memory_space<vmem>>, vector<2x24x16xf32>
    %365 = vector.broadcast %363 : vector<2x24x1xf32> to vector<2x24x16xf32>
    %366 = arith.mulf %365, %364 : vector<2x24x16xf32>
    %cst_136 = arith.constant dense<0.000000e+00> : vector<2x16xf32>
    %367 = vector.multi_reduction <add>, %366, %cst_136 [1] : vector<2x24x16xf32> to vector<2x16xf32>
    %368 = vector.broadcast %30 : vector<1x16xf32> to vector<2x16xf32>
    %369 = arith.addf %367, %368 : vector<2x16xf32>
    %370 = arith.addf %342, %369 : vector<2x16xf32>
    %371 = arith.index_cast %c3_i32 : i32 to index
    %c0_137 = arith.constant 0 : index
    %c0_138 = arith.constant 0 : index
    %372 = vector.load %arg12[%371, %c0_137, %c0_138] : memref<8x2x16xf32, #tpu.memory_space<vmem>>, vector<1x2x16xf32>
    %373 = vector.shape_cast %372 : vector<1x2x16xf32> to vector<2x16xf32>
    %374 = vector.shape_cast %370 : vector<2x16xf32> to vector<1x2x16xf32>
    tpu.vector_store %arg12[%371, %c0_137, %c0_138], %374 {strides = array<i32>} : memref<8x2x16xf32, #tpu.memory_space<vmem>>, vector<1x2x16xf32>,
    %c4_i32 = arith.constant 4 : i32
    %cst_139 = arith.constant dense<0xFF800000> : vector<2xf32>
    %375 = vector.multi_reduction <maximumf>, %370, %cst_139 [1] : vector<2x16xf32> to vector<2xf32>
    %376 = vector.shape_cast %375 : vector<2xf32> to vector<2x1xf32>
    %377 = vector.broadcast %376 : vector<2x1xf32> to vector<2x16xf32>
    %378 = arith.cmpf oge, %370, %377 : vector<2x16xf32>
    %c16_i32_140 = arith.constant 16 : i32
    %379 = vector.broadcast %c16_i32_140 : i32 to vector<2x16xi32>
    %380 = arith.select %378, %31, %379 : vector<2x16xi1>, vector<2x16xi32>
    %cst_141 = arith.constant dense<2147483647> : vector<2xi32>
    %381 = vector.multi_reduction <minsi>, %380, %cst_141 [1] : vector<2x16xi32> to vector<2xi32>
    %382 = vector.shape_cast %381 : vector<2xi32> to vector<2x1xi32>
    %383 = vector.broadcast %382 : vector<2x1xi32> to vector<2x16xi32>
    %384 = arith.cmpi eq, %31, %383 : vector<2x16xi32>
    %385 = arith.extui %384 : vector<2x16xi1> to vector<2x16xi32>
    %386 = arith.sitofp %385 : vector<2x16xi32> to vector<2x16xf32>
    %387 = arith.truncf %386 : vector<2x16xf32> to vector<2x16xbf16>
    %c0_142 = arith.constant 0 : index
    %c0_143 = arith.constant 0 : index
    %388 = vector.load %arg4[%c0_142, %c0_143] : memref<16x256xbf16, #tpu.memory_space<vmem>>, vector<16x256xbf16>
    %cst_144 = arith.constant dense<0.000000e+00> : vector<2x256xf32>
    %389 = tpu.matmul %387, %388, %cst_144 {dimension_numbers = #tpu.dot_dimension_numbers<[1], [0], [0], [1], [0, 0, 1, 1], [], []>} : vector<2x16xbf16>, vector<16x256xbf16>, vector<2x256xf32> -> vector<2x256xf32>
    %390 = arith.truncf %335 : vector<2x64xf32> to vector<2x64xbf16>
    %c0_145 = arith.constant 0 : index
    %c0_146 = arith.constant 0 : index
    %391 = vector.load %arg3[%c0_145, %c0_146] : memref<64x256xbf16, #tpu.memory_space<vmem>>, vector<64x256xbf16>
    %cst_147 = arith.constant dense<0.000000e+00> : vector<2x256xf32>
    %392 = tpu.matmul %390, %391, %cst_147 {dimension_numbers = #tpu.dot_dimension_numbers<[1], [0], [0], [1], [0, 0, 1, 1], [], []>} : vector<2x64xbf16>, vector<64x256xbf16>, vector<2x256xf32> -> vector<2x256xf32>
    %393 = arith.addf %389, %392 : vector<2x256xf32>
    %394 = vector.broadcast %25 : vector<1x256xf32> to vector<2x256xf32>
    %395 = arith.addf %393, %394 : vector<2x256xf32>
    %396 = vector.extract_strided_slice %395 {offsets = [0, 0], sizes = [2, 64], strides = [1, 1]} : vector<2x256xf32> to vector<2x64xf32>
    %397 = arith.negf %396 : vector<2x64xf32>
    %398 = math.exp %397 : vector<2x64xf32>
    %cst_148 = arith.constant 1.000000e+00 : f32
    %399 = vector.broadcast %cst_148 : f32 to vector<2x64xf32>
    %400 = arith.addf %399, %398 : vector<2x64xf32>
    %401 = arith.divf %399, %400 : vector<2x64xf32>
    %402 = vector.extract_strided_slice %395 {offsets = [0, 64], sizes = [2, 64], strides = [1, 1]} : vector<2x256xf32> to vector<2x64xf32>
    %403 = arith.negf %402 : vector<2x64xf32>
    %404 = math.exp %403 : vector<2x64xf32>
    %cst_149 = arith.constant 1.000000e+00 : f32
    %405 = vector.broadcast %cst_149 : f32 to vector<2x64xf32>
    %406 = arith.addf %405, %404 : vector<2x64xf32>
    %407 = arith.divf %405, %406 : vector<2x64xf32>
    %408 = vector.extract_strided_slice %395 {offsets = [0, 128], sizes = [2, 64], strides = [1, 1]} : vector<2x256xf32> to vector<2x64xf32>
    %409 = math.tanh %408 : vector<2x64xf32>
    %410 = vector.extract_strided_slice %395 {offsets = [0, 192], sizes = [2, 64], strides = [1, 1]} : vector<2x256xf32> to vector<2x64xf32>
    %411 = arith.negf %410 : vector<2x64xf32>
    %412 = math.exp %411 : vector<2x64xf32>
    %cst_150 = arith.constant 1.000000e+00 : f32
    %413 = vector.broadcast %cst_150 : f32 to vector<2x64xf32>
    %414 = arith.addf %413, %412 : vector<2x64xf32>
    %415 = arith.divf %413, %414 : vector<2x64xf32>
    %416 = arith.mulf %407, %333 : vector<2x64xf32>
    %417 = arith.mulf %401, %409 : vector<2x64xf32>
    %418 = arith.addf %416, %417 : vector<2x64xf32>
    %419 = math.tanh %418 : vector<2x64xf32>
    %420 = arith.mulf %415, %419 : vector<2x64xf32>
    %421 = arith.truncf %420 : vector<2x64xf32> to vector<2x64xbf16>
    %c0_151 = arith.constant 0 : index
    %c0_152 = arith.constant 0 : index
    %422 = vector.load %arg7[%c0_151, %c0_152] : memref<64x144xbf16, #tpu.memory_space<vmem>>, vector<64x144xbf16>
    %cst_153 = arith.constant dense<0.000000e+00> : vector<2x144xf32>
    %423 = tpu.matmul %421, %422, %cst_153 {dimension_numbers = #tpu.dot_dimension_numbers<[1], [0], [0], [1], [0, 0, 1, 1], [], []>} : vector<2x64xbf16>, vector<64x144xbf16>, vector<2x144xf32> -> vector<2x144xf32>
    %424 = vector.broadcast %26 : vector<1x144xf32> to vector<2x144xf32>
    %425 = arith.addf %423, %424 : vector<2x144xf32>
    %426 = vector.extract_strided_slice %425 {offsets = [0, 0], sizes = [2, 128], strides = [1, 1]} : vector<2x144xf32> to vector<2x128xf32>
    %427 = vector.extract_strided_slice %425 {offsets = [0, 128], sizes = [2, 16], strides = [1, 1]} : vector<2x144xf32> to vector<2x16xf32>
    %428 = vector.shape_cast %426 : vector<2x128xf32> to vector<2x1x128xf32>
    %c0_154 = arith.constant 0 : index
    %c0_155 = arith.constant 0 : index
    %c0_156 = arith.constant 0 : index
    %429 = vector.load %arg15[%c0_154, %c0_155, %c0_156] : memref<2x24x128xf32, #tpu.memory_space<vmem>>, vector<2x24x128xf32>
    %430 = vector.broadcast %428 : vector<2x1x128xf32> to vector<2x24x128xf32>
    %431 = arith.addf %430, %429 : vector<2x24x128xf32>
    %432 = math.tanh %431 : vector<2x24x128xf32>
    %433 = vector.broadcast %28 : vector<1x1x128xf32> to vector<2x24x128xf32>
    %434 = arith.mulf %432, %433 : vector<2x24x128xf32>
    %cst_157 = arith.constant dense<0.000000e+00> : vector<2x24xf32>
    %435 = vector.multi_reduction <add>, %434, %cst_157 [2] : vector<2x24x128xf32> to vector<2x24xf32>
    %436 = vector.broadcast %29 : vector<1x1xf32> to vector<2x24xf32>
    %437 = arith.addf %435, %436 : vector<2x24xf32>
    %cst_158 = arith.constant dense<0xFF800000> : vector<2xf32>
    %438 = vector.multi_reduction <maximumf>, %437, %cst_158 [1] : vector<2x24xf32> to vector<2xf32>
    %439 = vector.shape_cast %438 : vector<2xf32> to vector<2x1xf32>
    %440 = vector.broadcast %439 : vector<2x1xf32> to vector<2x24xf32>
    %441 = arith.subf %437, %440 : vector<2x24xf32>
    %442 = math.exp %441 : vector<2x24xf32>
    %cst_159 = arith.constant dense<0.000000e+00> : vector<2xf32>
    %443 = vector.multi_reduction <add>, %442, %cst_159 [1] : vector<2x24xf32> to vector<2xf32>
    %444 = vector.shape_cast %443 : vector<2xf32> to vector<2x1xf32>
    %445 = tpu.reciprocal %444 {approx = true} : vector<2x1xf32> -> vector<2x1xf32>
    %446 = vector.broadcast %445 : vector<2x1xf32> to vector<2x24xf32>
    %447 = arith.mulf %442, %446 : vector<2x24xf32>
    %448 = vector.shape_cast %447 : vector<2x24xf32> to vector<2x24x1xf32>
    %c0_160 = arith.constant 0 : index
    %c0_161 = arith.constant 0 : index
    %c0_162 = arith.constant 0 : index
    %449 = vector.load %arg16[%c0_160, %c0_161, %c0_162] : memref<2x24x16xf32, #tpu.memory_space<vmem>>, vector<2x24x16xf32>
    %450 = vector.broadcast %448 : vector<2x24x1xf32> to vector<2x24x16xf32>
    %451 = arith.mulf %450, %449 : vector<2x24x16xf32>
    %cst_163 = arith.constant dense<0.000000e+00> : vector<2x16xf32>
    %452 = vector.multi_reduction <add>, %451, %cst_163 [1] : vector<2x24x16xf32> to vector<2x16xf32>
    %453 = vector.broadcast %30 : vector<1x16xf32> to vector<2x16xf32>
    %454 = arith.addf %452, %453 : vector<2x16xf32>
    %455 = arith.addf %427, %454 : vector<2x16xf32>
    %456 = arith.index_cast %c4_i32 : i32 to index
    %c0_164 = arith.constant 0 : index
    %c0_165 = arith.constant 0 : index
    %457 = vector.load %arg12[%456, %c0_164, %c0_165] : memref<8x2x16xf32, #tpu.memory_space<vmem>>, vector<1x2x16xf32>
    %458 = vector.shape_cast %457 : vector<1x2x16xf32> to vector<2x16xf32>
    %459 = vector.shape_cast %455 : vector<2x16xf32> to vector<1x2x16xf32>
    tpu.vector_store %arg12[%456, %c0_164, %c0_165], %459 {strides = array<i32>} : memref<8x2x16xf32, #tpu.memory_space<vmem>>, vector<1x2x16xf32>,
    %c5_i32 = arith.constant 5 : i32
    %cst_166 = arith.constant dense<0xFF800000> : vector<2xf32>
    %460 = vector.multi_reduction <maximumf>, %455, %cst_166 [1] : vector<2x16xf32> to vector<2xf32>
    %461 = vector.shape_cast %460 : vector<2xf32> to vector<2x1xf32>
    %462 = vector.broadcast %461 : vector<2x1xf32> to vector<2x16xf32>
    %463 = arith.cmpf oge, %455, %462 : vector<2x16xf32>
    %c16_i32_167 = arith.constant 16 : i32
    %464 = vector.broadcast %c16_i32_167 : i32 to vector<2x16xi32>
    %465 = arith.select %463, %31, %464 : vector<2x16xi1>, vector<2x16xi32>
    %cst_168 = arith.constant dense<2147483647> : vector<2xi32>
    %466 = vector.multi_reduction <minsi>, %465, %cst_168 [1] : vector<2x16xi32> to vector<2xi32>
    %467 = vector.shape_cast %466 : vector<2xi32> to vector<2x1xi32>
    %468 = vector.broadcast %467 : vector<2x1xi32> to vector<2x16xi32>
    %469 = arith.cmpi eq, %31, %468 : vector<2x16xi32>
    %470 = arith.extui %469 : vector<2x16xi1> to vector<2x16xi32>
    %471 = arith.sitofp %470 : vector<2x16xi32> to vector<2x16xf32>
    %472 = arith.truncf %471 : vector<2x16xf32> to vector<2x16xbf16>
    %c0_169 = arith.constant 0 : index
    %c0_170 = arith.constant 0 : index
    %473 = vector.load %arg4[%c0_169, %c0_170] : memref<16x256xbf16, #tpu.memory_space<vmem>>, vector<16x256xbf16>
    %cst_171 = arith.constant dense<0.000000e+00> : vector<2x256xf32>
    %474 = tpu.matmul %472, %473, %cst_171 {dimension_numbers = #tpu.dot_dimension_numbers<[1], [0], [0], [1], [0, 0, 1, 1], [], []>} : vector<2x16xbf16>, vector<16x256xbf16>, vector<2x256xf32> -> vector<2x256xf32>
    %475 = arith.truncf %420 : vector<2x64xf32> to vector<2x64xbf16>
    %c0_172 = arith.constant 0 : index
    %c0_173 = arith.constant 0 : index
    %476 = vector.load %arg3[%c0_172, %c0_173] : memref<64x256xbf16, #tpu.memory_space<vmem>>, vector<64x256xbf16>
    %cst_174 = arith.constant dense<0.000000e+00> : vector<2x256xf32>
    %477 = tpu.matmul %475, %476, %cst_174 {dimension_numbers = #tpu.dot_dimension_numbers<[1], [0], [0], [1], [0, 0, 1, 1], [], []>} : vector<2x64xbf16>, vector<64x256xbf16>, vector<2x256xf32> -> vector<2x256xf32>
    %478 = arith.addf %474, %477 : vector<2x256xf32>
    %479 = vector.broadcast %25 : vector<1x256xf32> to vector<2x256xf32>
    %480 = arith.addf %478, %479 : vector<2x256xf32>
    %481 = vector.extract_strided_slice %480 {offsets = [0, 0], sizes = [2, 64], strides = [1, 1]} : vector<2x256xf32> to vector<2x64xf32>
    %482 = arith.negf %481 : vector<2x64xf32>
    %483 = math.exp %482 : vector<2x64xf32>
    %cst_175 = arith.constant 1.000000e+00 : f32
    %484 = vector.broadcast %cst_175 : f32 to vector<2x64xf32>
    %485 = arith.addf %484, %483 : vector<2x64xf32>
    %486 = arith.divf %484, %485 : vector<2x64xf32>
    %487 = vector.extract_strided_slice %480 {offsets = [0, 64], sizes = [2, 64], strides = [1, 1]} : vector<2x256xf32> to vector<2x64xf32>
    %488 = arith.negf %487 : vector<2x64xf32>
    %489 = math.exp %488 : vector<2x64xf32>
    %cst_176 = arith.constant 1.000000e+00 : f32
    %490 = vector.broadcast %cst_176 : f32 to vector<2x64xf32>
    %491 = arith.addf %490, %489 : vector<2x64xf32>
    %492 = arith.divf %490, %491 : vector<2x64xf32>
    %493 = vector.extract_strided_slice %480 {offsets = [0, 128], sizes = [2, 64], strides = [1, 1]} : vector<2x256xf32> to vector<2x64xf32>
    %494 = math.tanh %493 : vector<2x64xf32>
    %495 = vector.extract_strided_slice %480 {offsets = [0, 192], sizes = [2, 64], strides = [1, 1]} : vector<2x256xf32> to vector<2x64xf32>
    %496 = arith.negf %495 : vector<2x64xf32>
    %497 = math.exp %496 : vector<2x64xf32>
    %cst_177 = arith.constant 1.000000e+00 : f32
    %498 = vector.broadcast %cst_177 : f32 to vector<2x64xf32>
    %499 = arith.addf %498, %497 : vector<2x64xf32>
    %500 = arith.divf %498, %499 : vector<2x64xf32>
    %501 = arith.mulf %492, %418 : vector<2x64xf32>
    %502 = arith.mulf %486, %494 : vector<2x64xf32>
    %503 = arith.addf %501, %502 : vector<2x64xf32>
    %504 = math.tanh %503 : vector<2x64xf32>
    %505 = arith.mulf %500, %504 : vector<2x64xf32>
    %506 = arith.truncf %505 : vector<2x64xf32> to vector<2x64xbf16>
    %c0_178 = arith.constant 0 : index
    %c0_179 = arith.constant 0 : index
    %507 = vector.load %arg7[%c0_178, %c0_179] : memref<64x144xbf16, #tpu.memory_space<vmem>>, vector<64x144xbf16>
    %cst_180 = arith.constant dense<0.000000e+00> : vector<2x144xf32>
    %508 = tpu.matmul %506, %507, %cst_180 {dimension_numbers = #tpu.dot_dimension_numbers<[1], [0], [0], [1], [0, 0, 1, 1], [], []>} : vector<2x64xbf16>, vector<64x144xbf16>, vector<2x144xf32> -> vector<2x144xf32>
    %509 = vector.broadcast %26 : vector<1x144xf32> to vector<2x144xf32>
    %510 = arith.addf %508, %509 : vector<2x144xf32>
    %511 = vector.extract_strided_slice %510 {offsets = [0, 0], sizes = [2, 128], strides = [1, 1]} : vector<2x144xf32> to vector<2x128xf32>
    %512 = vector.extract_strided_slice %510 {offsets = [0, 128], sizes = [2, 16], strides = [1, 1]} : vector<2x144xf32> to vector<2x16xf32>
    %513 = vector.shape_cast %511 : vector<2x128xf32> to vector<2x1x128xf32>
    %c0_181 = arith.constant 0 : index
    %c0_182 = arith.constant 0 : index
    %c0_183 = arith.constant 0 : index
    %514 = vector.load %arg15[%c0_181, %c0_182, %c0_183] : memref<2x24x128xf32, #tpu.memory_space<vmem>>, vector<2x24x128xf32>
    %515 = vector.broadcast %513 : vector<2x1x128xf32> to vector<2x24x128xf32>
    %516 = arith.addf %515, %514 : vector<2x24x128xf32>
    %517 = math.tanh %516 : vector<2x24x128xf32>
    %518 = vector.broadcast %28 : vector<1x1x128xf32> to vector<2x24x128xf32>
    %519 = arith.mulf %517, %518 : vector<2x24x128xf32>
    %cst_184 = arith.constant dense<0.000000e+00> : vector<2x24xf32>
    %520 = vector.multi_reduction <add>, %519, %cst_184 [2] : vector<2x24x128xf32> to vector<2x24xf32>
    %521 = vector.broadcast %29 : vector<1x1xf32> to vector<2x24xf32>
    %522 = arith.addf %520, %521 : vector<2x24xf32>
    %cst_185 = arith.constant dense<0xFF800000> : vector<2xf32>
    %523 = vector.multi_reduction <maximumf>, %522, %cst_185 [1] : vector<2x24xf32> to vector<2xf32>
    %524 = vector.shape_cast %523 : vector<2xf32> to vector<2x1xf32>
    %525 = vector.broadcast %524 : vector<2x1xf32> to vector<2x24xf32>
    %526 = arith.subf %522, %525 : vector<2x24xf32>
    %527 = math.exp %526 : vector<2x24xf32>
    %cst_186 = arith.constant dense<0.000000e+00> : vector<2xf32>
    %528 = vector.multi_reduction <add>, %527, %cst_186 [1] : vector<2x24xf32> to vector<2xf32>
    %529 = vector.shape_cast %528 : vector<2xf32> to vector<2x1xf32>
    %530 = tpu.reciprocal %529 {approx = true} : vector<2x1xf32> -> vector<2x1xf32>
    %531 = vector.broadcast %530 : vector<2x1xf32> to vector<2x24xf32>
    %532 = arith.mulf %527, %531 : vector<2x24xf32>
    %533 = vector.shape_cast %532 : vector<2x24xf32> to vector<2x24x1xf32>
    %c0_187 = arith.constant 0 : index
    %c0_188 = arith.constant 0 : index
    %c0_189 = arith.constant 0 : index
    %534 = vector.load %arg16[%c0_187, %c0_188, %c0_189] : memref<2x24x16xf32, #tpu.memory_space<vmem>>, vector<2x24x16xf32>
    %535 = vector.broadcast %533 : vector<2x24x1xf32> to vector<2x24x16xf32>
    %536 = arith.mulf %535, %534 : vector<2x24x16xf32>
    %cst_190 = arith.constant dense<0.000000e+00> : vector<2x16xf32>
    %537 = vector.multi_reduction <add>, %536, %cst_190 [1] : vector<2x24x16xf32> to vector<2x16xf32>
    %538 = vector.broadcast %30 : vector<1x16xf32> to vector<2x16xf32>
    %539 = arith.addf %537, %538 : vector<2x16xf32>
    %540 = arith.addf %512, %539 : vector<2x16xf32>
    %541 = arith.index_cast %c5_i32 : i32 to index
    %c0_191 = arith.constant 0 : index
    %c0_192 = arith.constant 0 : index
    %542 = vector.load %arg12[%541, %c0_191, %c0_192] : memref<8x2x16xf32, #tpu.memory_space<vmem>>, vector<1x2x16xf32>
    %543 = vector.shape_cast %542 : vector<1x2x16xf32> to vector<2x16xf32>
    %544 = vector.shape_cast %540 : vector<2x16xf32> to vector<1x2x16xf32>
    tpu.vector_store %arg12[%541, %c0_191, %c0_192], %544 {strides = array<i32>} : memref<8x2x16xf32, #tpu.memory_space<vmem>>, vector<1x2x16xf32>,
    %c6_i32 = arith.constant 6 : i32
    %cst_193 = arith.constant dense<0xFF800000> : vector<2xf32>
    %545 = vector.multi_reduction <maximumf>, %540, %cst_193 [1] : vector<2x16xf32> to vector<2xf32>
    %546 = vector.shape_cast %545 : vector<2xf32> to vector<2x1xf32>
    %547 = vector.broadcast %546 : vector<2x1xf32> to vector<2x16xf32>
    %548 = arith.cmpf oge, %540, %547 : vector<2x16xf32>
    %c16_i32_194 = arith.constant 16 : i32
    %549 = vector.broadcast %c16_i32_194 : i32 to vector<2x16xi32>
    %550 = arith.select %548, %31, %549 : vector<2x16xi1>, vector<2x16xi32>
    %cst_195 = arith.constant dense<2147483647> : vector<2xi32>
    %551 = vector.multi_reduction <minsi>, %550, %cst_195 [1] : vector<2x16xi32> to vector<2xi32>
    %552 = vector.shape_cast %551 : vector<2xi32> to vector<2x1xi32>
    %553 = vector.broadcast %552 : vector<2x1xi32> to vector<2x16xi32>
    %554 = arith.cmpi eq, %31, %553 : vector<2x16xi32>
    %555 = arith.extui %554 : vector<2x16xi1> to vector<2x16xi32>
    %556 = arith.sitofp %555 : vector<2x16xi32> to vector<2x16xf32>
    %557 = arith.truncf %556 : vector<2x16xf32> to vector<2x16xbf16>
    %c0_196 = arith.constant 0 : index
    %c0_197 = arith.constant 0 : index
    %558 = vector.load %arg4[%c0_196, %c0_197] : memref<16x256xbf16, #tpu.memory_space<vmem>>, vector<16x256xbf16>
    %cst_198 = arith.constant dense<0.000000e+00> : vector<2x256xf32>
    %559 = tpu.matmul %557, %558, %cst_198 {dimension_numbers = #tpu.dot_dimension_numbers<[1], [0], [0], [1], [0, 0, 1, 1], [], []>} : vector<2x16xbf16>, vector<16x256xbf16>, vector<2x256xf32> -> vector<2x256xf32>
    %560 = arith.truncf %505 : vector<2x64xf32> to vector<2x64xbf16>
    %c0_199 = arith.constant 0 : index
    %c0_200 = arith.constant 0 : index
    %561 = vector.load %arg3[%c0_199, %c0_200] : memref<64x256xbf16, #tpu.memory_space<vmem>>, vector<64x256xbf16>
    %cst_201 = arith.constant dense<0.000000e+00> : vector<2x256xf32>
    %562 = tpu.matmul %560, %561, %cst_201 {dimension_numbers = #tpu.dot_dimension_numbers<[1], [0], [0], [1], [0, 0, 1, 1], [], []>} : vector<2x64xbf16>, vector<64x256xbf16>, vector<2x256xf32> -> vector<2x256xf32>
    %563 = arith.addf %559, %562 : vector<2x256xf32>
    %564 = vector.broadcast %25 : vector<1x256xf32> to vector<2x256xf32>
    %565 = arith.addf %563, %564 : vector<2x256xf32>
    %566 = vector.extract_strided_slice %565 {offsets = [0, 0], sizes = [2, 64], strides = [1, 1]} : vector<2x256xf32> to vector<2x64xf32>
    %567 = arith.negf %566 : vector<2x64xf32>
    %568 = math.exp %567 : vector<2x64xf32>
    %cst_202 = arith.constant 1.000000e+00 : f32
    %569 = vector.broadcast %cst_202 : f32 to vector<2x64xf32>
    %570 = arith.addf %569, %568 : vector<2x64xf32>
    %571 = arith.divf %569, %570 : vector<2x64xf32>
    %572 = vector.extract_strided_slice %565 {offsets = [0, 64], sizes = [2, 64], strides = [1, 1]} : vector<2x256xf32> to vector<2x64xf32>
    %573 = arith.negf %572 : vector<2x64xf32>
    %574 = math.exp %573 : vector<2x64xf32>
    %cst_203 = arith.constant 1.000000e+00 : f32
    %575 = vector.broadcast %cst_203 : f32 to vector<2x64xf32>
    %576 = arith.addf %575, %574 : vector<2x64xf32>
    %577 = arith.divf %575, %576 : vector<2x64xf32>
    %578 = vector.extract_strided_slice %565 {offsets = [0, 128], sizes = [2, 64], strides = [1, 1]} : vector<2x256xf32> to vector<2x64xf32>
    %579 = math.tanh %578 : vector<2x64xf32>
    %580 = vector.extract_strided_slice %565 {offsets = [0, 192], sizes = [2, 64], strides = [1, 1]} : vector<2x256xf32> to vector<2x64xf32>
    %581 = arith.negf %580 : vector<2x64xf32>
    %582 = math.exp %581 : vector<2x64xf32>
    %cst_204 = arith.constant 1.000000e+00 : f32
    %583 = vector.broadcast %cst_204 : f32 to vector<2x64xf32>
    %584 = arith.addf %583, %582 : vector<2x64xf32>
    %585 = arith.divf %583, %584 : vector<2x64xf32>
    %586 = arith.mulf %577, %503 : vector<2x64xf32>
    %587 = arith.mulf %571, %579 : vector<2x64xf32>
    %588 = arith.addf %586, %587 : vector<2x64xf32>
    %589 = math.tanh %588 : vector<2x64xf32>
    %590 = arith.mulf %585, %589 : vector<2x64xf32>
    %591 = arith.truncf %590 : vector<2x64xf32> to vector<2x64xbf16>
    %c0_205 = arith.constant 0 : index
    %c0_206 = arith.constant 0 : index
    %592 = vector.load %arg7[%c0_205, %c0_206] : memref<64x144xbf16, #tpu.memory_space<vmem>>, vector<64x144xbf16>
    %cst_207 = arith.constant dense<0.000000e+00> : vector<2x144xf32>
    %593 = tpu.matmul %591, %592, %cst_207 {dimension_numbers = #tpu.dot_dimension_numbers<[1], [0], [0], [1], [0, 0, 1, 1], [], []>} : vector<2x64xbf16>, vector<64x144xbf16>, vector<2x144xf32> -> vector<2x144xf32>
    %594 = vector.broadcast %26 : vector<1x144xf32> to vector<2x144xf32>
    %595 = arith.addf %593, %594 : vector<2x144xf32>
    %596 = vector.extract_strided_slice %595 {offsets = [0, 0], sizes = [2, 128], strides = [1, 1]} : vector<2x144xf32> to vector<2x128xf32>
    %597 = vector.extract_strided_slice %595 {offsets = [0, 128], sizes = [2, 16], strides = [1, 1]} : vector<2x144xf32> to vector<2x16xf32>
    %598 = vector.shape_cast %596 : vector<2x128xf32> to vector<2x1x128xf32>
    %c0_208 = arith.constant 0 : index
    %c0_209 = arith.constant 0 : index
    %c0_210 = arith.constant 0 : index
    %599 = vector.load %arg15[%c0_208, %c0_209, %c0_210] : memref<2x24x128xf32, #tpu.memory_space<vmem>>, vector<2x24x128xf32>
    %600 = vector.broadcast %598 : vector<2x1x128xf32> to vector<2x24x128xf32>
    %601 = arith.addf %600, %599 : vector<2x24x128xf32>
    %602 = math.tanh %601 : vector<2x24x128xf32>
    %603 = vector.broadcast %28 : vector<1x1x128xf32> to vector<2x24x128xf32>
    %604 = arith.mulf %602, %603 : vector<2x24x128xf32>
    %cst_211 = arith.constant dense<0.000000e+00> : vector<2x24xf32>
    %605 = vector.multi_reduction <add>, %604, %cst_211 [2] : vector<2x24x128xf32> to vector<2x24xf32>
    %606 = vector.broadcast %29 : vector<1x1xf32> to vector<2x24xf32>
    %607 = arith.addf %605, %606 : vector<2x24xf32>
    %cst_212 = arith.constant dense<0xFF800000> : vector<2xf32>
    %608 = vector.multi_reduction <maximumf>, %607, %cst_212 [1] : vector<2x24xf32> to vector<2xf32>
    %609 = vector.shape_cast %608 : vector<2xf32> to vector<2x1xf32>
    %610 = vector.broadcast %609 : vector<2x1xf32> to vector<2x24xf32>
    %611 = arith.subf %607, %610 : vector<2x24xf32>
    %612 = math.exp %611 : vector<2x24xf32>
    %cst_213 = arith.constant dense<0.000000e+00> : vector<2xf32>
    %613 = vector.multi_reduction <add>, %612, %cst_213 [1] : vector<2x24xf32> to vector<2xf32>
    %614 = vector.shape_cast %613 : vector<2xf32> to vector<2x1xf32>
    %615 = tpu.reciprocal %614 {approx = true} : vector<2x1xf32> -> vector<2x1xf32>
    %616 = vector.broadcast %615 : vector<2x1xf32> to vector<2x24xf32>
    %617 = arith.mulf %612, %616 : vector<2x24xf32>
    %618 = vector.shape_cast %617 : vector<2x24xf32> to vector<2x24x1xf32>
    %c0_214 = arith.constant 0 : index
    %c0_215 = arith.constant 0 : index
    %c0_216 = arith.constant 0 : index
    %619 = vector.load %arg16[%c0_214, %c0_215, %c0_216] : memref<2x24x16xf32, #tpu.memory_space<vmem>>, vector<2x24x16xf32>
    %620 = vector.broadcast %618 : vector<2x24x1xf32> to vector<2x24x16xf32>
    %621 = arith.mulf %620, %619 : vector<2x24x16xf32>
    %cst_217 = arith.constant dense<0.000000e+00> : vector<2x16xf32>
    %622 = vector.multi_reduction <add>, %621, %cst_217 [1] : vector<2x24x16xf32> to vector<2x16xf32>
    %623 = vector.broadcast %30 : vector<1x16xf32> to vector<2x16xf32>
    %624 = arith.addf %622, %623 : vector<2x16xf32>
    %625 = arith.addf %597, %624 : vector<2x16xf32>
    %626 = arith.index_cast %c6_i32 : i32 to index
    %c0_218 = arith.constant 0 : index
    %c0_219 = arith.constant 0 : index
    %627 = vector.load %arg12[%626, %c0_218, %c0_219] : memref<8x2x16xf32, #tpu.memory_space<vmem>>, vector<1x2x16xf32>
    %628 = vector.shape_cast %627 : vector<1x2x16xf32> to vector<2x16xf32>
    %629 = vector.shape_cast %625 : vector<2x16xf32> to vector<1x2x16xf32>
    tpu.vector_store %arg12[%626, %c0_218, %c0_219], %629 {strides = array<i32>} : memref<8x2x16xf32, #tpu.memory_space<vmem>>, vector<1x2x16xf32>,
    %c7_i32 = arith.constant 7 : i32
    %cst_220 = arith.constant dense<0xFF800000> : vector<2xf32>
    %630 = vector.multi_reduction <maximumf>, %625, %cst_220 [1] : vector<2x16xf32> to vector<2xf32>
    %631 = vector.shape_cast %630 : vector<2xf32> to vector<2x1xf32>
    %632 = vector.broadcast %631 : vector<2x1xf32> to vector<2x16xf32>
    %633 = arith.cmpf oge, %625, %632 : vector<2x16xf32>
    %c16_i32_221 = arith.constant 16 : i32
    %634 = vector.broadcast %c16_i32_221 : i32 to vector<2x16xi32>
    %635 = arith.select %633, %31, %634 : vector<2x16xi1>, vector<2x16xi32>
    %cst_222 = arith.constant dense<2147483647> : vector<2xi32>
    %636 = vector.multi_reduction <minsi>, %635, %cst_222 [1] : vector<2x16xi32> to vector<2xi32>
    %637 = vector.shape_cast %636 : vector<2xi32> to vector<2x1xi32>
    %638 = vector.broadcast %637 : vector<2x1xi32> to vector<2x16xi32>
    %639 = arith.cmpi eq, %31, %638 : vector<2x16xi32>
    %640 = arith.extui %639 : vector<2x16xi1> to vector<2x16xi32>
    %641 = arith.sitofp %640 : vector<2x16xi32> to vector<2x16xf32>
    %642 = arith.truncf %641 : vector<2x16xf32> to vector<2x16xbf16>
    %c0_223 = arith.constant 0 : index
    %c0_224 = arith.constant 0 : index
    %643 = vector.load %arg4[%c0_223, %c0_224] : memref<16x256xbf16, #tpu.memory_space<vmem>>, vector<16x256xbf16>
    %cst_225 = arith.constant dense<0.000000e+00> : vector<2x256xf32>
    %644 = tpu.matmul %642, %643, %cst_225 {dimension_numbers = #tpu.dot_dimension_numbers<[1], [0], [0], [1], [0, 0, 1, 1], [], []>} : vector<2x16xbf16>, vector<16x256xbf16>, vector<2x256xf32> -> vector<2x256xf32>
    %645 = arith.truncf %590 : vector<2x64xf32> to vector<2x64xbf16>
    %c0_226 = arith.constant 0 : index
    %c0_227 = arith.constant 0 : index
    %646 = vector.load %arg3[%c0_226, %c0_227] : memref<64x256xbf16, #tpu.memory_space<vmem>>, vector<64x256xbf16>
    %cst_228 = arith.constant dense<0.000000e+00> : vector<2x256xf32>
    %647 = tpu.matmul %645, %646, %cst_228 {dimension_numbers = #tpu.dot_dimension_numbers<[1], [0], [0], [1], [0, 0, 1, 1], [], []>} : vector<2x64xbf16>, vector<64x256xbf16>, vector<2x256xf32> -> vector<2x256xf32>
    %648 = arith.addf %644, %647 : vector<2x256xf32>
    %649 = vector.broadcast %25 : vector<1x256xf32> to vector<2x256xf32>
    %650 = arith.addf %648, %649 : vector<2x256xf32>
    %651 = vector.extract_strided_slice %650 {offsets = [0, 0], sizes = [2, 64], strides = [1, 1]} : vector<2x256xf32> to vector<2x64xf32>
    %652 = arith.negf %651 : vector<2x64xf32>
    %653 = math.exp %652 : vector<2x64xf32>
    %cst_229 = arith.constant 1.000000e+00 : f32
    %654 = vector.broadcast %cst_229 : f32 to vector<2x64xf32>
    %655 = arith.addf %654, %653 : vector<2x64xf32>
    %656 = arith.divf %654, %655 : vector<2x64xf32>
    %657 = vector.extract_strided_slice %650 {offsets = [0, 64], sizes = [2, 64], strides = [1, 1]} : vector<2x256xf32> to vector<2x64xf32>
    %658 = arith.negf %657 : vector<2x64xf32>
    %659 = math.exp %658 : vector<2x64xf32>
    %cst_230 = arith.constant 1.000000e+00 : f32
    %660 = vector.broadcast %cst_230 : f32 to vector<2x64xf32>
    %661 = arith.addf %660, %659 : vector<2x64xf32>
    %662 = arith.divf %660, %661 : vector<2x64xf32>
    %663 = vector.extract_strided_slice %650 {offsets = [0, 128], sizes = [2, 64], strides = [1, 1]} : vector<2x256xf32> to vector<2x64xf32>
    %664 = math.tanh %663 : vector<2x64xf32>
    %665 = vector.extract_strided_slice %650 {offsets = [0, 192], sizes = [2, 64], strides = [1, 1]} : vector<2x256xf32> to vector<2x64xf32>
    %666 = arith.negf %665 : vector<2x64xf32>
    %667 = math.exp %666 : vector<2x64xf32>
    %cst_231 = arith.constant 1.000000e+00 : f32
    %668 = vector.broadcast %cst_231 : f32 to vector<2x64xf32>
    %669 = arith.addf %668, %667 : vector<2x64xf32>
    %670 = arith.divf %668, %669 : vector<2x64xf32>
    %671 = arith.mulf %662, %588 : vector<2x64xf32>
    %672 = arith.mulf %656, %664 : vector<2x64xf32>
    %673 = arith.addf %671, %672 : vector<2x64xf32>
    %674 = math.tanh %673 : vector<2x64xf32>
    %675 = arith.mulf %670, %674 : vector<2x64xf32>
    %676 = arith.truncf %675 : vector<2x64xf32> to vector<2x64xbf16>
    %c0_232 = arith.constant 0 : index
    %c0_233 = arith.constant 0 : index
    %677 = vector.load %arg7[%c0_232, %c0_233] : memref<64x144xbf16, #tpu.memory_space<vmem>>, vector<64x144xbf16>
    %cst_234 = arith.constant dense<0.000000e+00> : vector<2x144xf32>
    %678 = tpu.matmul %676, %677, %cst_234 {dimension_numbers = #tpu.dot_dimension_numbers<[1], [0], [0], [1], [0, 0, 1, 1], [], []>} : vector<2x64xbf16>, vector<64x144xbf16>, vector<2x144xf32> -> vector<2x144xf32>
    %679 = vector.broadcast %26 : vector<1x144xf32> to vector<2x144xf32>
    %680 = arith.addf %678, %679 : vector<2x144xf32>
    %681 = vector.extract_strided_slice %680 {offsets = [0, 0], sizes = [2, 128], strides = [1, 1]} : vector<2x144xf32> to vector<2x128xf32>
    %682 = vector.extract_strided_slice %680 {offsets = [0, 128], sizes = [2, 16], strides = [1, 1]} : vector<2x144xf32> to vector<2x16xf32>
    %683 = vector.shape_cast %681 : vector<2x128xf32> to vector<2x1x128xf32>
    %c0_235 = arith.constant 0 : index
    %c0_236 = arith.constant 0 : index
    %c0_237 = arith.constant 0 : index
    %684 = vector.load %arg15[%c0_235, %c0_236, %c0_237] : memref<2x24x128xf32, #tpu.memory_space<vmem>>, vector<2x24x128xf32>
    %685 = vector.broadcast %683 : vector<2x1x128xf32> to vector<2x24x128xf32>
    %686 = arith.addf %685, %684 : vector<2x24x128xf32>
    %687 = math.tanh %686 : vector<2x24x128xf32>
    %688 = vector.broadcast %28 : vector<1x1x128xf32> to vector<2x24x128xf32>
    %689 = arith.mulf %687, %688 : vector<2x24x128xf32>
    %cst_238 = arith.constant dense<0.000000e+00> : vector<2x24xf32>
    %690 = vector.multi_reduction <add>, %689, %cst_238 [2] : vector<2x24x128xf32> to vector<2x24xf32>
    %691 = vector.broadcast %29 : vector<1x1xf32> to vector<2x24xf32>
    %692 = arith.addf %690, %691 : vector<2x24xf32>
    %cst_239 = arith.constant dense<0xFF800000> : vector<2xf32>
    %693 = vector.multi_reduction <maximumf>, %692, %cst_239 [1] : vector<2x24xf32> to vector<2xf32>
    %694 = vector.shape_cast %693 : vector<2xf32> to vector<2x1xf32>
    %695 = vector.broadcast %694 : vector<2x1xf32> to vector<2x24xf32>
    %696 = arith.subf %692, %695 : vector<2x24xf32>
    %697 = math.exp %696 : vector<2x24xf32>
    %cst_240 = arith.constant dense<0.000000e+00> : vector<2xf32>
    %698 = vector.multi_reduction <add>, %697, %cst_240 [1] : vector<2x24xf32> to vector<2xf32>
    %699 = vector.shape_cast %698 : vector<2xf32> to vector<2x1xf32>
    %700 = tpu.reciprocal %699 {approx = true} : vector<2x1xf32> -> vector<2x1xf32>
    %701 = vector.broadcast %700 : vector<2x1xf32> to vector<2x24xf32>
    %702 = arith.mulf %697, %701 : vector<2x24xf32>
    %703 = vector.shape_cast %702 : vector<2x24xf32> to vector<2x24x1xf32>
    %c0_241 = arith.constant 0 : index
    %c0_242 = arith.constant 0 : index
    %c0_243 = arith.constant 0 : index
    %704 = vector.load %arg16[%c0_241, %c0_242, %c0_243] : memref<2x24x16xf32, #tpu.memory_space<vmem>>, vector<2x24x16xf32>
    %705 = vector.broadcast %703 : vector<2x24x1xf32> to vector<2x24x16xf32>
    %706 = arith.mulf %705, %704 : vector<2x24x16xf32>
    %cst_244 = arith.constant dense<0.000000e+00> : vector<2x16xf32>
    %707 = vector.multi_reduction <add>, %706, %cst_244 [1] : vector<2x24x16xf32> to vector<2x16xf32>
    %708 = vector.broadcast %30 : vector<1x16xf32> to vector<2x16xf32>
    %709 = arith.addf %707, %708 : vector<2x16xf32>
    %710 = arith.addf %682, %709 : vector<2x16xf32>
    %711 = arith.index_cast %c7_i32 : i32 to index
    %c0_245 = arith.constant 0 : index
    %c0_246 = arith.constant 0 : index
    %712 = vector.load %arg12[%711, %c0_245, %c0_246] : memref<8x2x16xf32, #tpu.memory_space<vmem>>, vector<1x2x16xf32>
    %713 = vector.shape_cast %712 : vector<1x2x16xf32> to vector<2x16xf32>
    %714 = vector.shape_cast %710 : vector<2x16xf32> to vector<1x2x16xf32>
    tpu.vector_store %arg12[%711, %c0_245, %c0_246], %714 {strides = array<i32>} : memref<8x2x16xf32, #tpu.memory_space<vmem>>, vector<1x2x16xf32>,
    %c8_i32 = arith.constant 8 : i32
    %c0_247 = arith.constant 0 : index
    %c0_248 = arith.constant 0 : index
    %715 = vector.load %arg13[%c0_247, %c0_248] : memref<2x64xf32, #tpu.memory_space<vmem>>, vector<2x64xf32>
    tpu.vector_store %arg13[%c0_247, %c0_248], %675 {strides = array<i32>} : memref<2x64xf32, #tpu.memory_space<vmem>>, vector<2x64xf32>,
    %c0_249 = arith.constant 0 : index
    %c0_250 = arith.constant 0 : index
    %716 = vector.load %arg14[%c0_249, %c0_250] : memref<2x64xf32, #tpu.memory_space<vmem>>, vector<2x64xf32>
    tpu.vector_store %arg14[%c0_249, %c0_250], %673 {strides = array<i32>} : memref<2x64xf32, #tpu.memory_space<vmem>>, vector<2x64xf32>,
    return
  }
}

</mosaic_0001>

<bundles_post_ra>
// kernel: _plate_decoder_forward.1
= control target key start
LH: loop header
LB: loop body
LE: loop exit
PB: predicated region body
PF: predicated region fallthrough
CT: control target
= control target key end

     0   :  { %s7933_s0 = inlined_call_operand.vmem [shape: f32[2,16], index: 0, kind: input, shape index: {}]   ;;  %s7934_s1 = inlined_call_operand.vmem [shape: bf16[48,512], index: 1, kind: input, shape index: {}]   ;;  %s7935_s2 = inlined_call_operand.vmem [shape: f32[24,128], index: 2, kind: input, shape index: {}]   ;;  %s7936_s3 = inlined_call_operand.vmem [shape: bf16[64,256], index: 3, kind: input, shape index: {}]   ;;  %s7937_s4 = inlined_call_operand.vmem [shape: bf16[16,256], index: 4, kind: input, shape index: {}]   ;;  %s7938_s5 = inlined_call_operand.vmem [shape: f32[1,256], index: 5, kind: input, shape index: {}]   ;;  %s7939_s6 = inlined_call_operand.vmem [shape: bf16[512,144], index: 6, kind: input, shape index: {}]   ;;  %s7940_s7 = inlined_call_operand.vmem [shape: bf16[64,144], index: 7, kind: input, shape index: {}]   ;;  %s7941_s8 = inlined_call_operand.vmem [shape: f32[1,144], index: 8, kind: input, shape index: {}]   ;;  %s7942_s9 = inlined_call_operand.vmem [shape: f32[1,128], index: 9, kind: input, shape index: {}]   ;;  %s7943_s10 = inlined_call_operand.<no memory space> [shape: f32[1,1], index: 10, kind: input, shape index: {}]   ;;  %s7944_s11 = inlined_call_operand.vmem [shape: f32[1,16], index: 11, kind: input, shape index: {}]   ;;  %s7945_s12 = inlined_call_operand.vmem [shape: f32[8,2,16], index: 12, kind: output, shape index: {0}]   ;;  %s7946_s13 = inlined_call_operand.hbm [shape: f32[2,64], index: 13, kind: output, shape index: {1}]   ;;  %s7947_s14 = inlined_call_operand.hbm [shape: f32[2,64], index: 14, kind: output, shape index: {2}]  }
   0x1   :  { %v20_v0 = vstv %s7943_s10 }
   0x2   :  { %21 = vst [vmem:[#allocation4] sm:$0x1] %v20_v0 }
   0x3   :  { %22 = vsyncpa [#allocation6], 0  ;;  %v665_v1 = vld [vmem:[%s7933_s0] sm:$0x3]  ;;  %vm666_vm0 = vcmask 123904  }
   0x4   :  { %v667_v2 = vsel %vm666_vm0, %v665_v1, -inf }
   0x5   :  { %668 = vmax.xlane.f32.xlu0 %v667_v2 }
   0x6   :  { %23 = vsyncpa [#allocation8], 0  ;;  %v663_v3 = vlaneseq  ;;  %v5695_v10 = vld [vmem:[%s7939_s6 + $0x74] ss:$8 sps:$4 sm:$0xff]   ;;  %v5699_v12 = vld [vmem:[%s7939_s6 + $0x70] ss:$8 sps:$4 sm:$0xff]  }
   0x7   :  { %v5697_v11 = vld [vmem:[%s7939_s6 + $0x174] ss:$8 sps:$4 sm:$0xff]   ;;  %v5700_v13 = vld [vmem:[%s7939_s6 + $0x170] ss:$8 sps:$4 sm:$0xff]   ;;  %v5701_v14 = vld [vmem:[%s7939_s6 + $0x64] ss:$8 sps:$4 sm:$0xff]   ;;  %505 = vmatprep.subr.bf16.mxu0 %v5695_v10 }
   0x8   :  { %v6360_v4 = vand.u32 127, %v663_v3  ;;  %v5703_v15 = vld [vmem:[%s7939_s6 + $0x164] ss:$8 sps:$4 sm:$0xff]   ;;  %568 = vmatprep.subr.bf16.mxu1 %v5697_v11  ;;  %506 = vmatpush1.bf16.msra.mxu0 %v5699_v12  ;;  %v5705_v16 = vld [vmem:[%s7939_s6 + $0x60] ss:$8 sps:$4 sm:$0xff]   ;;  %vm640_vm3 = vcmask 130048  }
   0x9   :  { %569 = vmatpush1.bf16.msra.mxu1 %v5700_v13  ;;  %v5706_v17 = vld [vmem:[%s7939_s6 + $0x160] ss:$8 sps:$4 sm:$0xff]   ;;  %507 = vmatprep.subr.bf16.mxu0 %v5701_v14  ;;  %v5707_v18 = vld [vmem:[%s7939_s6 + $0x54] ss:$8 sps:$4 sm:$0xff]   ;;  %v5711_v20 = vld [vmem:[%s7939_s6 + $0x50] ss:$8 sps:$4 sm:$0xff]  }
   0xa   :  { %570 = vmatprep.subr.bf16.mxu1 %v5703_v15  ;;  %v5709_v19 = vld [vmem:[%s7939_s6 + $0x154] ss:$8 sps:$4 sm:$0xff]   ;;  %v5712_v21 = vld [vmem:[%s7939_s6 + $0x150] ss:$8 sps:$4 sm:$0xff]   ;;  %v5713_v22 = vld [vmem:[%s7939_s6 + $0x44] ss:$8 sps:$4 sm:$0xff]  }
   0xb   :  { %v5715_v23 = vld [vmem:[%s7939_s6 + $0x144] ss:$8 sps:$4 sm:$0xff]   ;;  %v5717_v24 = vld [vmem:[%s7939_s6 + $0x40] ss:$8 sps:$4 sm:$0xff]   ;;  %v5719_v26 = vld [vmem:[%s7939_s6 + $0x34] ss:$8 sps:$4 sm:$0xff]  }
   0xc   :  { %508 = vmatpush1.bf16.msra.mxu0 %v5705_v16  ;;  %v5718_v25 = vld [vmem:[%s7939_s6 + $0x140] ss:$8 sps:$4 sm:$0xff]   ;;  %v5721_v27 = vld [vmem:[%s7939_s6 + $0x134] ss:$8 sps:$4 sm:$0xff]   ;;  %v5723_v28 = vld [vmem:[%s7939_s6 + $0x30] ss:$8 sps:$4 sm:$0xff]  }
   0xd   :  { %571 = vmatpush1.bf16.msra.mxu1 %v5706_v17  ;;  %509 = vmatprep.subr.bf16.mxu0 %v5707_v18  ;;  %v5724_v29 = vld [vmem:[%s7939_s6 + $0x130] ss:$8 sps:$4 sm:$0xff]   ;;  %v5725_v30 = vld [vmem:[%s7939_s6 + $0x24] ss:$8 sps:$4 sm:$0xff]   ;;  %v5729_v32 = vld [vmem:[%s7939_s6 + $0x20] ss:$8 sps:$4 sm:$0xff]  }
   0xe   :  { %572 = vmatprep.subr.bf16.mxu1 %v5709_v19  ;;  %v5727_v31 = vld [vmem:[%s7939_s6 + $0x124] ss:$8 sps:$4 sm:$0xff]   ;;  %v5730_v33 = vld [vmem:[%s7939_s6 + $0x120] ss:$8 sps:$4 sm:$0xff]   ;;  %v5731_v34 = vld [vmem:[%s7939_s6 + $0x14] ss:$8 sps:$4 sm:$0xff]  }
   0xf   :  { %v5733_v35 = vld [vmem:[%s7939_s6 + $0x114] ss:$8 sps:$4 sm:$0xff]   ;;  %v5735_v38 = vld [vmem:[%s7939_s6 + $0x10] ss:$8 sps:$4 sm:$0xff]   ;;  %v5737_v40 = vld [vmem:[%s7939_s6 + $0x4] ss:$8 sps:$4 sm:$0xff]  }
  0x10   :  { %510 = vmatpush1.bf16.msra.mxu0 %v5711_v20  ;;  %v5793_v36 = vld [vmem:[%s7934_s1 + $0x4] ss:$16 sps:$4 sm:$0xff]   ;;  %v5796_v37 = vld [vmem:[%s7934_s1 + $0xc] ss:$16 sps:$4 sm:$0xff]   ;;  %v5736_v39 = vld [vmem:[%s7939_s6 + $0x110] ss:$8 sps:$4 sm:$0xff]  }
  0x11   :  { %573 = vmatpush1.bf16.msra.mxu1 %v5712_v21  ;;  %511 = vmatprep.subr.bf16.mxu0 %v5713_v22  ;;  %v5739_v41 = vld [vmem:[%s7939_s6 + $0x104] ss:$8 sps:$4 sm:$0xff]   ;;  %v5741_v42 = vld [vmem:[%s7939_s6] ss:$8 sps:$4 sm:$0xff]   ;;  %v5743_v44 = vld [vmem:[%s7939_s6 + $0xf4] ss:$8 sps:$4 sm:$0xff]  }
  0x12   :  { %574 = vmatprep.subr.bf16.mxu1 %v5715_v23  ;;  %537 = vmatprep.mubr.bf16.mxu0 %v5793_v36  ;;  %v5742_v43 = vld [vmem:[%s7939_s6 + $0x100] ss:$8 sps:$4 sm:$0xff]   ;;  %v5745_v45 = vld [vmem:[%s7939_s6 + $0x1f4] ss:$8 sps:$4 sm:$0xff]   ;;  %v5747_v46 = vld [vmem:[%s7939_s6 + $0xf0] ss:$8 sps:$4 sm:$0xff]  }
  0x13   :  { %600 = vmatprep.mubr.bf16.mxu1 %v5796_v37  ;;  %v5748_v47 = vld [vmem:[%s7939_s6 + $0x1f0] ss:$8 sps:$4 sm:$0xff]   ;;  %v5749_v48 = vld [vmem:[%s7939_s6 + $0xe4] ss:$8 sps:$4 sm:$0xff]   ;;  %v5753_v50 = vld [vmem:[%s7939_s6 + $0xe0] ss:$8 sps:$4 sm:$0xff]  }
  0x14   :  { %512 = vmatpush1.bf16.msra.mxu0 %v5717_v24  ;;  %v5751_v49 = vld [vmem:[%s7939_s6 + $0x1e4] ss:$8 sps:$4 sm:$0xff]   ;;  %v5754_v51 = vld [vmem:[%s7939_s6 + $0x1e0] ss:$8 sps:$4 sm:$0xff]   ;;  %v5755_v52 = vld [vmem:[%s7939_s6 + $0xd4] ss:$8 sps:$4 sm:$0xff]  }
  0x15   :  { %575 = vmatpush1.bf16.msra.mxu1 %v5718_v25  ;;  %513 = vmatprep.subr.bf16.mxu0 %v5719_v26  ;;  %v5757_v53 = vld [vmem:[%s7939_s6 + $0x1d4] ss:$8 sps:$4 sm:$0xff]   ;;  %v5759_v54 = vld [vmem:[%s7939_s6 + $0xd0] ss:$8 sps:$4 sm:$0xff]   ;;  %v5761_v56 = vld [vmem:[%s7939_s6 + $0xc4] ss:$8 sps:$4 sm:$0xff]  }
  0x16   :  { %576 = vmatprep.subr.bf16.mxu1 %v5721_v27  ;;  %v5760_v55 = vld [vmem:[%s7939_s6 + $0x1d0] ss:$8 sps:$4 sm:$0xff]   ;;  %v5763_v57 = vld [vmem:[%s7939_s6 + $0x1c4] ss:$8 sps:$4 sm:$0xff]   ;;  %v5765_v58 = vld [vmem:[%s7939_s6 + $0xc0] ss:$8 sps:$4 sm:$0xff]  }
  0x17   :  { %v5766_v59 = vld [vmem:[%s7939_s6 + $0x1c0] ss:$8 sps:$4 sm:$0xff]   ;;  %v5767_v60 = vld [vmem:[%s7939_s6 + $0xb4] ss:$8 sps:$4 sm:$0xff]   ;;  %v5771_v62 = vld [vmem:[%s7939_s6 + $0xb0] ss:$8 sps:$4 sm:$0xff]  }
  0x18   :  { %514 = vmatpush1.bf16.msra.mxu0 %v5723_v28  ;;  %v5769_v61 = vld [vmem:[%s7939_s6 + $0x1b4] ss:$8 sps:$4 sm:$0xff]   ;;  %v5772_v63 = vld [vmem:[%s7939_s6 + $0x1b0] ss:$8 sps:$4 sm:$0xff]   ;;  %v5773_v0 = vld [vmem:[%s7939_s6 + $0xa4] ss:$8 sps:$4 sm:$0xff]  }
  0x19   :  { %577 = vmatpush1.bf16.msra.mxu1 %v5724_v29  ;;  %515 = vmatprep.subr.bf16.mxu0 %v5725_v30  ;;  %v5777_v2 = vld [vmem:[%s7939_s6 + $0xa0] ss:$8 sps:$4 sm:$0xff]   ;;  %v5783_v10 = vld [vmem:[%s7939_s6 + $0x90] ss:$8 sps:$4 sm:$0xff]   ;;  %v5785_v12 = vld [vmem:[%s7939_s6 + $0x84] ss:$8 sps:$4 sm:$0xff]  }
  0x1a   :  { %578 = vmatprep.subr.bf16.mxu1 %v5727_v31  ;;  %v5784_v11 = vld [vmem:[%s7939_s6 + $0x190] ss:$8 sps:$4 sm:$0xff]   ;;  %v5787_v13 = vld [vmem:[%s7939_s6 + $0x184] ss:$8 sps:$4 sm:$0xff]   ;;  %v5789_v14 = vld [vmem:[%s7939_s6 + $0x80] ss:$8 sps:$4 sm:$0xff]  }
  0x1b   :  { %v5790_v15 = vld [vmem:[%s7939_s6 + $0x180] ss:$8 sps:$4 sm:$0xff]   ;;  %v6571_v16 = vld [vmem:[%s7936_s3 + $0x34] ss:$8 sps:$4 sm:$0xff]   ;;  %v6576_v17 = vld [vmem:[%s7937_s4 + $0x4] ss:$8 sps:$4 sm:$0xff]  }
  0x1c   :  { %516 = vmatpush1.bf16.msra.mxu0 %v5729_v32  ;;  %v5791_v18 = vld [vmem:[%s7934_s1] ss:$16 sps:$4 sm:$0xff]   ;;  %v5794_v19 = vld [vmem:[%s7934_s1 + $0x8] ss:$16 sps:$4 sm:$0xff]   ;;  %v5803_v22 = vld [vmem:[%s7934_s1 + $0x24] ss:$16 sps:$4 sm:$0xff]  }
  0x1d   :  { %579 = vmatpush1.bf16.msra.mxu1 %v5730_v33  ;;  %517 = vmatprep.subr.bf16.mxu0 %v5731_v34  ;;  %v6587_v20 = vld [vmem:[%s7936_s3 + $0x30] ss:$8 sps:$4 sm:$0xff]   ;;  %v6592_v21 = vld [vmem:[%s7937_s4] ss:$8 sps:$4 sm:$0xff]   ;;  %v5805_v23 = vld [vmem:[%s7934_s1 + $0x2c] ss:$16 sps:$4 sm:$0xff]  }
  0x1e   :  { %580 = vmatprep.subr.bf16.mxu1 %v5733_v35  ;;  %v6605_v24 = vld [vmem:[%s7936_s3 + $0x24] ss:$8 sps:$4 sm:$0xff]   ;;  %v6612_v25 = vld [vmem:[%s7936_s3 + $0x20] ss:$8 sps:$4 sm:$0xff]   ;;  %v6617_v26 = vld [vmem:[%s7936_s3 + $0x14] ss:$8 sps:$4 sm:$0xff]  }
  0x1f   :  { %v5807_v27 = vld [vmem:[%s7934_s1 + $0x20] ss:$16 sps:$4 sm:$0xff]   ;;  %v5808_v28 = vld [vmem:[%s7934_s1 + $0x28] ss:$16 sps:$4 sm:$0xff]   ;;  %v5812_v29 = vld [vmem:[%s7934_s1 + $0x44] ss:$16 sps:$4 sm:$0xff]  }
  0x20   :  { %518 = vmatpush1.bf16.msra.mxu0 %v5735_v38  ;;  %v5814_v30 = vld [vmem:[%s7934_s1 + $0x4c] ss:$16 sps:$4 sm:$0xff]   ;;  %v6637_v31 = vld [vmem:[%s7936_s3 + $0x10] ss:$8 sps:$4 sm:$0xff]   ;;  %v6649_v33 = vld [vmem:[%s7936_s3] ss:$8 sps:$4 sm:$0xff]  }
  0x21   :  { %581 = vmatpush1.bf16.msra.mxu1 %v5736_v39  ;;  %519 = vmatprep.subr.bf16.mxu0 %v5737_v40  ;;  %v6643_v32 = vld [vmem:[%s7936_s3 + $0x4] ss:$8 sps:$4 sm:$0xff]   ;;  %v5816_v34 = vld [vmem:[%s7934_s1 + $0x40] ss:$16 sps:$4 sm:$0xff]   ;;  %v5817_v35 = vld [vmem:[%s7934_s1 + $0x48] ss:$16 sps:$4 sm:$0xff]  }
  0x22   :  { %582 = vmatprep.subr.bf16.mxu1 %v5739_v41  ;;  %v6271_v40 = vmov 0   ;;  %vm741_vm5 = vcmask 523264   ;;  %vm1087_vm6 = vcmask 130112   ;;  %vm1094_vm7 = vcmask 195712   ;;  %s6276_s27 = smov [#allocation7]  }
  0x23   :  { %5693 = vset.pattern.permute.xlu1 %v6271_v40  ;;  %5694 = vset.pattern.permute.xlu0 %v6271_v40  ;;  %vm1110_vm8 = vcmask 1041409   ;;  %vm1113_vm9 = vcmask 189440   ;;  %s5396_s28 = sshll.u32 %s6276_s27, 4  ;;  %s5397_s28 = int_to_ptr.vmem [resolvable:$true] %s5396_s28 }
  0x24   :  { %520 = vmatpush1.bf16.msra.mxu0 %v5741_v42 }
  0x25   :  { %583 = vmatpush1.bf16.msra.mxu1 %v5742_v43  ;;  %521 = vmatprep.subr.bf16.mxu0 %v5743_v44 }
  0x26   :  { %584 = vmatprep.subr.bf16.mxu1 %v5745_v45 }
  0x28   :  { %522 = vmatpush2.bf16.msra.mxu0 %v5747_v46 }
  0x29   :  { %585 = vmatpush2.bf16.msra.mxu1 %v5748_v47  ;;  %523 = vmatprep.subr.bf16.mxu0 %v5749_v48 }
  0x2a   :  { %586 = vmatprep.subr.bf16.mxu1 %v5751_v49 }
  0x2c   :  { %524 = vmatpush2.bf16.msra.mxu0 %v5753_v50 }
  0x2d   :  { %587 = vmatpush2.bf16.msra.mxu1 %v5754_v51  ;;  %525 = vmatprep.subr.bf16.mxu0 %v5755_v52 }
  0x2e   :  { %588 = vmatprep.subr.bf16.mxu1 %v5757_v53 }
  0x30   :  { %526 = vmatpush2.bf16.msra.mxu0 %v5759_v54 }
  0x31   :  { %589 = vmatpush2.bf16.msra.mxu1 %v5760_v55  ;;  %527 = vmatprep.subr.bf16.mxu0 %v5761_v56 }
  0x32   :  { %590 = vmatprep.subr.bf16.mxu1 %v5763_v57 }
  0x34   :  { %528 = vmatpush2.bf16.msra.mxu0 %v5765_v58 }
  0x35   :  { %591 = vmatpush2.bf16.msra.mxu1 %v5766_v59  ;;  %529 = vmatprep.subr.bf16.mxu0 %v5767_v60 }
  0x36   :  { %592 = vmatprep.subr.bf16.mxu1 %v5769_v61 }
  0x38   :  { %530 = vmatpush2.bf16.msra.mxu0 %v5771_v62 }
  0x39   :  { %593 = vmatpush2.bf16.msra.mxu1 %v5772_v63  ;;  %531 = vmatprep.subr.bf16.mxu0 %v5773_v0  ;;  %v6272_v0 = vmov 0.0  }
  0x3c   :  { %532 = vmatpush2.bf16.msra.mxu0 %v5777_v2 }
  0x8e   :  { %v669_v5 = vpop.xlane.xlu0 %668 }
  0x8f   :  { %vm670_vm1 = vcmp.ge.f32.partialorder %v665_v1, %v669_v5  ;;  %v5775_v1 = vld [vmem:[%s7939_s6 + $0x1a4] ss:$8 sps:$4 sm:$0xff]   ;;  %v5778_v5 = vld [vmem:[%s7939_s6 + $0x1a0] ss:$8 sps:$4 sm:$0xff]  }
  0x90   :  { %v671_v6 = vsel %vm670_vm1, %v6360_v4, 16  ;;  %594 = vmatprep.subr.bf16.mxu1 %v5775_v1 }
  0x91   :  { %v6364_v7 = vsel %vm666_vm0, %v671_v6, 2147483647  ;;  %v5779_v6 = vld [vmem:[%s7939_s6 + $0x94] ss:$8 sps:$4 sm:$0xff]   ;;  %595 = vmatpush2.bf16.msra.mxu1 %v5778_v5 }
  0x92   :  { %v674_v8 = vshra.s32 %v6364_v7, 16  ;;  %533 = vmatprep.subr.bf16.mxu0 %v5779_v6  ;;  %v673_v36 = vand.u32 65535, %v6364_v7 }
  0x93   :  { %534 = vmatpush2.bf16.msra.mxu0 %v5783_v10 }
  0x94   :  { %v6367_v9 = vcvt.s32.f32 %v674_v8  ;;  %v5781_v8 = vld [vmem:[%s7939_s6 + $0x194] ss:$8 sps:$4 sm:$0xff]   ;;  %535 = vmatprep.subr.bf16.mxu0 %v5785_v12  ;;  %v675_v38 = vcvt.s32.f32 %v673_v36 }
  0x95   :  { %596 = vmatprep.subr.bf16.mxu1 %v5781_v8 }
  0x96   :  { %677 = vmin.xlane.f32.xlu0 %v6367_v9  ;;  %597 = vmatpush2.bf16.msra.mxu1 %v5784_v11 }
  0x97   :  { %598 = vmatprep.subr.bf16.mxu1 %v5787_v13  ;;  %536 = vmatpush2.bf16.msra.mxu0 %v5789_v14 }
  0x98   :  { %753 = vmatprep.subr.bf16.mxu0 %v6571_v16 }
  0x9a   :  { %599 = vmatpush2.bf16.msra.mxu1 %v5790_v15  ;;  %538 = vmatmul.mubr.bf16.vlgmr.msra.gmra.mxu0 %v5791_v18 }
  0x9b   :  { %813 = vmatprep.subr.bf16.mxu1 %v6576_v17  ;;  %754 = vmatpush1.bf16.msra.mxu0 %v6587_v20 }
  0x9c   :  { %547 = vmatprep.mubr.bf16.mxu0 %v5803_v22  ;;  %755 = vmatprep.subr.bf16.mxu0 %v6605_v24 }
  0x9d   :  { %601 = vmatmul.mubr.bf16.vlgmr.msra.gmra.mxu1 %v5794_v19 }
  0x9e   :  { %814 = vmatpush1.bf16.msra.mxu1 %v6592_v21  ;;  %610 = vmatprep.mubr.bf16.mxu1 %v5805_v23 }
  0x9f   :  { %1382 = vmatprep.subr.bf16.mxu1 %v6571_v16  ;;  %756 = vmatpush1.bf16.msra.mxu0 %v6612_v25 }
  0xa0   :  { %757 = vmatprep.subr.bf16.mxu0 %v6617_v26 }
  0xa2   :  { %548 = vmatmul.mubr.bf16.gmra.mxu0 %v5807_v27 }
  0xa3   :  { %557 = vmatprep.mubr.bf16.mxu0 %v5812_v29  ;;  %758 = vmatpush1.bf16.msra.mxu0 %v6637_v31 }
  0xa4   :  { %759 = vmatprep.subr.bf16.mxu0 %v6643_v32 }
  0xa5   :  { %611 = vmatmul.mubr.bf16.gmra.mxu1 %v5808_v28 }
  0xa6   :  { %620 = vmatprep.mubr.bf16.mxu1 %v5814_v30 }
  0xa7   :  { %760 = vmatpush1.bf16.msra.mxu0 %v6649_v33 }
  0xaa   :  { %558 = vmatmul.mubr.bf16.gmra.mxu0 %v5816_v34 }
  0xab   :  { %777 = vmatprep.mubr.bf16.mxu0 %v6271_v40 }
  0xad   :  { %621 = vmatmul.mubr.bf16.gmra.mxu1 %v5817_v35 }
  0xae   :  { %831 = vmatprep.mubr.bf16.mxu1 %v6271_v40 }
  0xb2   :  { %778 = vmatmul.mubr.bf16.vlgmr.msra.gmra.mxu0 %v6271_v40 }
  0xb3   :  { %973 = vmatprep.mubr.bf16.mxu0 %v6271_v40 }
 0x11f   :  { %v678_v37 = vpop.xlane.xlu0 %677 }
 0x120   :  { %vm679_vm2 = vcmp.eq.f32.partialorder %v6367_v9, %v678_v37  ;;  %v684_v45 = vcvt.f32.s32 %v678_v37  ;;  %v6697_v37 = vshrl.u32 %v663_v3, 7 }
 0x121   :  { %v680_v39 = vsel %vm679_vm2, %v675_v38, inf }
 0x122   :  { %681 = vmin.xlane.f32.xlu1 %v680_v39  ;;  %v685_v53 = vshll.u32 %v684_v45, 16  ;;  %v6700_v38 = vsub.s32 0, %v6697_v37  ;;  %v658_v39 = vld [vmem:[%s7938_s5] sm:$0x3]  ;;  %v6710_v3 = vsub.s32 1, %v6697_v37  ;;  %s6273_s5 = smov 64  }
 0x15a   :  { %v539_v7 = vpop.f32.mrf.mxu0 }
 0x15c   :  { %v541_v9 = vpop.f32.mrf.mxu0 }
 0x15d   :  { %v602_v41 = vpop.f32.mrf.mxu1 }
 0x15e   :  { %v6667_v42 = vadd.f32 %v602_v41, %v539_v7  ;;  %v543_v46 = vpop.f32.mrf.mxu0  ;;  %v6706_v7 = vrot.slane %v658_v39, %v6700_v38 }
 0x15f   :  { %v604_v43 = vpop.f32.mrf.mxu1 }
 0x160   :  { %v605_v44 = vadd.f32 %v604_v43, %v541_v9  ;;  %v545_v49 = vpop.f32.mrf.mxu0 }
 0x161   :  { %v606_v47 = vpop.f32.mrf.mxu1 }
 0x162   :  { %641 = vst.msk [vmem:[#allocation3] sm:$0xff] %vm640_vm3, %v605_v44  ;;  %v6670_v48 = vadd.f32 %v606_v47, %v543_v46  ;;  %v549_v55 = vpop.f32.mrf.mxu0 }
 0x163   :  { %v608_v50 = vpop.f32.mrf.mxu1 }
 0x164   :  { %v609_v52 = vadd.f32 %v608_v50, %v545_v49  ;;  %v551_v59 = vpop.f32.mrf.mxu0  ;;  %v6713_v50 = vrot.slane %v658_v39, %v6710_v3 }
 0x165   :  { %v612_v56 = vpop.f32.mrf.mxu1 }
 0x166   :  { %642 = vst.msk [vmem:[#allocation3 + $0x8] sm:$0xff] %vm640_vm3, %v609_v52  ;;  %v6673_v57 = vadd.f32 %v612_v56, %v549_v55  ;;  %v553_v62 = vpop.f32.mrf.mxu0 }
 0x167   :  { %v614_v60 = vpop.f32.mrf.mxu1 }
 0x168   :  { %v615_v61 = vadd.f32 %v614_v60, %v551_v59  ;;  %v555_v6 = vpop.f32.mrf.mxu0  ;;  %v5826_v59 = vld [vmem:[%s7940_s7 + $0x34] ss:$8 sps:$4 sm:$0xff]   ;;  %v5829_v60 = vld [vmem:[%s7940_s7 + $0x24] ss:$8 sps:$4 sm:$0xff]  }
 0x169   :  { %v616_v63 = vpop.f32.mrf.mxu1  ;;  %949 = vmatprep.subr.bf16.mxu0 %v5826_v59 }
 0x16a   :  { %643 = vst.msk [vmem:[#allocation3 + $0x10] sm:$0xff] %vm640_vm3, %v615_v61  ;;  %v6678_v2 = vadd.f32 %v616_v63, %v553_v62  ;;  %v559_v11 = vpop.f32.mrf.mxu0  ;;  %v5827_v61 = vld [vmem:[%s7940_s7 + $0x20] ss:$8 sps:$4 sm:$0xff]   ;;  %v5832_v62 = vld [vmem:[%s7940_s7 + $0x14] ss:$8 sps:$4 sm:$0xff]  }
 0x16b   :  { %v618_v8 = vpop.f32.mrf.mxu1  ;;  %v5830_v63 = vld [vmem:[%s7940_s7 + $0x10] ss:$8 sps:$4 sm:$0xff]  }
 0x16c   :  { %v619_v10 = vadd.f32 %v618_v8, %v555_v6  ;;  %v561_v14 = vpop.f32.mrf.mxu0 }
 0x16d   :  { %v622_v12 = vpop.f32.mrf.mxu1 }
 0x16e   :  { %655 = vst.msk [vmem:[#allocation3 + $0x18] sm:$0xff] %vm640_vm3, %v619_v10  ;;  %v6682_v13 = vadd.f32 %v622_v12, %v559_v11  ;;  %v563_v19 = vpop.f32.mrf.mxu0 }
 0x16f   :  { %v624_v15 = vpop.f32.mrf.mxu1 }
 0x170   :  { %v625_v18 = vadd.f32 %v624_v15, %v561_v14  ;;  %v565_v27 = vpop.f32.mrf.mxu0 }
 0x171   :  { %v626_v22 = vpop.f32.mrf.mxu1 }
 0x172   :  { %656 = vst.msk [vmem:[#allocation3 + $0x20] sm:$0xff] %vm640_vm3, %v625_v18  ;;  %v6688_v23 = vadd.f32 %v626_v22, %v563_v19  ;;  %v779_v30 = vpop.f32.mrf.mxu0 }
 0x173   :  { %v628_v28 = vpop.f32.mrf.mxu1 }
 0x174   :  { %v629_v29 = vadd.f32 %v628_v28, %v565_v27  ;;  %v781_v34 = vpop.f32.mrf.mxu0 }
 0x176   :  { %657 = vst.msk [vmem:[#allocation3 + $0x28] sm:$0xff] %vm640_vm3, %v629_v29  ;;  %v783_v35 = vpop.f32.mrf.mxu0  ;;  %v6755_v29 = vld [vmem:[%s7941_s8] sm:$0x3] }
 0x178   :  { %v784_v36 = vpop.f32.mrf.mxu0 }
 0x1ab   :  { %v682_v51 = vpop.xlane.xlu1 %681 }
 0x1ac   :  { %v683_v54 = vcvt.f32.s32 %v682_v51 }
 0x1ae   :  { %v686_v58 = vadd.s32 %v685_v53, %v683_v54 }
 0x1b0   :  { %vm687_vm4 = vcmp.eq.s32.totalorder %v6360_v4, %v686_v58  ;;  %v5824_v58 = vld [vmem:[%s7940_s7 + $0x30] ss:$8 sps:$4 sm:$0xff]  }
 0x1b1   :  { %v5486_v1 = vsel %vm687_vm4, 1.0, %v6272_v0  ;;  %950 = vmatpush1.bf16.msra.mxu0 %v5824_v58 }
 0x1b2   :  { %v690_v5 = vpack.c.bf16 %v5486_v1, %v5486_v1  ;;  %951 = vmatprep.subr.bf16.mxu0 %v5829_v60  ;;  %v5835_v1 = vld [vmem:[%s7940_s7 + $0x4] ss:$8 sps:$4 sm:$0xff]  }
 0x1b4   :  { %5497 = vmatmul.mubr.msk.bf16.vlgmr.msra.gmra.mxu1 %vm640_vm3, %v690_v5  ;;  %v5833_v5 = vld [vmem:[%s7940_s7] ss:$8 sps:$4 sm:$0xff]  }
 0x1b5   :  { %1383 = vmatpush1.bf16.msra.mxu1 %v6587_v20  ;;  %1406 = vmatprep.mubr.bf16.mxu1 %v6271_v40 }
 0x1b6   :  { %1384 = vmatprep.subr.bf16.mxu1 %v6605_v24  ;;  %952 = vmatpush1.bf16.msra.mxu0 %v5827_v61 }
 0x1b7   :  { %953 = vmatprep.subr.bf16.mxu0 %v5832_v62 }
 0x1b9   :  { %1385 = vmatpush1.bf16.msra.mxu1 %v6612_v25 }
 0x1ba   :  { %1386 = vmatprep.subr.bf16.mxu1 %v6617_v26  ;;  %954 = vmatpush1.bf16.msra.mxu0 %v5830_v63 }
 0x1bb   :  { %955 = vmatprep.subr.bf16.mxu0 %v5835_v1 }
 0x1bd   :  { %1387 = vmatpush1.bf16.msra.mxu1 %v6637_v31 }
 0x1be   :  { %1388 = vmatprep.subr.bf16.mxu1 %v6643_v32  ;;  %956 = vmatpush1.bf16.msra.mxu0 %v5833_v5 }
 0x1bf   :  { %1442 = vmatprep.subr.bf16.mxu0 %v6576_v17  ;;  %v6274_v17 = vmov 1966171168  }
 0x1c0   :  { %v984_v28 = vunpack.c.l.s4 %v6274_v17 }
 0x1c1   :  { %1389 = vmatpush1.bf16.msra.mxu1 %v6649_v33 }
 0x1c2   :  { %1556 = vmatprep.subr.bf16.mxu1 %v5826_v59 }
 0x274   :  { %v833_v41 = vpop.f32.mrf.mxu1 }
 0x275   :  { %v834_v9 = vadd.f32 %v833_v41, %v779_v30 }
 0x276   :  { %v835_v43 = vpop.f32.mrf.mxu1 }
 0x277   :  { %v851_v44 = vadd.f32 %v6706_v7, %v834_v9  ;;  %v836_v49 = vadd.f32 %v835_v43, %v781_v34  ;;  %v631_v9 = vld [vmem:[%s7935_s2] sm:$0xff] }
 0x278   :  { %v837_v45 = vpop.f32.mrf.mxu1 }
 0x279   :  { %v5498_v46 = vmul.f32 -1.442695, %v851_v44  ;;  %v852_v51 = vadd.f32 %v6713_v50, %v836_v49  ;;  %v632_v44 = vld [vmem:[%s7935_s2 + $0x8] sm:$0xff]  ;;  %v633_v45 = vld [vmem:[%s7935_s2 + $0x10] sm:$0xff] }
 0x27a   :  { %v838_v47 = vpop.f32.mrf.mxu1 }
 0x27b   :  { %5917 = vpow2.f32 %v5498_v46  ;;  %v5499_v6 = vmul.f32 -1.442695, %v852_v51 }
 0x27c   :  { %5919 = vtanh.f32 %v852_v51 }
 0x288   :  { %v5918_v52 = vpop.eup %5917 }
 0x289   :  { %v856_v53 = vadd.f32 1.0, %v5918_v52  ;;  %v5920_v54 = vpop.eup %5919  ;;  %v6783_v52 = vadd.f32 %v631_v9, %v6667_v42 }
 0x28b   :  { %5921 = vrcp.f32 %v856_v53 }
 0x28c   :  { %5923 = vpow2.f32 %v5499_v6 }
 0x298   :  { %v5922_v55 = vpop.eup %5921 }
 0x299   :  { %v867_v56 = vmul.f32 %v5922_v55, %v5920_v54  ;;  %v5924_v8 = vpop.eup %5923  ;;  %v866_v11 = vmul.f32 0.0, %v5922_v55  ;;  %v6786_v55 = vadd.f32 %v632_v44, %v6670_v48  ;;  %v6801_v48 = vadd.f32 %v631_v9, %v6678_v2  ;;  %v6812_v2 = vld [vmem:[%s7942_s9] ss:$0 sm:$0xff] }
 0x29a   :  { %v863_v10 = vadd.f32 1.0, %v5924_v8  ;;  %v1082_v9 = vadd.s32 4294967288, %v6360_v4 }
 0x29b   :  { %869 = vrot.lane.b32.xlu1 %v867_v56, %s6273_s5  ;;  %v6789_v56 = vadd.f32 %v633_v45, %v6673_v57 }
 0x29c   :  { %5925 = vrcp.f32 %v863_v10 }
 0x2a9   :  { %v5926_v15 = vpop.eup %5925 }
 0x30d   :  { %v870_v12 = vpop.permute.xlu1 %869 }
 0x30e   :  { %v6742_v14 = vadd.f32 %v870_v12, %v866_v11 }
 0x310   :  { %5927 = vtanh.f32 %v6742_v14 }
 0x31d   :  { %v5928_v18 = vpop.eup %5927 }
 0x31e   :  { %v874_v19 = vmul.f32 %v5928_v18, %v5926_v15 }
 0x320   :  { %v875_v22 = vpack.c.bf16 %v874_v19, %v874_v19 }
 0x322   :  { %896 = vrot.lane.b32.xlu0 %v875_v22, %s6273_s5 }
 0x394   :  { %v897_v27 = vpop.permute.xlu0 %896 }
 0x395   :  { %5508 = vmatmul.mubr.msk.bf16.vlgmr.msra.gmra.mxu0 %vm741_vm5, %v897_v27  ;;  %5521 = vmatmul.mubr.msk.bf16.vlgmr.msra.gmra.mxu1 %vm741_vm5, %v897_v27 }
 0x396   :  { %1443 = vmatpush1.bf16.msra.mxu0 %v6592_v21  ;;  %1460 = vmatprep.mubr.bf16.mxu0 %v6271_v40  ;;  %v985_v21 = vunpack.c.0.s8 %v984_v28  ;;  %v5510_v28 = vld [vmem:[#allocation4] ss:$0 sm:$0xff] }
 0x397   :  { %1963 = vmatprep.subr.bf16.mxu0 %v6571_v16  ;;  %1557 = vmatpush1.bf16.msra.mxu1 %v5824_v58  ;;  %v6759_v16 = vrot.slane %v6755_v29, %v6700_v38 }
 0x398   :  { %1558 = vmatprep.subr.bf16.mxu1 %v5829_v60  ;;  %1580 = vmatprep.mubr.bf16.mxu1 %v6271_v40  ;;  %v6762_v30 = vsub.s32 %v985_v21, %v6697_v37  ;;  %v6794_v60 = vadd.f32 %v632_v44, %v6682_v13 }
 0x39b   :  { %1559 = vmatpush1.bf16.msra.mxu1 %v5827_v61 }
 0x39c   :  { %1560 = vmatprep.subr.bf16.mxu1 %v5832_v62 }
 0x39f   :  { %1561 = vmatpush1.bf16.msra.mxu1 %v5830_v63 }
 0x3a0   :  { %1562 = vmatprep.subr.bf16.mxu1 %v5835_v1  ;;  %v6805_v1 = vadd.f32 %v633_v45, %v6688_v23 }
 0x3a3   :  { %1563 = vmatpush1.bf16.msra.mxu1 %v5833_v5 }
 0x455   :  { %v975_v34 = vpop.f32.mrf.mxu0  ;;  %v6764_v35 = vpop.f32.mrf.mxu1 }
 0x456   :  { %v976_v36 = vadd.f32 %v975_v34, %v6759_v16 }
 0x457   :  { %v6767_v39 = vpop.f32.mrf.mxu0  ;;  %v6769_v41 = vpop.f32.mrf.mxu1 }
 0x458   :  { %v989_v43 = vrot.slane %v976_v36, %v6762_v30 }
 0x459   :  { %v979_v46 = vpop.f32.mrf.mxu0  ;;  %v1412_v47 = vpop.f32.mrf.mxu1 }
 0x45a   :  { %v990_v49 = vcombine.high %v989_v43, %v989_v43  ;;  %v997_v51 = vrot.slane %v989_v43, %v6762_v30  ;;  %v1089_v43 = vadd.s32 4294967280, %v6360_v4  ;;  %v6824_v46 = vsub.s32 %v6360_v4, %v6697_v37 }
 0x45b   :  { %v980_v53 = vpop.f32.mrf.mxu0  ;;  %v1413_v54 = vpop.f32.mrf.mxu1  ;;  %v6827_v47 = vsub.s32 %v1082_v9, %v6697_v37 }
 0x45c   :  { %v1004_v58 = vrot.slane %v990_v49, %v6762_v30  ;;  %v1014_v59 = vrot.slane %v997_v51, %v6700_v38  ;;  %v6830_v49 = vsub.s32 %v1089_v43, %v6697_v37 }
 0x45e   :  { %v1018_v61 = vrot.slane %v1004_v58, %v6700_v38  ;;  %v1021_v42 = vadd.f32 %v1014_v59, %v6783_v52  ;;  %v1022_v62 = vadd.f32 %v1014_v59, %v6786_v55  ;;  %v1023_v63 = vadd.f32 %v1014_v59, %v6789_v56 }
 0x460   :  { %v1025_v57 = vadd.f32 %v1018_v61, %v6794_v60  ;;  %5929 = vtanh.f32 %v1021_v42  ;;  %v1024_v13 = vadd.f32 %v1018_v61, %v6801_v48  ;;  %v1026_v5 = vadd.f32 %v1018_v61, %v6805_v1 }
 0x461   :  { %5931 = vtanh.f32 %v1022_v62 }
 0x462   :  { %5933 = vtanh.f32 %v1023_v63 }
 0x463   :  { %5935 = vtanh.f32 %v1025_v57 }
 0x464   :  { %5937 = vtanh.f32 %v1024_v13 }
 0x465   :  { %5939 = vtanh.f32 %v1026_v5 }
 0x46d   :  { %v5930_v6 = vpop.eup %5929 }
 0x46e   :  { %v5932_v8 = vpop.eup %5931  ;;  %v1039_v10 = vmul.f32 %v5930_v6, %v6812_v2 }
 0x46f   :  { %v5934_v23 = vpop.eup %5933  ;;  %v1040_v11 = vmul.f32 %v5932_v8, %v6812_v2 }
 0x470   :  { %1045 = vadd.xlane.f32.xlu1 %v1039_v10  ;;  %v5936_v12 = vpop.eup %5935  ;;  %v1041_v15 = vmul.f32 %v5934_v23, %v6812_v2 }
 0x471   :  { %1047 = vadd.xlane.f32.xlu0 %v1040_v11  ;;  %v5938_v18 = vpop.eup %5937  ;;  %v1043_v19 = vmul.f32 %v5936_v12, %v6812_v2 }
 0x472   :  { %v5940_v22 = vpop.eup %5939  ;;  %v1042_v27 = vmul.f32 %v5938_v18, %v6812_v2 }
 0x473   :  { %v1044_v17 = vmul.f32 %v5940_v22, %v6812_v2 }
 0x474   :  { %1049 = vadd.xlane.f32.xlu1 %v1041_v15 }
 0x475   :  { %1053 = vadd.xlane.f32.xlu0 %v1043_v19 }
 0x478   :  { %1051 = vadd.xlane.f32.xlu1 %v1042_v27 }
 0x479   :  { %1055 = vadd.xlane.f32.xlu0 %v1044_v17 }
 0x489   :  { %1063 = vperm.xlu1 %5693, %v5510_v28  }
 0x4f9   :  { %v1046_v21 = vpop.xlane.xlu1 %1045 }
 0x4fa   :  { %v1048_v34 = vpop.xlane.xlu0 %1047 }
 0x4fd   :  { %v1050_v36 = vpop.xlane.xlu1 %1049 }
 0x4fe   :  { %v1054_v44 = vpop.xlane.xlu0 %1053 }
 0x501   :  { %v1052_v45 = vpop.xlane.xlu1 %1051 }
 0x502   :  { %v1056_v53 = vpop.xlane.xlu0 %1055 }
 0x505   :  { %v6832_v51 = vpop.permute.xlu1 %1063 }
 0x506   :  { %v1066_v54 = vadd.f32 %v6832_v51, %v1046_v21  ;;  %v1067_v58 = vadd.f32 %v6832_v51, %v1048_v34  ;;  %v1068_v59 = vadd.f32 %v6832_v51, %v1050_v36  ;;  %v1069_v61 = vadd.f32 %v6832_v51, %v1052_v45 }
 0x507   :  { %v1070_v42 = vadd.f32 %v6832_v51, %v1054_v44  ;;  %v1071_v62 = vadd.f32 %v6832_v51, %v1056_v53 }
 0x508   :  { %v1081_v37 = vrot.slane %v1066_v54, %v6824_v46  ;;  %v1086_v63 = vrot.slane %v1067_v58, %v6827_v47  ;;  %v1093_v57 = vrot.slane %v1068_v59, %v6830_v49  ;;  %v1099_v13 = vrot.slane %v1069_v61, %v6824_v46 }
 0x509   :  { %v1103_v5 = vrot.slane %v1070_v42, %v6827_v47  ;;  %v1108_v6 = vrot.slane %v1071_v62, %v6830_v49 }
 0x50a   :  { %v1088_v8 = vsel %vm1087_vm6, %v1086_v63, %v1081_v37 }
 0x50b   :  { %v1095_v10 = vsel %vm1094_vm7, %v1093_v57, %v1088_v8  ;;  %v1104_v23 = vsel %vm1087_vm6, %v1103_v5, %v1099_v13 }
 0x50c   :  { %v1109_v11 = vsel %vm1094_vm7, %v1108_v6, %v1104_v23 }
 0x50d   :  { %v1111_v12 = vsel %vm1110_vm8, %v1109_v11, %v1095_v10 }
 0x50e   :  { %v1114_v15 = vsel %vm1113_vm9, %v1111_v12, -inf }
 0x50f   :  { %1115 = vmax.xlane.f32.xlu0 %v1114_v15 }
 0x598   :  { %v1116_v18 = vpop.xlane.xlu0 %1115 }
 0x599   :  { %v1121_v19 = vrot.slane %v1116_v18, %v6700_v38  ;;  %v1125_v22 = vrot.slane %v1116_v18, %v6710_v3 }
 0x59b   :  { %v1128_v27 = vsub.f32 %v1066_v54, %v1121_v19  ;;  %v1129_v17 = vsub.f32 %v1067_v58, %v1121_v19  ;;  %v1131_v28 = vsub.f32 %v1069_v61, %v1125_v22  ;;  %v1132_v36 = vsub.f32 %v1070_v42, %v1125_v22 }
 0x59c   :  { %v1130_v43 = vsub.f32 %v1068_v59, %v1121_v19  ;;  %v1133_v45 = vsub.f32 %v1071_v62, %v1125_v22 }
 0x59d   :  { %v1134_v21 = vmul.f32 1.442695, %v1128_v27  ;;  %v1136_v34 = vmul.f32 1.442695, %v1129_v17  ;;  %v1140_v9 = vmul.f32 1.442695, %v1131_v28 }
 0x59e   :  { %v1142_v44 = vmul.f32 1.442695, %v1132_v36  ;;  %v1138_v53 = vmul.f32 1.442695, %v1130_v43  ;;  %v1144_v63 = vmul.f32 1.442695, %v1133_v45 }
 0x59f   :  { %5941 = vpow2.f32 %v1134_v21 }
 0x5a0   :  { %5943 = vpow2.f32 %v1136_v34 }
 0x5a1   :  { %5945 = vpow2.f32 %v1140_v9 }
 0x5a2   :  { %5947 = vpow2.f32 %v1142_v44 }
 0x5a3   :  { %5949 = vpow2.f32 %v1138_v53 }
 0x5a4   :  { %5951 = vpow2.f32 %v1144_v63 }
 0x5ac   :  { %v5942_v37 = vpop.eup %5941 }
 0x5ad   :  { %v5944_v57 = vpop.eup %5943  ;;  %1153 = vperm.xlu0 %5694, %v5942_v37  }
 0x5ae   :  { %1156 = vperm.xlu1 %5693, %v5944_v57   ;;  %v5946_v54 = vpop.eup %5945 }
 0x5af   :  { %v5948_v58 = vpop.eup %5947 }
 0x5b0   :  { %v5950_v61 = vpop.eup %5949 }
 0x5b1   :  { %v5952_v42 = vpop.eup %5951 }
 0x5b2   :  { %1162 = vperm.xlu1 %5693, %v5946_v54  }
 0x5b6   :  { %1165 = vperm.xlu1 %5693, %v5948_v58  }
 0x5ba   :  { %1159 = vperm.xlu1 %5693, %v5950_v61  }
 0x5be   :  { %1168 = vperm.xlu1 %5693, %v5952_v42  }
 0x628   :  { %v1154_v5 = vpop.permute.xlu0 %1153 }
 0x629   :  { %v1157_v59 = vpop.permute.xlu1 %1156  ;;  %v1173_v10 = vrot.slane %v1154_v5, %v6824_v46 }
 0x62a   :  { %v1177_v8 = vrot.slane %v1157_v59, %v6827_v47 }
 0x62c   :  { %v1178_v19 = vsel %vm1087_vm6, %v1177_v8, %v1173_v10  ;;  %v6868_v8 = vld [vmem:[#allocation3 + $0x20] sm:$0xff]  ;;  %v6871_v10 = vld [vmem:[#allocation3 + $0x18] sm:$0xff] }
 0x62d   :  { %v1163_v13 = vpop.permute.xlu1 %1162 }
 0x62e   :  { %v1187_v12 = vrot.slane %v1163_v13, %v6824_v46 }
 0x631   :  { %v1166_v62 = vpop.permute.xlu1 %1165 }
 0x632   :  { %v1191_v23 = vrot.slane %v1166_v62, %v6827_v47 }
 0x634   :  { %v1192_v22 = vsel %vm1087_vm6, %v1191_v23, %v1187_v12  ;;  %v6880_v12 = vld [vmem:[#allocation3 + $0x28] sm:$0xff] }
 0x635   :  { %v1160_v6 = vpop.permute.xlu1 %1159 }
 0x636   :  { %v1182_v11 = vrot.slane %v1160_v6, %v6830_v49 }
 0x638   :  { %v1183_v27 = vsel %vm1094_vm7, %v1182_v11, %v1178_v19 }
 0x639   :  { %v1169_v15 = vpop.permute.xlu1 %1168 }
 0x63a   :  { %v1196_v18 = vrot.slane %v1169_v15, %v6830_v49 }
 0x63c   :  { %v1197_v17 = vsel %vm1094_vm7, %v1196_v18, %v1192_v22 }
 0x63d   :  { %v1198_v28 = vsel %vm1110_vm8, %v1197_v17, %v1183_v27 }
 0x63e   :  { %v1200_v21 = vsel %vm1113_vm9, %v1198_v28, 0.0 }
 0x63f   :  { %1201 = vadd.xlane.f32.xlu1 %v1200_v21  ;;  %v6887_v21 = vld [vmem:[#allocation3 + $0x10] sm:$0xff] }
 0x6c8   :  { %v1202_v34 = vpop.xlane.xlu1 %1201 }
 0x6c9   :  { %5953 = vrcp.f32 %v1202_v34 }
 0x6d6   :  { %v5954_v36 = vpop.eup %5953 }
 0x6d7   :  { %v1212_v9 = vrot.slane %v5954_v36, %v6710_v3  ;;  %v1208_v45 = vrot.slane %v5954_v36, %v6700_v38 }
 0x6d9   :  { %v1218_v43 = vmul.f32 %v5946_v54, %v1212_v9  ;;  %v1219_v44 = vmul.f32 %v5948_v58, %v1212_v9  ;;  %v1215_v53 = vmul.f32 %v5942_v37, %v1208_v45  ;;  %v1216_v63 = vmul.f32 %v5944_v57, %v1208_v45  ;;  %v6874_v37 = vld [vmem:[#allocation3 + $0x8] sm:$0xff] }
 0x6da   :  { %v1220_v59 = vmul.f32 %v5952_v42, %v1212_v9  ;;  %v1217_v13 = vmul.f32 %v5950_v61, %v1208_v45  ;;  %v6878_v61 = vld [vmem:[#allocation3] sm:$0xff] }
 0x6db   :  { %1244 = vperm.xlu0 %5694, %v1218_v43  }
 0x6df   :  { %1249 = vperm.xlu0 %5694, %v1219_v44  }
 0x6e3   :  { %1229 = vperm.xlu0 %5694, %v1215_v53  }
 0x6e7   :  { %1234 = vperm.xlu0 %5694, %v1216_v63  }
 0x6eb   :  { %1254 = vperm.xlu0 %5694, %v1220_v59  }
 0x6ef   :  { %1239 = vperm.xlu0 %5694, %v1217_v13  }
 0x756   :  { %v1245_v62 = vpop.permute.xlu0 %1244 }
 0x757   :  { %v1260_v23 = vmul.f32 %v1245_v62, %v6871_v10 }
 0x759   :  { %v1274_v15 = vsel %vm640_vm3, %v1260_v23, 0.0 }
 0x75a   :  { %v1250_v5 = vpop.permute.xlu0 %1249 }
 0x75b   :  { %v1261_v54 = vmul.f32 %v1250_v5, %v6868_v8 }
 0x75d   :  { %v1275_v57 = vsel %vm640_vm3, %v1261_v54, 0.0 }
 0x75e   :  { %v1230_v6 = vpop.permute.xlu0 %1229  ;;  %v1276_v22 = vadd.f32 %v1275_v57, %v1274_v15  ;;  %v6900_v15 = vrot.slane %v6755_v29, %v6710_v3 }
 0x75f   :  { %v1257_v18 = vmul.f32 %v1230_v6, %v6878_v61 }
 0x761   :  { %v1263_v36 = vsel %vm640_vm3, %v1257_v18, 0.0 }
 0x762   :  { %v1235_v58 = vpop.permute.xlu0 %1234 }
 0x763   :  { %v1258_v42 = vmul.f32 %v1235_v58, %v6874_v37  ;;  %v6895_v58 = vld [vmem:[%s7944_s11] ss:$0 sm:$0xff] }
 0x765   :  { %v1264_v27 = vsel %vm640_vm3, %v1258_v42, 0.0 }
 0x766   :  { %v1255_v11 = vpop.permute.xlu0 %1254  ;;  %v1265_v43 = vadd.f32 %v1264_v27, %v1263_v36  ;;  %v978_v27 = vadd.f32 %v6767_v39, %v6900_v15 }
 0x767   :  { %v1262_v19 = vmul.f32 %v1255_v11, %v6880_v12 }
 0x769   :  { %v1277_v17 = vsel %vm640_vm3, %v1262_v19, 0.0 }
 0x76a   :  { %v1278_v28 = vadd.f32 %v1277_v17, %v1276_v22  ;;  %v1240_v34 = vpop.permute.xlu0 %1239 }
 0x76b   :  { %v1259_v9 = vmul.f32 %v1240_v34, %v6887_v21 }
 0x76c   :  { %v1279_v44 = vrot.slane %v1278_v28, 4 }
 0x76d   :  { %v1266_v45 = vsel %vm640_vm3, %v1259_v9, 0.0 }
 0x76e   :  { %v1280_v53 = vadd.f32 %v1279_v44, %v1278_v28  ;;  %v1267_v63 = vadd.f32 %v1266_v45, %v1265_v43 }
 0x770   :  { %v1281_v59 = vrot.slane %v1280_v53, 2  ;;  %v1268_v13 = vrot.slane %v1267_v63, 4 }
 0x772   :  { %v1282_v62 = vadd.f32 %v1281_v59, %v1280_v53  ;;  %v1269_v5 = vadd.f32 %v1268_v13, %v1267_v63 }
 0x774   :  { %v1283_v6 = vrot.slane %v1282_v62, 1  ;;  %v1270_v54 = vrot.slane %v1269_v5, 2 }
 0x776   :  { %v1284_v23 = vadd.f32 %v1283_v6, %v1282_v62  ;;  %v1271_v57 = vadd.f32 %v1270_v54, %v1269_v5 }
 0x778   :  { %v1272_v42 = vrot.slane %v1271_v57, 1  ;;  %v1292_v11 = vadd.f32 %v6895_v58, %v1284_v23 }
 0x77a   :  { %v1273_v18 = vadd.f32 %v1272_v42, %v1271_v57  ;;  %v1295_v22 = vrot.slane %v1292_v11, 7 }
 0x77c   :  { %v1291_v19 = vadd.f32 %v6895_v58, %v1273_v18 }
 0x77e   :  { %v1296_v17 = vsel %vm1110_vm8, %v1295_v22, %v1291_v19 }
 0x77f   :  { %v1298_v28 = vadd.f32 %v1296_v17, %v978_v27 }
 0x781   :  { %v1300_v34 = vsel %vm666_vm0, %v1298_v28, -inf  ;;  %1299 = vst.msk [vmem:[%s7945_s12] sm:$0x3] %vm666_vm0, %v1298_v28 }
 0x782   :  { %1301 = vmax.xlane.f32.xlu1 %v1300_v34 }
 0x80b   :  { %v1302_v29 = vpop.xlane.xlu1 %1301 }
 0x80c   :  { %vm1303_vm10 = vcmp.ge.f32.partialorder %v1298_v28, %v1302_v29 }
 0x80d   :  { %v1304_v36 = vsel %vm1303_vm10, %v6360_v4, 16 }
 0x80e   :  { %v1305_v9 = vsel %vm666_vm0, %v1304_v36, 2147483647 }
 0x80f   :  { %v1307_v43 = vshra.s32 %v1305_v9, 16  ;;  %v1306_v39 = vand.u32 65535, %v1305_v9 }
 0x811   :  { %v1309_v44 = vcvt.s32.f32 %v1307_v43  ;;  %v1308_v53 = vcvt.s32.f32 %v1306_v39 }
 0x813   :  { %1310 = vmin.xlane.f32.xlu0 %v1309_v44 }
 0x89c   :  { %v1311_v45 = vpop.xlane.xlu0 %1310 }
 0x89d   :  { %vm1312_vm11 = vcmp.eq.f32.partialorder %v1309_v44, %v1311_v45  ;;  %v1317_v59 = vcvt.f32.s32 %v1311_v45 }
 0x89e   :  { %v1313_v63 = vsel %vm1312_vm11, %v1308_v53, inf }
 0x89f   :  { %1314 = vmin.xlane.f32.xlu1 %v1313_v63  ;;  %v1318_v62 = vshll.u32 %v1317_v59, 16 }
 0x928   :  { %v1315_v13 = vpop.xlane.xlu1 %1314 }
 0x929   :  { %v1316_v5 = vcvt.f32.s32 %v1315_v13 }
 0x92b   :  { %v1319_v6 = vadd.s32 %v1318_v62, %v1316_v5 }
 0x92d   :  { %vm1320_vm12 = vcmp.eq.s32.totalorder %v6360_v4, %v1319_v6 }
 0x92e   :  { %v5512_v54 = vsel %vm1320_vm12, 1.0, %v6272_v0 }
 0x92f   :  { %v1323_v23 = vpack.c.bf16 %v5512_v54, %v5512_v54 }
 0x931   :  { %5524 = vmatmul.mubr.msk.bf16.vlgmr.msra.gmra.mxu0 %vm640_vm3, %v1323_v23 }
 0x932   :  { %1964 = vmatpush1.bf16.msra.mxu0 %v6587_v20  ;;  %1987 = vmatprep.mubr.bf16.mxu0 %v6271_v40 }
 0x933   :  { %1965 = vmatprep.subr.bf16.mxu0 %v6605_v24 }
 0x936   :  { %1966 = vmatpush1.bf16.msra.mxu0 %v6612_v25 }
 0x937   :  { %1967 = vmatprep.subr.bf16.mxu0 %v6617_v26 }
 0x93a   :  { %1968 = vmatpush1.bf16.msra.mxu0 %v6637_v31 }
 0x93b   :  { %1969 = vmatprep.subr.bf16.mxu0 %v6643_v32 }
 0x93e   :  { %1970 = vmatpush1.bf16.msra.mxu0 %v6649_v33 }
 0x9f1   :  { %v1462_v57 = vpop.f32.mrf.mxu0 }
 0x9f2   :  { %v1463_v42 = vadd.f32 %v1462_v57, %v6764_v35 }
 0x9f3   :  { %v1464_v11 = vpop.f32.mrf.mxu0 }
 0x9f4   :  { %v1469_v20 = vadd.f32 %v1463_v42, %v6706_v7  ;;  %v1465_v24 = vadd.f32 %v1464_v11, %v6769_v41 }
 0x9f5   :  { %v1466_v18 = vpop.f32.mrf.mxu0 }
 0x9f6   :  { %v5525_v19 = vmul.f32 -1.442695, %v1469_v20  ;;  %v1470_v25 = vadd.f32 %v1465_v24, %v6713_v50 }
 0x9f7   :  { %v1467_v22 = vpop.f32.mrf.mxu0 }
 0x9f8   :  { %5955 = vpow2.f32 %v5525_v19  ;;  %v5526_v35 = vmul.f32 -1.442695, %v1470_v25 }
 0x9f9   :  { %5957 = vtanh.f32 %v1470_v25 }
 0xa05   :  { %v5956_v26 = vpop.eup %5955 }
 0xa06   :  { %v1474_v31 = vadd.f32 1.0, %v5956_v26  ;;  %v5958_v32 = vpop.eup %5957 }
 0xa08   :  { %5959 = vrcp.f32 %v1474_v31 }
 0xa09   :  { %5961 = vpow2.f32 %v5526_v35 }
 0xa15   :  { %v5960_v33 = vpop.eup %5959 }
 0xa16   :  { %v1485_v27 = vmul.f32 %v5960_v33, %v5958_v32  ;;  %v5962_v17 = vpop.eup %5961  ;;  %v1484_v34 = vmul.f32 %v5960_v33, %v6742_v14 }
 0xa17   :  { %v1481_v28 = vadd.f32 1.0, %v5962_v17 }
 0xa18   :  { %1487 = vrot.lane.b32.xlu1 %v1485_v27, %s6273_s5 }
 0xa19   :  { %5963 = vrcp.f32 %v1481_v28 }
 0xa26   :  { %v5964_v41 = vpop.eup %5963 }
 0xa8a   :  { %v1488_v29 = vpop.permute.xlu1 %1487 }
 0xa8b   :  { %v6930_v36 = vadd.f32 %v1488_v29, %v1484_v34 }
 0xa8d   :  { %5965 = vtanh.f32 %v6930_v36 }
 0xa9a   :  { %v5966_v9 = vpop.eup %5965 }
 0xa9b   :  { %v1492_v43 = vmul.f32 %v5966_v9, %v5964_v41 }
 0xa9d   :  { %v1493_v44 = vpack.c.bf16 %v1492_v43, %v1492_v43 }
 0xa9f   :  { %1503 = vrot.lane.b32.xlu1 %v1493_v44, %s6273_s5 }
 0xb11   :  { %v1504_v39 = vpop.permute.xlu1 %1503 }
 0xb12   :  { %5535 = vmatmul.mubr.msk.bf16.vlgmr.msra.gmra.mxu1 %vm741_vm5, %v1504_v39  ;;  %5546 = vmatmul.mubr.msk.bf16.vlgmr.msra.gmra.mxu0 %vm741_vm5, %v1504_v39 }
 0xb13   :  { %2041 = vmatprep.mubr.bf16.mxu1 %v6271_v40  ;;  %2161 = vmatprep.mubr.bf16.mxu0 %v6271_v40 }
 0xbd2   :  { %v1582_v14 = vpop.f32.mrf.mxu1  ;;  %v6938_v45 = vpop.f32.mrf.mxu0 }
 0xbd3   :  { %v1583_v53 = vadd.f32 %v1582_v14, %v6759_v16 }
 0xbd4   :  { %v6941_v63 = vpop.f32.mrf.mxu1  ;;  %v6943_v59 = vpop.f32.mrf.mxu0 }
 0xbd5   :  { %v1596_v13 = vrot.slane %v1583_v53, %v6762_v30 }
 0xbd6   :  { %v1586_v62 = vpop.f32.mrf.mxu1  ;;  %v1993_v5 = vpop.f32.mrf.mxu0 }
 0xbd7   :  { %v1597_v6 = vcombine.high %v1596_v13, %v1596_v13  ;;  %v1604_v54 = vrot.slane %v1596_v13, %v6762_v30 }
 0xbd8   :  { %v1587_v23 = vpop.f32.mrf.mxu1  ;;  %v1994_v57 = vpop.f32.mrf.mxu0 }
 0xbd9   :  { %v1611_v42 = vrot.slane %v1597_v6, %v6762_v30  ;;  %v1621_v11 = vrot.slane %v1604_v54, %v6700_v38 }
 0xbdb   :  { %v1628_v20 = vadd.f32 %v1621_v11, %v6783_v52  ;;  %v1629_v18 = vadd.f32 %v1621_v11, %v6786_v55  ;;  %v1625_v19 = vrot.slane %v1611_v42, %v6700_v38  ;;  %v1630_v22 = vadd.f32 %v1621_v11, %v6789_v56 }
 0xbdd   :  { %5967 = vtanh.f32 %v1628_v20  ;;  %v1631_v24 = vadd.f32 %v1625_v19, %v6801_v48  ;;  %v1632_v25 = vadd.f32 %v1625_v19, %v6794_v60  ;;  %v1633_v26 = vadd.f32 %v1625_v19, %v6805_v1 }
 0xbde   :  { %5969 = vtanh.f32 %v1629_v18 }
 0xbdf   :  { %5971 = vtanh.f32 %v1630_v22 }
 0xbe0   :  { %5973 = vtanh.f32 %v1631_v24 }
 0xbe1   :  { %5975 = vtanh.f32 %v1632_v25 }
 0xbe2   :  { %5977 = vtanh.f32 %v1633_v26 }
 0xbea   :  { %v5968_v31 = vpop.eup %5967 }
 0xbeb   :  { %v5970_v32 = vpop.eup %5969  ;;  %v1640_v33 = vmul.f32 %v5968_v31, %v6812_v2 }
 0xbec   :  { %v1641_v27 = vmul.f32 %v5970_v32, %v6812_v2  ;;  %v5972_v35 = vpop.eup %5971 }
 0xbed   :  { %1646 = vadd.xlane.f32.xlu1 %v1640_v33  ;;  %v1642_v17 = vmul.f32 %v5972_v35, %v6812_v2  ;;  %v5974_v28 = vpop.eup %5973 }
 0xbee   :  { %1648 = vadd.xlane.f32.xlu0 %v1641_v27  ;;  %v1643_v34 = vmul.f32 %v5974_v28, %v6812_v2  ;;  %v5976_v29 = vpop.eup %5975 }
 0xbef   :  { %v1644_v41 = vmul.f32 %v5976_v29, %v6812_v2  ;;  %v5978_v9 = vpop.eup %5977 }
 0xbf0   :  { %v1645_v43 = vmul.f32 %v5978_v9, %v6812_v2 }
 0xbf2   :  { %1650 = vadd.xlane.f32.xlu0 %v1642_v17 }
 0xbf6   :  { %1652 = vadd.xlane.f32.xlu0 %v1643_v34 }
 0xbfa   :  { %1654 = vadd.xlane.f32.xlu0 %v1644_v41 }
 0xbfe   :  { %1656 = vadd.xlane.f32.xlu0 %v1645_v43 }
 0xc76   :  { %v1647_v53 = vpop.xlane.xlu1 %1646 }
 0xc77   :  { %v1649_v44 = vpop.xlane.xlu0 %1648  ;;  %v1658_v62 = vadd.f32 %v1647_v53, %v6832_v51 }
 0xc78   :  { %v1659_v13 = vadd.f32 %v1649_v44, %v6832_v51 }
 0xc79   :  { %v1673_v2 = vrot.slane %v1658_v62, %v6824_v46 }
 0xc7a   :  { %v1677_v57 = vrot.slane %v1659_v13, %v6827_v47 }
 0xc7b   :  { %v1651_v39 = vpop.xlane.xlu0 %1650 }
 0xc7c   :  { %v1660_v6 = vadd.f32 %v1651_v39, %v6832_v51  ;;  %v1678_v24 = vsel %vm1087_vm6, %v1677_v57, %v1673_v2 }
 0xc7e   :  { %v1682_v20 = vrot.slane %v1660_v6, %v6830_v49 }
 0xc7f   :  { %v1653_v14 = vpop.xlane.xlu0 %1652 }
 0xc80   :  { %v1661_v23 = vadd.f32 %v1653_v14, %v6832_v51  ;;  %v1683_v26 = vsel %vm1094_vm7, %v1682_v20, %v1678_v24 }
 0xc82   :  { %v1687_v19 = vrot.slane %v1661_v23, %v6824_v46 }
 0xc83   :  { %v1655_v5 = vpop.xlane.xlu0 %1654 }
 0xc84   :  { %v1662_v54 = vadd.f32 %v1655_v5, %v6832_v51 }
 0xc86   :  { %v1691_v42 = vrot.slane %v1662_v54, %v6827_v47 }
 0xc87   :  { %v1657_v11 = vpop.xlane.xlu0 %1656 }
 0xc88   :  { %v1663_v18 = vadd.f32 %v1657_v11, %v6832_v51  ;;  %v1692_v25 = vsel %vm1087_vm6, %v1691_v42, %v1687_v19 }
 0xc8a   :  { %v1696_v22 = vrot.slane %v1663_v18, %v6830_v49 }
 0xc8c   :  { %v1697_v31 = vsel %vm1094_vm7, %v1696_v22, %v1692_v25 }
 0xc8d   :  { %v1698_v32 = vsel %vm1110_vm8, %v1697_v31, %v1683_v26 }
 0xc8e   :  { %v1700_v33 = vsel %vm1113_vm9, %v1698_v32, -inf }
 0xc8f   :  { %1701 = vmax.xlane.f32.xlu0 %v1700_v33 }
 0xd18   :  { %v1702_v27 = vpop.xlane.xlu0 %1701 }
 0xd19   :  { %v1707_v35 = vrot.slane %v1702_v27, %v6700_v38  ;;  %v1711_v17 = vrot.slane %v1702_v27, %v6710_v3 }
 0xd1b   :  { %v1714_v28 = vsub.f32 %v1658_v62, %v1707_v35  ;;  %v1715_v34 = vsub.f32 %v1659_v13, %v1707_v35  ;;  %v1717_v29 = vsub.f32 %v1661_v23, %v1711_v17  ;;  %v1718_v41 = vsub.f32 %v1662_v54, %v1711_v17 }
 0xd1c   :  { %v1716_v44 = vsub.f32 %v1660_v6, %v1707_v35  ;;  %v1719_v14 = vsub.f32 %v1663_v18, %v1711_v17 }
 0xd1d   :  { %v1720_v9 = vmul.f32 1.442695, %v1714_v28  ;;  %v1722_v43 = vmul.f32 1.442695, %v1715_v34  ;;  %v1726_v39 = vmul.f32 1.442695, %v1717_v29 }
 0xd1e   :  { %v1728_v53 = vmul.f32 1.442695, %v1718_v41  ;;  %v1724_v5 = vmul.f32 1.442695, %v1716_v44  ;;  %v1730_v57 = vmul.f32 1.442695, %v1719_v14 }
 0xd1f   :  { %5979 = vpow2.f32 %v1720_v9 }
 0xd20   :  { %5981 = vpow2.f32 %v1722_v43 }
 0xd21   :  { %5983 = vpow2.f32 %v1726_v39 }
 0xd22   :  { %5985 = vpow2.f32 %v1728_v53 }
 0xd23   :  { %5987 = vpow2.f32 %v1724_v5 }
 0xd24   :  { %5989 = vpow2.f32 %v1730_v57 }
 0xd2c   :  { %v5980_v2 = vpop.eup %5979 }
 0xd2d   :  { %v5982_v42 = vpop.eup %5981  ;;  %1739 = vperm.xlu0 %5694, %v5980_v2  }
 0xd2e   :  { %1742 = vperm.xlu1 %5693, %v5982_v42   ;;  %v5984_v13 = vpop.eup %5983 }
 0xd2f   :  { %v5986_v62 = vpop.eup %5985 }
 0xd30   :  { %v5988_v6 = vpop.eup %5987 }
 0xd31   :  { %1748 = vperm.xlu0 %5694, %v5984_v13   ;;  %v5990_v54 = vpop.eup %5989 }
 0xd32   :  { %1751 = vperm.xlu1 %5693, %v5986_v62  }
 0xd35   :  { %1745 = vperm.xlu0 %5694, %v5988_v6  }
 0xd36   :  { %1754 = vperm.xlu1 %5693, %v5990_v54  }
 0xda8   :  { %v1740_v23 = vpop.permute.xlu0 %1739 }
 0xda9   :  { %v1743_v11 = vpop.permute.xlu1 %1742  ;;  %v1759_v22 = vrot.slane %v1740_v23, %v6824_v46 }
 0xdaa   :  { %v1763_v19 = vrot.slane %v1743_v11, %v6827_v47 }
 0xdac   :  { %v1749_v20 = vpop.permute.xlu0 %1748  ;;  %v1764_v27 = vsel %vm1087_vm6, %v1763_v19, %v1759_v22 }
 0xdad   :  { %v1752_v18 = vpop.permute.xlu1 %1751  ;;  %v1773_v25 = vrot.slane %v1749_v20, %v6824_v46 }
 0xdae   :  { %v1777_v24 = vrot.slane %v1752_v18, %v6827_v47 }
 0xdb0   :  { %v1746_v26 = vpop.permute.xlu0 %1745  ;;  %v1778_v17 = vsel %vm1087_vm6, %v1777_v24, %v1773_v25 }
 0xdb1   :  { %v1755_v31 = vpop.permute.xlu1 %1754  ;;  %v1768_v32 = vrot.slane %v1746_v26, %v6830_v49 }
 0xdb2   :  { %v1782_v33 = vrot.slane %v1755_v31, %v6830_v49 }
 0xdb3   :  { %v1769_v35 = vsel %vm1094_vm7, %v1768_v32, %v1764_v27 }
 0xdb4   :  { %v1783_v28 = vsel %vm1094_vm7, %v1782_v33, %v1778_v17 }
 0xdb5   :  { %v1784_v34 = vsel %vm1110_vm8, %v1783_v28, %v1769_v35 }
 0xdb6   :  { %v1786_v29 = vsel %vm1113_vm9, %v1784_v34, 0.0 }
 0xdb7   :  { %1787 = vadd.xlane.f32.xlu0 %v1786_v29 }
 0xe40   :  { %v1788_v41 = vpop.xlane.xlu0 %1787 }
 0xe41   :  { %5991 = vrcp.f32 %v1788_v41 }
 0xe4e   :  { %v5992_v9 = vpop.eup %5991 }
 0xe4f   :  { %v1798_v43 = vrot.slane %v5992_v9, %v6710_v3  ;;  %v1794_v14 = vrot.slane %v5992_v9, %v6700_v38 }
 0xe51   :  { %v1804_v44 = vmul.f32 %v5984_v13, %v1798_v43  ;;  %v1805_v39 = vmul.f32 %v5986_v62, %v1798_v43  ;;  %v1801_v53 = vmul.f32 %v5980_v2, %v1794_v14  ;;  %v1802_v5 = vmul.f32 %v5982_v42, %v1794_v14 }
 0xe52   :  { %v1806_v57 = vmul.f32 %v5990_v54, %v1798_v43  ;;  %v1803_v23 = vmul.f32 %v5988_v6, %v1794_v14 }
 0xe53   :  { %1830 = vperm.xlu1 %5693, %v1804_v44  }
 0xe57   :  { %1835 = vperm.xlu1 %5693, %v1805_v39  }
 0xe5b   :  { %1815 = vperm.xlu1 %5693, %v1801_v53  }
 0xe5f   :  { %1820 = vperm.xlu1 %5693, %v1802_v5  }
 0xe63   :  { %1840 = vperm.xlu1 %5693, %v1806_v57   ;;  %v1585_v57 = vadd.f32 %v6941_v63, %v6900_v15  ;;  %v7023_v63 = vld [vmem:[%s7937_s4] ss:$8 sps:$4 sm:$0xff]  }
 0xe67   :  { %1825 = vperm.xlu1 %5693, %v1803_v23  }
 0xece   :  { %v1831_v11 = vpop.permute.xlu1 %1830 }
 0xecf   :  { %v1846_v13 = vmul.f32 %v1831_v11, %v6871_v10 }
 0xed1   :  { %v1860_v42 = vsel %vm640_vm3, %v1846_v13, 0.0 }
 0xed2   :  { %v1836_v20 = vpop.permute.xlu1 %1835 }
 0xed3   :  { %v1847_v19 = vmul.f32 %v1836_v20, %v6868_v8 }
 0xed5   :  { %v1861_v62 = vsel %vm640_vm3, %v1847_v19, 0.0 }
 0xed6   :  { %v1816_v18 = vpop.permute.xlu1 %1815  ;;  %v1862_v25 = vadd.f32 %v1861_v62, %v1860_v42  ;;  %v7028_v62 = vld [vmem:[%s7937_s4 + $0x4] ss:$8 sps:$4 sm:$0xff]  }
 0xed7   :  { %v1843_v54 = vmul.f32 %v1816_v18, %v6878_v61  ;;  %2023 = vmatprep.subr.bf16.mxu1 %v7028_v62 }
 0xed8   :  { %2024 = vmatpush1.bf16.msra.mxu1 %v7023_v63 }
 0xed9   :  { %v1849_v10 = vsel %vm640_vm3, %v1843_v54, 0.0 }
 0xeda   :  { %v1821_v22 = vpop.permute.xlu1 %1820 }
 0xedb   :  { %v1844_v24 = vmul.f32 %v1821_v22, %v6874_v37 }
 0xedd   :  { %v1850_v26 = vsel %vm640_vm3, %v1844_v24, 0.0 }
 0xede   :  { %v1841_v2 = vpop.permute.xlu1 %1840  ;;  %v1851_v27 = vadd.f32 %v1850_v26, %v1849_v10 }
 0xedf   :  { %v1848_v6 = vmul.f32 %v1841_v2, %v6880_v12 }
 0xee1   :  { %v1863_v31 = vsel %vm640_vm3, %v1848_v6, 0.0 }
 0xee2   :  { %v1864_v8 = vadd.f32 %v1863_v31, %v1862_v25  ;;  %v1826_v32 = vpop.permute.xlu1 %1825 }
 0xee3   :  { %v1845_v33 = vmul.f32 %v1826_v32, %v6887_v21 }
 0xee4   :  { %v1865_v37 = vrot.slane %v1864_v8, 4 }
 0xee5   :  { %v1852_v35 = vsel %vm640_vm3, %v1845_v33, 0.0 }
 0xee6   :  { %v1866_v17 = vadd.f32 %v1865_v37, %v1864_v8  ;;  %v1853_v28 = vadd.f32 %v1852_v35, %v1851_v27 }
 0xee8   :  { %v1867_v61 = vrot.slane %v1866_v17, 2  ;;  %v1854_v34 = vrot.slane %v1853_v28, 4 }
 0xeea   :  { %v1868_v12 = vadd.f32 %v1867_v61, %v1866_v17  ;;  %v1855_v29 = vadd.f32 %v1854_v34, %v1853_v28 }
 0xeec   :  { %v1869_v41 = vrot.slane %v1868_v12, 1  ;;  %v1856_v9 = vrot.slane %v1855_v29, 2 }
 0xeee   :  { %v1870_v43 = vadd.f32 %v1869_v41, %v1868_v12  ;;  %v1857_v44 = vadd.f32 %v1856_v9, %v1855_v29 }
 0xef0   :  { %v1858_v39 = vrot.slane %v1857_v44, 1  ;;  %v1872_v14 = vadd.f32 %v6895_v58, %v1870_v43 }
 0xef2   :  { %v1859_v53 = vadd.f32 %v1858_v39, %v1857_v44  ;;  %v1875_v5 = vrot.slane %v1872_v14, 7  ;;  %v5841_v39 = vld [vmem:[%s7940_s7 + $0x34] ss:$8 sps:$4 sm:$0xff]  }
 0xef3   :  { %v5844_v14 = vld [vmem:[%s7936_s3 + $0x34] ss:$8 sps:$4 sm:$0xff]   ;;  %2137 = vmatprep.subr.bf16.mxu0 %v5841_v39 }
 0xef4   :  { %v1871_v21 = vadd.f32 %v6895_v58, %v1859_v53  ;;  %v5847_v53 = vld [vmem:[%s7940_s7 + $0x24] ss:$8 sps:$4 sm:$0xff]   ;;  %2544 = vmatprep.subr.bf16.mxu1 %v5844_v14 }
 0xef6   :  { %v1876_v23 = vsel %vm1110_vm8, %v1875_v5, %v1871_v21  ;;  %v7061_v21 = vld [vmem:[%s7936_s3 + $0x24] ss:$8 sps:$4 sm:$0xff]   ;;  %v5845_v5 = vld [vmem:[%s7940_s7 + $0x20] ss:$8 sps:$4 sm:$0xff]  }
 0xef7   :  { %v1878_v11 = vadd.f32 %v1876_v23, %v1585_v57  ;;  %v7070_v57 = vld [vmem:[%s7936_s3 + $0x20] ss:$8 sps:$4 sm:$0xff]   ;;  %v5853_v23 = vld [vmem:[%s7940_s7 + $0x14] ss:$8 sps:$4 sm:$0xff]  }
 0xef9   :  { %v1881_v20 = vsel %vm666_vm0, %v1878_v11, -inf  ;;  %5536 = vst.msk [vmem:[%s7945_s12 + $0x2] sm:$0x3] %vm666_vm0, %v1878_v11 }
 0xefa   :  { %1882 = vmax.xlane.f32.xlu1 %v1881_v20  ;;  %v5851_v20 = vld [vmem:[%s7940_s7 + $0x10] ss:$8 sps:$4 sm:$0xff]  }
 0xf83   :  { %v1883_v18 = vpop.xlane.xlu1 %1882 }
 0xf84   :  { %vm1884_vm13 = vcmp.ge.f32.partialorder %v1878_v11, %v1883_v18  ;;  %v7079_v11 = vld [vmem:[%s7936_s3 + $0x14] ss:$8 sps:$4 sm:$0xff]   ;;  %v7088_v18 = vld [vmem:[%s7936_s3 + $0x10] ss:$8 sps:$4 sm:$0xff]  }
 0xf85   :  { %v1885_v19 = vsel %vm1884_vm13, %v6360_v4, 16 }
 0xf86   :  { %v1886_v58 = vsel %vm666_vm0, %v1885_v19, 2147483647  ;;  %v5859_v19 = vld [vmem:[%s7940_s7 + $0x4] ss:$8 sps:$4 sm:$0xff]  }
 0xf87   :  { %v1888_v22 = vshra.s32 %v1886_v58, 16  ;;  %v1887_v24 = vand.u32 65535, %v1886_v58  ;;  %v7097_v58 = vld [vmem:[%s7936_s3 + $0x4] ss:$8 sps:$4 sm:$0xff]  }
 0xf89   :  { %v1890_v13 = vcvt.s32.f32 %v1888_v22  ;;  %v1889_v42 = vcvt.s32.f32 %v1887_v24  ;;  %v5857_v22 = vld [vmem:[%s7940_s7] ss:$8 sps:$4 sm:$0xff]  }
 0xf8b   :  { %1891 = vmin.xlane.f32.xlu0 %v1890_v13 }
0x1014   :  { %v1892_v2 = vpop.xlane.xlu0 %1891 }
0x1015   :  { %vm1893_vm14 = vcmp.eq.f32.partialorder %v1890_v13, %v1892_v2  ;;  %v1898_v6 = vcvt.f32.s32 %v1892_v2  ;;  %v7106_v13 = vld [vmem:[%s7936_s3] ss:$8 sps:$4 sm:$0xff]  }
0x1016   :  { %v1894_v54 = vsel %vm1893_vm14, %v1889_v42, inf }
0x1017   :  { %1895 = vmin.xlane.f32.xlu0 %v1894_v54  ;;  %v1899_v26 = vshll.u32 %v1898_v6, 16 }
0x10a0   :  { %v1896_v25 = vpop.xlane.xlu0 %1895 }
0x10a1   :  { %v1897_v31 = vcvt.f32.s32 %v1896_v25 }
0x10a3   :  { %v1900_v8 = vadd.s32 %v1899_v26, %v1897_v31 }
0x10a5   :  { %vm1901_vm15 = vcmp.eq.s32.totalorder %v6360_v4, %v1900_v8 }
0x10a6   :  { %v5537_v32 = vsel %vm1901_vm15, 1.0, %v6272_v0 }
0x10a7   :  { %v1904_v10 = vpack.c.bf16 %v5537_v32, %v5537_v32 }
0x10a9   :  { %5549 = vmatmul.mubr.msk.bf16.vlgmr.msra.gmra.mxu1 %vm640_vm3, %v1904_v10 }
0x10aa   :  { %2568 = vmatprep.mubr.bf16.mxu1 %v6271_v40 }
0x1169   :  { %v2043_v33 = vpop.f32.mrf.mxu1 }
0x116a   :  { %v2044_v27 = vadd.f32 %v2043_v33, %v6938_v45  ;;  %v5839_v45 = vld [vmem:[%s7940_s7 + $0x30] ss:$8 sps:$4 sm:$0xff]  }
0x116b   :  { %v2045_v37 = vpop.f32.mrf.mxu1  ;;  %2138 = vmatpush1.bf16.msra.mxu0 %v5839_v45 }
0x116c   :  { %v2050_v35 = vadd.f32 %v2044_v27, %v6706_v7  ;;  %v2046_v34 = vadd.f32 %v2045_v37, %v6943_v59  ;;  %v7050_v59 = vld [vmem:[%s7936_s3 + $0x30] ss:$8 sps:$4 sm:$0xff]   ;;  %2139 = vmatprep.subr.bf16.mxu0 %v5847_v53 }
0x116d   :  { %v2047_v17 = vpop.f32.mrf.mxu1  ;;  %2545 = vmatpush1.bf16.msra.mxu1 %v7050_v59 }
0x116e   :  { %v5550_v28 = vmul.f32 -1.442695, %v2050_v35  ;;  %v2051_v12 = vadd.f32 %v2046_v34, %v6713_v50  ;;  %2546 = vmatprep.subr.bf16.mxu1 %v7061_v21 }
0x116f   :  { %v2048_v61 = vpop.f32.mrf.mxu1  ;;  %2140 = vmatpush1.bf16.msra.mxu0 %v5845_v5 }
0x1170   :  { %5993 = vpow2.f32 %v5550_v28  ;;  %2141 = vmatprep.subr.bf16.mxu0 %v5853_v23  ;;  %v5551_v24 = vmul.f32 -1.442695, %v2051_v12 }
0x1171   :  { %5995 = vtanh.f32 %v2051_v12  ;;  %2547 = vmatpush1.bf16.msra.mxu1 %v7070_v57 }
0x1172   :  { %2548 = vmatprep.subr.bf16.mxu1 %v7079_v11 }
0x1173   :  { %2142 = vmatpush1.bf16.msra.mxu0 %v5851_v20 }
0x1174   :  { %2143 = vmatprep.subr.bf16.mxu0 %v5859_v19 }
0x1175   :  { %2549 = vmatpush1.bf16.msra.mxu1 %v7088_v18 }
0x1176   :  { %2550 = vmatprep.subr.bf16.mxu1 %v7097_v58 }
0x1177   :  { %2144 = vmatpush1.bf16.msra.mxu0 %v5857_v22 }
0x1178   :  { %2604 = vmatprep.subr.bf16.mxu0 %v7028_v62 }
0x1179   :  { %2551 = vmatpush1.bf16.msra.mxu1 %v7106_v13 }
0x117a   :  { %2718 = vmatprep.subr.bf16.mxu1 %v5841_v39 }
0x117d   :  { %v5994_v29 = vpop.eup %5993 }
0x117e   :  { %v2055_v41 = vadd.f32 1.0, %v5994_v29  ;;  %v5996_v9 = vpop.eup %5995 }
0x1180   :  { %5997 = vrcp.f32 %v2055_v41 }
0x1181   :  { %5999 = vpow2.f32 %v5551_v24 }
0x118d   :  { %v5998_v43 = vpop.eup %5997 }
0x118e   :  { %v2066_v44 = vmul.f32 %v5998_v43, %v5996_v9  ;;  %v6000_v2 = vpop.eup %5999  ;;  %v2065_v54 = vmul.f32 %v5998_v43, %v6930_v36 }
0x118f   :  { %v2062_v42 = vadd.f32 1.0, %v6000_v2 }
0x1190   :  { %2068 = vrot.lane.b32.xlu0 %v2066_v44, %s6273_s5 }
0x1191   :  { %6001 = vrcp.f32 %v2062_v42 }
0x119e   :  { %v6002_v26 = vpop.eup %6001 }
0x1202   :  { %v2069_v6 = vpop.permute.xlu0 %2068 }
0x1203   :  { %v7112_v25 = vadd.f32 %v2069_v6, %v2065_v54 }
0x1205   :  { %6003 = vtanh.f32 %v7112_v25 }
0x1212   :  { %v6004_v31 = vpop.eup %6003 }
0x1213   :  { %v2073_v8 = vmul.f32 %v6004_v31, %v6002_v26 }
0x1215   :  { %v2074_v32 = vpack.c.bf16 %v2073_v8, %v2073_v8 }
0x1217   :  { %2084 = vrot.lane.b32.xlu0 %v2074_v32, %s6273_s5 }
0x1289   :  { %v2085_v62 = vpop.permute.xlu0 %2084 }
0x128a   :  { %5560 = vmatmul.mubr.msk.bf16.vlgmr.msra.gmra.mxu0 %vm741_vm5, %v2085_v62  ;;  %5571 = vmatmul.mubr.msk.bf16.vlgmr.msra.gmra.mxu1 %vm741_vm5, %v2085_v62 }
0x128b   :  { %2605 = vmatpush1.bf16.msra.mxu0 %v7023_v63  ;;  %2622 = vmatprep.mubr.bf16.mxu0 %v6271_v40 }
0x128c   :  { %3125 = vmatprep.subr.bf16.mxu0 %v5844_v14  ;;  %2719 = vmatpush1.bf16.msra.mxu1 %v5839_v45 }
0x128d   :  { %2720 = vmatprep.subr.bf16.mxu1 %v5847_v53  ;;  %2742 = vmatprep.mubr.bf16.mxu1 %v6271_v40 }
0x1290   :  { %2721 = vmatpush1.bf16.msra.mxu1 %v5845_v5 }
0x1291   :  { %2722 = vmatprep.subr.bf16.mxu1 %v5853_v23 }
0x1294   :  { %2723 = vmatpush1.bf16.msra.mxu1 %v5851_v20  ;;  %v7142_v20 = vld [vmem:[%s7942_s9] ss:$0 sm:$0xff] }
0x1295   :  { %2724 = vmatprep.subr.bf16.mxu1 %v5859_v19 }
0x1298   :  { %2725 = vmatpush1.bf16.msra.mxu1 %v5857_v22 }
0x134a   :  { %v2163_v36 = vpop.f32.mrf.mxu0  ;;  %v7121_v10 = vpop.f32.mrf.mxu1 }
0x134b   :  { %v2164_v33 = vadd.f32 %v2163_v36, %v6759_v16 }
0x134c   :  { %v7124_v27 = vpop.f32.mrf.mxu0  ;;  %v7126_v63 = vpop.f32.mrf.mxu1 }
0x134d   :  { %v2177_v37 = vrot.slane %v2164_v33, %v6762_v30 }
0x134e   :  { %v2167_v35 = vpop.f32.mrf.mxu0  ;;  %v2574_v17 = vpop.f32.mrf.mxu1 }
0x134f   :  { %v2178_v28 = vcombine.high %v2177_v37, %v2177_v37  ;;  %v2185_v61 = vrot.slane %v2177_v37, %v6762_v30 }
0x1350   :  { %v2168_v34 = vpop.f32.mrf.mxu0  ;;  %v2575_v12 = vpop.f32.mrf.mxu1 }
0x1351   :  { %v2192_v29 = vrot.slane %v2178_v28, %v6762_v30  ;;  %v2202_v41 = vrot.slane %v2185_v61, %v6700_v38 }
0x1353   :  { %v2206_v9 = vrot.slane %v2192_v29, %v6700_v38  ;;  %v2209_v43 = vadd.f32 %v2202_v41, %v6783_v52  ;;  %v2210_v44 = vadd.f32 %v2202_v41, %v6786_v55  ;;  %v2211_v45 = vadd.f32 %v2202_v41, %v6789_v56 }
0x1355   :  { %6005 = vtanh.f32 %v2209_v43  ;;  %v2212_v39 = vadd.f32 %v2206_v9, %v6801_v48  ;;  %v2213_v14 = vadd.f32 %v2206_v9, %v6794_v60  ;;  %v2214_v53 = vadd.f32 %v2206_v9, %v6805_v1 }
0x1356   :  { %6007 = vtanh.f32 %v2210_v44 }
0x1357   :  { %6009 = vtanh.f32 %v2211_v45 }
0x1358   :  { %6011 = vtanh.f32 %v2212_v39 }
0x1359   :  { %6013 = vtanh.f32 %v2213_v14 }
0x135a   :  { %6015 = vtanh.f32 %v2214_v53 }
0x1362   :  { %v6006_v5 = vpop.eup %6005 }
0x1363   :  { %v6008_v23 = vpop.eup %6007  ;;  %v2221_v19 = vmul.f32 %v7142_v20, %v6006_v5 }
0x1364   :  { %v6010_v22 = vpop.eup %6009  ;;  %v2222_v24 = vmul.f32 %v7142_v20, %v6008_v23 }
0x1365   :  { %2227 = vadd.xlane.f32.xlu1 %v2221_v19  ;;  %v2223_v2 = vmul.f32 %v7142_v20, %v6010_v22  ;;  %v6012_v42 = vpop.eup %6011 }
0x1366   :  { %2229 = vadd.xlane.f32.xlu0 %v2222_v24  ;;  %v2224_v54 = vmul.f32 %v7142_v20, %v6012_v42  ;;  %v6014_v6 = vpop.eup %6013 }
0x1367   :  { %v2225_v26 = vmul.f32 %v7142_v20, %v6014_v6  ;;  %v6016_v31 = vpop.eup %6015 }
0x1368   :  { %v2226_v8 = vmul.f32 %v7142_v20, %v6016_v31 }
0x1369   :  { %2231 = vadd.xlane.f32.xlu1 %v2223_v2 }
0x136d   :  { %2233 = vadd.xlane.f32.xlu1 %v2224_v54 }
0x1371   :  { %2235 = vadd.xlane.f32.xlu1 %v2225_v26 }
0x1375   :  { %2237 = vadd.xlane.f32.xlu1 %v2226_v8 }
0x13ee   :  { %v2228_v32 = vpop.xlane.xlu1 %2227 }
0x13ef   :  { %v2230_v33 = vpop.xlane.xlu0 %2229  ;;  %v2239_v35 = vadd.f32 %v2228_v32, %v6832_v51 }
0x13f0   :  { %v2240_v37 = vadd.f32 %v2230_v33, %v6832_v51 }
0x13f1   :  { %v2254_v29 = vrot.slane %v2239_v35, %v6824_v46 }
0x13f2   :  { %v2232_v62 = vpop.xlane.xlu1 %2231  ;;  %v2258_v12 = vrot.slane %v2240_v37, %v6827_v47 }
0x13f3   :  { %v2241_v28 = vadd.f32 %v2232_v62, %v6832_v51 }
0x13f4   :  { %v2259_v14 = vsel %vm1087_vm6, %v2258_v12, %v2254_v29 }
0x13f5   :  { %v2263_v43 = vrot.slane %v2241_v28, %v6830_v49 }
0x13f6   :  { %v2234_v36 = vpop.xlane.xlu1 %2233 }
0x13f7   :  { %v2242_v34 = vadd.f32 %v2234_v36, %v6832_v51  ;;  %v2264_v5 = vsel %vm1094_vm7, %v2263_v43, %v2259_v14 }
0x13f9   :  { %v2268_v45 = vrot.slane %v2242_v34, %v6824_v46 }
0x13fa   :  { %v2236_v17 = vpop.xlane.xlu1 %2235 }
0x13fb   :  { %v2243_v61 = vadd.f32 %v2236_v17, %v6832_v51 }
0x13fd   :  { %v2272_v41 = vrot.slane %v2243_v61, %v6827_v47 }
0x13fe   :  { %v2238_v9 = vpop.xlane.xlu1 %2237 }
0x13ff   :  { %v2244_v44 = vadd.f32 %v2238_v9, %v6832_v51  ;;  %v2273_v53 = vsel %vm1087_vm6, %v2272_v41, %v2268_v45 }
0x1401   :  { %v2277_v39 = vrot.slane %v2244_v44, %v6830_v49 }
0x1403   :  { %v2278_v23 = vsel %vm1094_vm7, %v2277_v39, %v2273_v53 }
0x1404   :  { %v2279_v19 = vsel %vm1110_vm8, %v2278_v23, %v2264_v5 }
0x1405   :  { %v2281_v22 = vsel %vm1113_vm9, %v2279_v19, -inf }
0x1406   :  { %2282 = vmax.xlane.f32.xlu1 %v2281_v22 }
0x148f   :  { %v2283_v24 = vpop.xlane.xlu1 %2282 }
0x1490   :  { %v2288_v2 = vrot.slane %v2283_v24, %v6700_v38  ;;  %v2292_v42 = vrot.slane %v2283_v24, %v6710_v3 }
0x1492   :  { %v2295_v54 = vsub.f32 %v2239_v35, %v2288_v2  ;;  %v2296_v6 = vsub.f32 %v2240_v37, %v2288_v2  ;;  %v2298_v26 = vsub.f32 %v2242_v34, %v2292_v42  ;;  %v2299_v32 = vsub.f32 %v2243_v61, %v2292_v42 }
0x1493   :  { %v2297_v36 = vsub.f32 %v2241_v28, %v2288_v2  ;;  %v2300_v17 = vsub.f32 %v2244_v44, %v2292_v42 }
0x1494   :  { %v2301_v31 = vmul.f32 1.442695, %v2295_v54  ;;  %v2303_v8 = vmul.f32 1.442695, %v2296_v6  ;;  %v2307_v62 = vmul.f32 1.442695, %v2298_v26 }
0x1495   :  { %v2309_v33 = vmul.f32 1.442695, %v2299_v32  ;;  %v2305_v12 = vmul.f32 1.442695, %v2297_v36  ;;  %v2311_v29 = vmul.f32 1.442695, %v2300_v17 }
0x1496   :  { %6017 = vpow2.f32 %v2301_v31 }
0x1497   :  { %6019 = vpow2.f32 %v2303_v8 }
0x1498   :  { %6021 = vpow2.f32 %v2307_v62 }
0x1499   :  { %6023 = vpow2.f32 %v2309_v33 }
0x149a   :  { %6025 = vpow2.f32 %v2305_v12 }
0x149b   :  { %6027 = vpow2.f32 %v2311_v29 }
0x14a3   :  { %v6018_v41 = vpop.eup %6017 }
0x14a4   :  { %v6020_v9 = vpop.eup %6019  ;;  %2320 = vperm.xlu1 %5693, %v6018_v41  }
0x14a5   :  { %2323 = vperm.xlu0 %5694, %v6020_v9   ;;  %v6022_v37 = vpop.eup %6021 }
0x14a6   :  { %v6024_v35 = vpop.eup %6023 }
0x14a7   :  { %v6026_v61 = vpop.eup %6025 }
0x14a8   :  { %2329 = vperm.xlu1 %5693, %v6022_v37   ;;  %v6028_v34 = vpop.eup %6027 }
0x14ac   :  { %2332 = vperm.xlu1 %5693, %v6024_v35  }
0x14b0   :  { %2326 = vperm.xlu1 %5693, %v6026_v61  }
0x14b4   :  { %2335 = vperm.xlu1 %5693, %v6028_v34  }
0x151f   :  { %v2321_v28 = vpop.permute.xlu1 %2320 }
0x1520   :  { %v2324_v45 = vpop.permute.xlu0 %2323  ;;  %v2340_v53 = vrot.slane %v2321_v28, %v6824_v46 }
0x1521   :  { %v2344_v14 = vrot.slane %v2324_v45, %v6827_v47 }
0x1523   :  { %v2330_v43 = vpop.permute.xlu1 %2329  ;;  %v2345_v2 = vsel %vm1087_vm6, %v2344_v14, %v2340_v53  ;;  %v7184_v14 = vld [vmem:[#allocation3 + $0x20] sm:$0xff]  ;;  %v7187_v53 = vld [vmem:[#allocation3 + $0x18] sm:$0xff] }
0x1524   :  { %v2354_v19 = vrot.slane %v2330_v43, %v6824_v46 }
0x1527   :  { %v2333_v44 = vpop.permute.xlu1 %2332 }
0x1528   :  { %v2358_v5 = vrot.slane %v2333_v44, %v6827_v47 }
0x152a   :  { %v2359_v42 = vsel %vm1087_vm6, %v2358_v5, %v2354_v19 }
0x152b   :  { %v2327_v39 = vpop.permute.xlu1 %2326 }
0x152c   :  { %v2349_v23 = vrot.slane %v2327_v39, %v6830_v49 }
0x152e   :  { %v2350_v54 = vsel %vm1094_vm7, %v2349_v23, %v2345_v2  ;;  %v7196_v23 = vld [vmem:[#allocation3 + $0x28] sm:$0xff] }
0x152f   :  { %v2336_v22 = vpop.permute.xlu1 %2335 }
0x1530   :  { %v2363_v24 = vrot.slane %v2336_v22, %v6830_v49 }
0x1532   :  { %v2364_v6 = vsel %vm1094_vm7, %v2363_v24, %v2359_v42 }
0x1533   :  { %v2365_v26 = vsel %vm1110_vm8, %v2364_v6, %v2350_v54 }
0x1534   :  { %v2367_v31 = vsel %vm1113_vm9, %v2365_v26, 0.0 }
0x1535   :  { %2368 = vadd.xlane.f32.xlu0 %v2367_v31  ;;  %v7203_v31 = vld [vmem:[#allocation3 + $0x10] sm:$0xff] }
0x15be   :  { %v2369_v8 = vpop.xlane.xlu0 %2368 }
0x15bf   :  { %6029 = vrcp.f32 %v2369_v8 }
0x15cc   :  { %v6030_v32 = vpop.eup %6029 }
0x15cd   :  { %v2379_v62 = vrot.slane %v6030_v32, %v6710_v3  ;;  %v2375_v17 = vrot.slane %v6030_v32, %v6700_v38 }
0x15cf   :  { %v2385_v36 = vmul.f32 %v6022_v37, %v2379_v62  ;;  %v2386_v33 = vmul.f32 %v6024_v35, %v2379_v62  ;;  %v2382_v12 = vmul.f32 %v6018_v41, %v2375_v17  ;;  %v2383_v29 = vmul.f32 %v6020_v9, %v2375_v17  ;;  %v7190_v41 = vld [vmem:[#allocation3 + $0x8] sm:$0xff] }
0x15d0   :  { %v2387_v28 = vmul.f32 %v6028_v34, %v2379_v62  ;;  %v2384_v43 = vmul.f32 %v6026_v61, %v2375_v17  ;;  %v7194_v61 = vld [vmem:[#allocation3] sm:$0xff] }
0x15d1   :  { %2411 = vperm.xlu1 %5693, %v2385_v36  }
0x15d5   :  { %2416 = vperm.xlu1 %5693, %v2386_v33  }
0x15d9   :  { %2396 = vperm.xlu1 %5693, %v2382_v12  }
0x15dd   :  { %2401 = vperm.xlu1 %5693, %v2383_v29  }
0x15e1   :  { %2421 = vperm.xlu1 %5693, %v2387_v28  }
0x15e5   :  { %2406 = vperm.xlu1 %5693, %v2384_v43  }
0x164c   :  { %v2412_v44 = vpop.permute.xlu1 %2411 }
0x164d   :  { %v2427_v5 = vmul.f32 %v2412_v44, %v7187_v53 }
0x164f   :  { %v2441_v22 = vsel %vm640_vm3, %v2427_v5, 0.0 }
0x1650   :  { %v2417_v45 = vpop.permute.xlu1 %2416 }
0x1651   :  { %v2428_v37 = vmul.f32 %v2417_v45, %v7184_v14 }
0x1653   :  { %v2442_v9 = vsel %vm640_vm3, %v2428_v37, 0.0 }
0x1654   :  { %v2397_v39 = vpop.permute.xlu1 %2396  ;;  %v2443_v42 = vadd.f32 %v2442_v9, %v2441_v22 }
0x1655   :  { %v2424_v24 = vmul.f32 %v2397_v39, %v7194_v61 }
0x1657   :  { %v2430_v32 = vsel %vm640_vm3, %v2424_v24, 0.0 }
0x1658   :  { %v2402_v35 = vpop.permute.xlu1 %2401 }
0x1659   :  { %v2425_v34 = vmul.f32 %v2402_v35, %v7190_v41 }
0x165b   :  { %v2431_v54 = vsel %vm640_vm3, %v2425_v34, 0.0  ;;  %v7211_v34 = vld [vmem:[%s7944_s11] ss:$0 sm:$0xff] }
0x165c   :  { %v2422_v19 = vpop.permute.xlu1 %2421  ;;  %v2432_v36 = vadd.f32 %v2431_v54, %v2430_v32 }
0x165d   :  { %v2429_v2 = vmul.f32 %v2422_v19, %v7196_v23 }
0x165f   :  { %v2444_v6 = vsel %vm640_vm3, %v2429_v2, 0.0 }
0x1660   :  { %v2445_v26 = vadd.f32 %v2444_v6, %v2443_v42  ;;  %v2407_v8 = vpop.permute.xlu1 %2406  ;;  %v2166_v42 = vadd.f32 %v7124_v27, %v6900_v15 }
0x1661   :  { %v2426_v62 = vmul.f32 %v2407_v8, %v7203_v31 }
0x1662   :  { %v2446_v33 = vrot.slane %v2445_v26, 4 }
0x1663   :  { %v2433_v17 = vsel %vm640_vm3, %v2426_v62, 0.0 }
0x1664   :  { %v2447_v12 = vadd.f32 %v2446_v33, %v2445_v26  ;;  %v2434_v29 = vadd.f32 %v2433_v17, %v2432_v36 }
0x1666   :  { %v2448_v28 = vrot.slane %v2447_v12, 2  ;;  %v2435_v43 = vrot.slane %v2434_v29, 4 }
0x1668   :  { %v2449_v44 = vadd.f32 %v2448_v28, %v2447_v12  ;;  %v2436_v45 = vadd.f32 %v2435_v43, %v2434_v29 }
0x166a   :  { %v2450_v39 = vrot.slane %v2449_v44, 1  ;;  %v2437_v37 = vrot.slane %v2436_v45, 2 }
0x166c   :  { %v2451_v35 = vadd.f32 %v2450_v39, %v2449_v44  ;;  %v2438_v5 = vadd.f32 %v2437_v37, %v2436_v45 }
0x166e   :  { %v2439_v9 = vrot.slane %v2438_v5, 1  ;;  %v2453_v19 = vadd.f32 %v7211_v34, %v2451_v35 }
0x1670   :  { %v2440_v22 = vadd.f32 %v2439_v9, %v2438_v5  ;;  %v2456_v2 = vrot.slane %v2453_v19, 7 }
0x1672   :  { %v2452_v24 = vadd.f32 %v7211_v34, %v2440_v22 }
0x1674   :  { %v2457_v54 = vsel %vm1110_vm8, %v2456_v2, %v2452_v24 }
0x1675   :  { %v2459_v6 = vadd.f32 %v2457_v54, %v2166_v42 }
0x1677   :  { %v2462_v26 = vsel %vm666_vm0, %v2459_v6, -inf  ;;  %5561 = vst.msk [vmem:[%s7945_s12 + $0x4] sm:$0x3] %vm666_vm0, %v2459_v6 }
0x1678   :  { %2463 = vmax.xlane.f32.xlu1 %v2462_v26 }
0x1701   :  { %v2464_v8 = vpop.xlane.xlu1 %2463 }
0x1702   :  { %vm2465_vm1 = vcmp.ge.f32.partialorder %v2459_v6, %v2464_v8 }
0x1703   :  { %v2466_v32 = vsel %vm2465_vm1, %v6360_v4, 16 }
0x1704   :  { %v2467_v62 = vsel %vm666_vm0, %v2466_v32, 2147483647 }
0x1705   :  { %v2469_v36 = vshra.s32 %v2467_v62, 16  ;;  %v2468_v27 = vand.u32 65535, %v2467_v62 }
0x1707   :  { %v2471_v33 = vcvt.s32.f32 %v2469_v36  ;;  %v2470_v12 = vcvt.s32.f32 %v2468_v27 }
0x1709   :  { %2472 = vmin.xlane.f32.xlu0 %v2471_v33 }
0x1792   :  { %v2473_v17 = vpop.xlane.xlu0 %2472 }
0x1793   :  { %vm2474_vm2 = vcmp.eq.f32.partialorder %v2471_v33, %v2473_v17  ;;  %v2479_v28 = vcvt.f32.s32 %v2473_v17 }
0x1794   :  { %v2475_v29 = vsel %vm2474_vm2, %v2470_v12, inf }
0x1795   :  { %2476 = vmin.xlane.f32.xlu0 %v2475_v29  ;;  %v2480_v44 = vshll.u32 %v2479_v28, 16 }
0x181e   :  { %v2477_v43 = vpop.xlane.xlu0 %2476 }
0x181f   :  { %v2478_v45 = vcvt.f32.s32 %v2477_v43 }
0x1821   :  { %v2481_v39 = vadd.s32 %v2480_v44, %v2478_v45 }
0x1823   :  { %vm2482_vm4 = vcmp.eq.s32.totalorder %v6360_v4, %v2481_v39 }
0x1824   :  { %v5562_v37 = vsel %vm2482_vm4, 1.0, %v6272_v0 }
0x1825   :  { %v2485_v35 = vpack.c.bf16 %v5562_v37, %v5562_v37 }
0x1827   :  { %5574 = vmatmul.mubr.msk.bf16.vlgmr.msra.gmra.mxu0 %vm640_vm3, %v2485_v35 }
0x1828   :  { %3126 = vmatpush1.bf16.msra.mxu0 %v7050_v59  ;;  %3149 = vmatprep.mubr.bf16.mxu0 %v6271_v40 }
0x1829   :  { %3127 = vmatprep.subr.bf16.mxu0 %v7061_v21 }
0x182c   :  { %3128 = vmatpush1.bf16.msra.mxu0 %v7070_v57 }
0x182d   :  { %3129 = vmatprep.subr.bf16.mxu0 %v7079_v11 }
0x1830   :  { %3130 = vmatpush1.bf16.msra.mxu0 %v7088_v18 }
0x1831   :  { %3131 = vmatprep.subr.bf16.mxu0 %v7097_v58 }
0x1834   :  { %3132 = vmatpush1.bf16.msra.mxu0 %v7106_v13 }
0x18e7   :  { %v2624_v5 = vpop.f32.mrf.mxu0 }
0x18e8   :  { %v2625_v9 = vadd.f32 %v2624_v5, %v7121_v10 }
0x18e9   :  { %v2626_v19 = vpop.f32.mrf.mxu0 }
0x18ea   :  { %v2631_v59 = vadd.f32 %v2625_v9, %v6706_v7  ;;  %v2627_v21 = vadd.f32 %v2626_v19, %v7126_v63 }
0x18eb   :  { %v2628_v22 = vpop.f32.mrf.mxu0 }
0x18ec   :  { %v5575_v24 = vmul.f32 -1.442695, %v2631_v59  ;;  %v2632_v57 = vadd.f32 %v2627_v21, %v6713_v50 }
0x18ed   :  { %v2629_v2 = vpop.f32.mrf.mxu0 }
0x18ee   :  { %6031 = vpow2.f32 %v5575_v24  ;;  %v5576_v10 = vmul.f32 -1.442695, %v2632_v57 }
0x18ef   :  { %6033 = vtanh.f32 %v2632_v57 }
0x18fb   :  { %v6032_v11 = vpop.eup %6031 }
0x18fc   :  { %v2636_v18 = vadd.f32 1.0, %v6032_v11  ;;  %v6034_v58 = vpop.eup %6033 }
0x18fe   :  { %6035 = vrcp.f32 %v2636_v18 }
0x18ff   :  { %6037 = vpow2.f32 %v5576_v10 }
0x190b   :  { %v6036_v13 = vpop.eup %6035 }
0x190c   :  { %v2647_v42 = vmul.f32 %v6036_v13, %v6034_v58  ;;  %v6038_v54 = vpop.eup %6037  ;;  %v2646_v26 = vmul.f32 %v6036_v13, %v7112_v25 }
0x190d   :  { %v2643_v6 = vadd.f32 1.0, %v6038_v54 }
0x190e   :  { %2649 = vrot.lane.b32.xlu0 %v2647_v42, %s6273_s5 }
0x190f   :  { %6039 = vrcp.f32 %v2643_v6 }
0x191c   :  { %v6040_v63 = vpop.eup %6039 }
0x1980   :  { %v2650_v8 = vpop.permute.xlu0 %2649 }
0x1981   :  { %v7242_v32 = vadd.f32 %v2650_v8, %v2646_v26 }
0x1983   :  { %6041 = vtanh.f32 %v7242_v32 }
0x1990   :  { %v6042_v62 = vpop.eup %6041 }
0x1991   :  { %v2654_v36 = vmul.f32 %v6042_v62, %v6040_v63 }
0x1993   :  { %v2655_v33 = vpack.c.bf16 %v2654_v36, %v2654_v36 }
0x1995   :  { %2665 = vrot.lane.b32.xlu0 %v2655_v33, %s6273_s5 }
0x1a07   :  { %v2666_v27 = vpop.permute.xlu0 %2665 }
0x1a08   :  { %5585 = vmatmul.mubr.msk.bf16.vlgmr.msra.gmra.mxu1 %vm741_vm5, %v2666_v27  ;;  %5596 = vmatmul.mubr.msk.bf16.vlgmr.msra.gmra.mxu0 %vm741_vm5, %v2666_v27 }
0x1a09   :  { %3203 = vmatprep.mubr.bf16.mxu1 %v6271_v40  ;;  %3323 = vmatprep.mubr.bf16.mxu0 %v6271_v40 }
0x1ac8   :  { %v2744_v25 = vpop.f32.mrf.mxu1  ;;  %v7250_v17 = vpop.f32.mrf.mxu0 }
0x1ac9   :  { %v2745_v12 = vadd.f32 %v2744_v25, %v6759_v16 }
0x1aca   :  { %v7253_v29 = vpop.f32.mrf.mxu1  ;;  %v7255_v28 = vpop.f32.mrf.mxu0 }
0x1acb   :  { %v2758_v43 = vrot.slane %v2745_v12, %v6762_v30 }
0x1acc   :  { %v2748_v44 = vpop.f32.mrf.mxu1  ;;  %v3155_v45 = vpop.f32.mrf.mxu0 }
0x1acd   :  { %v2759_v39 = vcombine.high %v2758_v43, %v2758_v43  ;;  %v2766_v37 = vrot.slane %v2758_v43, %v6762_v30 }
0x1ace   :  { %v2749_v35 = vpop.f32.mrf.mxu1  ;;  %v3156_v5 = vpop.f32.mrf.mxu0 }
0x1acf   :  { %v2773_v9 = vrot.slane %v2759_v39, %v6762_v30  ;;  %v2783_v19 = vrot.slane %v2766_v37, %v6700_v38 }
0x1ad1   :  { %v2787_v59 = vrot.slane %v2773_v9, %v6700_v38  ;;  %v2790_v22 = vadd.f32 %v2783_v19, %v6783_v52  ;;  %v2791_v24 = vadd.f32 %v2783_v19, %v6786_v55  ;;  %v2792_v2 = vadd.f32 %v2783_v19, %v6789_v56 }
0x1ad3   :  { %6043 = vtanh.f32 %v2790_v22  ;;  %v2793_v21 = vadd.f32 %v2787_v59, %v6801_v48  ;;  %v2794_v57 = vadd.f32 %v2787_v59, %v6794_v60  ;;  %v2795_v11 = vadd.f32 %v2787_v59, %v6805_v1 }
0x1ad4   :  { %6045 = vtanh.f32 %v2791_v24 }
0x1ad5   :  { %6047 = vtanh.f32 %v2792_v2 }
0x1ad6   :  { %6049 = vtanh.f32 %v2793_v21 }
0x1ad7   :  { %6051 = vtanh.f32 %v2794_v57 }
0x1ad8   :  { %6053 = vtanh.f32 %v2795_v11 }
0x1ae0   :  { %v6044_v18 = vpop.eup %6043 }
0x1ae1   :  { %v6046_v58 = vpop.eup %6045  ;;  %v2802_v13 = vmul.f32 %v7142_v20, %v6044_v18 }
0x1ae2   :  { %v6048_v42 = vpop.eup %6047  ;;  %v2803_v10 = vmul.f32 %v7142_v20, %v6046_v58 }
0x1ae3   :  { %2808 = vadd.xlane.f32.xlu1 %v2802_v13  ;;  %v2804_v54 = vmul.f32 %v7142_v20, %v6048_v42  ;;  %v6050_v6 = vpop.eup %6049 }
0x1ae4   :  { %2810 = vadd.xlane.f32.xlu0 %v2803_v10  ;;  %v2805_v26 = vmul.f32 %v7142_v20, %v6050_v6  ;;  %v6052_v8 = vpop.eup %6051 }
0x1ae5   :  { %v2806_v63 = vmul.f32 %v7142_v20, %v6052_v8  ;;  %v6054_v62 = vpop.eup %6053 }
0x1ae6   :  { %v2807_v36 = vmul.f32 %v7142_v20, %v6054_v62 }
0x1ae7   :  { %2812 = vadd.xlane.f32.xlu1 %v2804_v54 }
0x1aeb   :  { %2814 = vadd.xlane.f32.xlu1 %v2805_v26 }
0x1aef   :  { %2816 = vadd.xlane.f32.xlu1 %v2806_v63 }
0x1af3   :  { %2818 = vadd.xlane.f32.xlu1 %v2807_v36 }
0x1b6c   :  { %v2809_v33 = vpop.xlane.xlu1 %2808 }
0x1b6d   :  { %v2811_v12 = vpop.xlane.xlu0 %2810  ;;  %v2820_v44 = vadd.f32 %v2809_v33, %v6832_v51 }
0x1b6e   :  { %v2821_v43 = vadd.f32 %v2811_v12, %v6832_v51 }
0x1b6f   :  { %v2835_v20 = vrot.slane %v2820_v44, %v6824_v46 }
0x1b70   :  { %v2813_v27 = vpop.xlane.xlu1 %2812  ;;  %v2839_v5 = vrot.slane %v2821_v43, %v6827_v47 }
0x1b71   :  { %v2822_v39 = vadd.f32 %v2813_v27, %v6832_v51 }
0x1b72   :  { %v2840_v21 = vsel %vm1087_vm6, %v2839_v5, %v2835_v20 }
0x1b73   :  { %v2844_v59 = vrot.slane %v2822_v39, %v6830_v49 }
0x1b74   :  { %v2815_v25 = vpop.xlane.xlu1 %2814 }
0x1b75   :  { %v2823_v35 = vadd.f32 %v2815_v25, %v6832_v51  ;;  %v2845_v11 = vsel %vm1094_vm7, %v2844_v59, %v2840_v21 }
0x1b77   :  { %v2849_v24 = vrot.slane %v2823_v35, %v6824_v46 }
0x1b78   :  { %v2817_v45 = vpop.xlane.xlu1 %2816 }
0x1b79   :  { %v2824_v37 = vadd.f32 %v2817_v45, %v6832_v51 }
0x1b7b   :  { %v2853_v9 = vrot.slane %v2824_v37, %v6827_v47 }
0x1b7c   :  { %v2819_v19 = vpop.xlane.xlu1 %2818 }
0x1b7d   :  { %v2825_v22 = vadd.f32 %v2819_v19, %v6832_v51  ;;  %v2854_v57 = vsel %vm1087_vm6, %v2853_v9, %v2849_v24 }
0x1b7f   :  { %v2858_v2 = vrot.slane %v2825_v22, %v6830_v49 }
0x1b81   :  { %v2859_v18 = vsel %vm1094_vm7, %v2858_v2, %v2854_v57 }
0x1b82   :  { %v2860_v58 = vsel %vm1110_vm8, %v2859_v18, %v2845_v11 }
0x1b83   :  { %v2862_v13 = vsel %vm1113_vm9, %v2860_v58, -inf }
0x1b84   :  { %2863 = vmax.xlane.f32.xlu1 %v2862_v13 }
0x1c0d   :  { %v2864_v42 = vpop.xlane.xlu1 %2863 }
0x1c0e   :  { %v2869_v10 = vrot.slane %v2864_v42, %v6700_v38  ;;  %v2873_v54 = vrot.slane %v2864_v42, %v6710_v3 }
0x1c10   :  { %v2876_v6 = vsub.f32 %v2820_v44, %v2869_v10  ;;  %v2877_v26 = vsub.f32 %v2821_v43, %v2869_v10  ;;  %v2879_v8 = vsub.f32 %v2823_v35, %v2873_v54  ;;  %v2880_v36 = vsub.f32 %v2824_v37, %v2873_v54 }
0x1c11   :  { %v2878_v27 = vsub.f32 %v2822_v39, %v2869_v10  ;;  %v2881_v12 = vsub.f32 %v2825_v22, %v2873_v54 }
0x1c12   :  { %v2882_v63 = vmul.f32 1.442695, %v2876_v6  ;;  %v2884_v62 = vmul.f32 1.442695, %v2877_v26  ;;  %v2888_v33 = vmul.f32 1.442695, %v2879_v8 }
0x1c13   :  { %v2890_v25 = vmul.f32 1.442695, %v2880_v36  ;;  %v2886_v45 = vmul.f32 1.442695, %v2878_v27  ;;  %v2892_v5 = vmul.f32 1.442695, %v2881_v12 }
0x1c14   :  { %6055 = vpow2.f32 %v2882_v63 }
0x1c15   :  { %6057 = vpow2.f32 %v2884_v62 }
0x1c16   :  { %6059 = vpow2.f32 %v2888_v33 }
0x1c17   :  { %6061 = vpow2.f32 %v2890_v25 }
0x1c18   :  { %6063 = vpow2.f32 %v2886_v45 }
0x1c19   :  { %6065 = vpow2.f32 %v2892_v5 }
0x1c21   :  { %v6056_v20 = vpop.eup %6055 }
0x1c22   :  { %v6058_v9 = vpop.eup %6057  ;;  %2901 = vperm.xlu1 %5693, %v6056_v20  }
0x1c23   :  { %2904 = vperm.xlu0 %5694, %v6058_v9   ;;  %v6060_v43 = vpop.eup %6059 }
0x1c24   :  { %v6062_v44 = vpop.eup %6061 }
0x1c25   :  { %v6064_v37 = vpop.eup %6063 }
0x1c26   :  { %2910 = vperm.xlu1 %5693, %v6060_v43   ;;  %v6066_v35 = vpop.eup %6065 }
0x1c2a   :  { %2913 = vperm.xlu1 %5693, %v6062_v44  }
0x1c2e   :  { %2907 = vperm.xlu1 %5693, %v6064_v37  }
0x1c32   :  { %2916 = vperm.xlu1 %5693, %v6066_v35  }
0x1c9d   :  { %v2902_v39 = vpop.permute.xlu1 %2901 }
0x1c9e   :  { %v2905_v22 = vpop.permute.xlu0 %2904  ;;  %v2921_v21 = vrot.slane %v2902_v39, %v6824_v46 }
0x1c9f   :  { %v2925_v2 = vrot.slane %v2905_v22, %v6827_v47 }
0x1ca1   :  { %v2911_v19 = vpop.permute.xlu1 %2910  ;;  %v2926_v42 = vsel %vm1087_vm6, %v2925_v2, %v2921_v21 }
0x1ca2   :  { %v2935_v18 = vrot.slane %v2911_v19, %v6824_v46 }
0x1ca5   :  { %v2914_v59 = vpop.permute.xlu1 %2913 }
0x1ca6   :  { %v2939_v57 = vrot.slane %v2914_v59, %v6827_v47 }
0x1ca8   :  { %v2940_v10 = vsel %vm1087_vm6, %v2939_v57, %v2935_v18 }
0x1ca9   :  { %v2908_v24 = vpop.permute.xlu1 %2907 }
0x1caa   :  { %v2930_v11 = vrot.slane %v2908_v24, %v6830_v49 }
0x1cac   :  { %v2931_v54 = vsel %vm1094_vm7, %v2930_v11, %v2926_v42 }
0x1cad   :  { %v2917_v58 = vpop.permute.xlu1 %2916 }
0x1cae   :  { %v2944_v13 = vrot.slane %v2917_v58, %v6830_v49 }
0x1cb0   :  { %v2945_v6 = vsel %vm1094_vm7, %v2944_v13, %v2940_v10 }
0x1cb1   :  { %v2946_v26 = vsel %vm1110_vm8, %v2945_v6, %v2931_v54 }
0x1cb2   :  { %v2948_v8 = vsel %vm1113_vm9, %v2946_v26, 0.0 }
0x1cb3   :  { %2949 = vadd.xlane.f32.xlu0 %v2948_v8 }
0x1d3c   :  { %v2950_v63 = vpop.xlane.xlu0 %2949 }
0x1d3d   :  { %6067 = vrcp.f32 %v2950_v63 }
0x1d4a   :  { %v6068_v62 = vpop.eup %6067 }
0x1d4b   :  { %v2960_v36 = vrot.slane %v6068_v62, %v6710_v3  ;;  %v2956_v25 = vrot.slane %v6068_v62, %v6700_v38 }
0x1d4d   :  { %v2966_v33 = vmul.f32 %v6060_v43, %v2960_v36  ;;  %v2967_v27 = vmul.f32 %v6062_v44, %v2960_v36  ;;  %v2963_v12 = vmul.f32 %v6056_v20, %v2956_v25  ;;  %v2964_v45 = vmul.f32 %v6058_v9, %v2956_v25 }
0x1d4e   :  { %v2968_v5 = vmul.f32 %v6066_v35, %v2960_v36  ;;  %v2965_v39 = vmul.f32 %v6064_v37, %v2956_v25 }
0x1d4f   :  { %2992 = vperm.xlu1 %5693, %v2966_v33  }
0x1d53   :  { %2997 = vperm.xlu1 %5693, %v2967_v27  }
0x1d57   :  { %2977 = vperm.xlu1 %5693, %v2963_v12  }
0x1d5b   :  { %2982 = vperm.xlu1 %5693, %v2964_v45  }
0x1d5f   :  { %3002 = vperm.xlu1 %5693, %v2968_v5   ;;  %v2747_v5 = vadd.f32 %v7253_v29, %v6900_v15  ;;  %v7335_v29 = vld [vmem:[%s7937_s4] ss:$8 sps:$4 sm:$0xff]  }
0x1d63   :  { %2987 = vperm.xlu1 %5693, %v2965_v39  }
0x1dca   :  { %v2993_v19 = vpop.permute.xlu1 %2992 }
0x1dcb   :  { %v3008_v43 = vmul.f32 %v2993_v19, %v7187_v53 }
0x1dcd   :  { %v3022_v9 = vsel %vm640_vm3, %v3008_v43, 0.0 }
0x1dce   :  { %v2998_v59 = vpop.permute.xlu1 %2997 }
0x1dcf   :  { %v3009_v24 = vmul.f32 %v2998_v59, %v7184_v14 }
0x1dd1   :  { %v3023_v44 = vsel %vm640_vm3, %v3009_v24, 0.0 }
0x1dd2   :  { %v2978_v22 = vpop.permute.xlu1 %2977  ;;  %v3024_v57 = vadd.f32 %v3023_v44, %v3022_v9  ;;  %v7340_v44 = vld [vmem:[%s7937_s4 + $0x4] ss:$8 sps:$4 sm:$0xff]  }
0x1dd3   :  { %v3005_v35 = vmul.f32 %v2978_v22, %v7194_v61  ;;  %3185 = vmatprep.subr.bf16.mxu1 %v7340_v44 }
0x1dd4   :  { %3186 = vmatpush1.bf16.msra.mxu1 %v7335_v29 }
0x1dd5   :  { %v3011_v53 = vsel %vm640_vm3, %v3005_v35, 0.0 }
0x1dd6   :  { %v2983_v2 = vpop.permute.xlu1 %2982 }
0x1dd7   :  { %v3006_v21 = vmul.f32 %v2983_v2, %v7190_v41 }
0x1dd9   :  { %v3012_v11 = vsel %vm640_vm3, %v3006_v21, 0.0 }
0x1dda   :  { %v3003_v20 = vpop.permute.xlu1 %3002  ;;  %v3013_v42 = vadd.f32 %v3012_v11, %v3011_v53 }
0x1ddb   :  { %v3010_v37 = vmul.f32 %v3003_v20, %v7196_v23 }
0x1ddd   :  { %v3025_v18 = vsel %vm640_vm3, %v3010_v37, 0.0 }
0x1dde   :  { %v3026_v14 = vadd.f32 %v3025_v18, %v3024_v57  ;;  %v2988_v58 = vpop.permute.xlu1 %2987 }
0x1ddf   :  { %v3007_v13 = vmul.f32 %v2988_v58, %v7203_v31 }
0x1de0   :  { %v3027_v41 = vrot.slane %v3026_v14, 4 }
0x1de1   :  { %v3014_v10 = vsel %vm640_vm3, %v3007_v13, 0.0 }
0x1de2   :  { %v3028_v54 = vadd.f32 %v3027_v41, %v3026_v14  ;;  %v3015_v6 = vadd.f32 %v3014_v10, %v3013_v42 }
0x1de4   :  { %v3029_v61 = vrot.slane %v3028_v54, 2  ;;  %v3016_v26 = vrot.slane %v3015_v6, 4 }
0x1de6   :  { %v3030_v23 = vadd.f32 %v3029_v61, %v3028_v54  ;;  %v3017_v8 = vadd.f32 %v3016_v26, %v3015_v6 }
0x1de8   :  { %v3031_v63 = vrot.slane %v3030_v23, 1  ;;  %v3018_v62 = vrot.slane %v3017_v8, 2 }
0x1dea   :  { %v3032_v36 = vadd.f32 %v3031_v63, %v3030_v23  ;;  %v3019_v33 = vadd.f32 %v3018_v62, %v3017_v8 }
0x1dec   :  { %v3020_v27 = vrot.slane %v3019_v33, 1  ;;  %v3034_v25 = vadd.f32 %v7211_v34, %v3032_v36 }
0x1dee   :  { %v3021_v12 = vadd.f32 %v3020_v27, %v3019_v33  ;;  %v3037_v45 = vrot.slane %v3034_v25, 7  ;;  %v5868_v27 = vld [vmem:[%s7940_s7 + $0x34] ss:$8 sps:$4 sm:$0xff]  }
0x1def   :  { %v5871_v25 = vld [vmem:[%s7936_s3 + $0x34] ss:$8 sps:$4 sm:$0xff]   ;;  %3299 = vmatprep.subr.bf16.mxu0 %v5868_v27 }
0x1df0   :  { %v3033_v31 = vadd.f32 %v7211_v34, %v3021_v12  ;;  %v5874_v12 = vld [vmem:[%s7940_s7 + $0x24] ss:$8 sps:$4 sm:$0xff]   ;;  %3706 = vmatprep.subr.bf16.mxu1 %v5871_v25 }
0x1df2   :  { %v3038_v39 = vsel %vm1110_vm8, %v3037_v45, %v3033_v31  ;;  %v7373_v31 = vld [vmem:[%s7936_s3 + $0x24] ss:$8 sps:$4 sm:$0xff]   ;;  %v5872_v45 = vld [vmem:[%s7940_s7 + $0x20] ss:$8 sps:$4 sm:$0xff]  }
0x1df3   :  { %v3040_v19 = vadd.f32 %v3038_v39, %v2747_v5  ;;  %v7382_v5 = vld [vmem:[%s7936_s3 + $0x20] ss:$8 sps:$4 sm:$0xff]   ;;  %v5880_v39 = vld [vmem:[%s7940_s7 + $0x14] ss:$8 sps:$4 sm:$0xff]  }
0x1df5   :  { %v3043_v59 = vsel %vm666_vm0, %v3040_v19, -inf  ;;  %5586 = vst.msk [vmem:[%s7945_s12 + $0x6] sm:$0x3] %vm666_vm0, %v3040_v19 }
0x1df6   :  { %3044 = vmax.xlane.f32.xlu1 %v3043_v59  ;;  %v5878_v59 = vld [vmem:[%s7940_s7 + $0x10] ss:$8 sps:$4 sm:$0xff]  }
0x1e7f   :  { %v3045_v22 = vpop.xlane.xlu1 %3044 }
0x1e80   :  { %vm3046_vm10 = vcmp.ge.f32.partialorder %v3040_v19, %v3045_v22  ;;  %v7391_v19 = vld [vmem:[%s7936_s3 + $0x14] ss:$8 sps:$4 sm:$0xff]   ;;  %v7400_v22 = vld [vmem:[%s7936_s3 + $0x10] ss:$8 sps:$4 sm:$0xff]  }
0x1e81   :  { %v3047_v24 = vsel %vm3046_vm10, %v6360_v4, 16 }
0x1e82   :  { %v3048_v34 = vsel %vm666_vm0, %v3047_v24, 2147483647  ;;  %v5886_v24 = vld [vmem:[%s7940_s7 + $0x4] ss:$8 sps:$4 sm:$0xff]  }
0x1e83   :  { %v3050_v2 = vshra.s32 %v3048_v34, 16  ;;  %v3049_v21 = vand.u32 65535, %v3048_v34  ;;  %v7409_v34 = vld [vmem:[%s7936_s3 + $0x4] ss:$8 sps:$4 sm:$0xff]  }
0x1e85   :  { %v3052_v43 = vcvt.s32.f32 %v3050_v2  ;;  %v3051_v9 = vcvt.s32.f32 %v3049_v21  ;;  %v5884_v2 = vld [vmem:[%s7940_s7] ss:$8 sps:$4 sm:$0xff]  }
0x1e87   :  { %3053 = vmin.xlane.f32.xlu0 %v3052_v43 }
0x1f10   :  { %v3054_v20 = vpop.xlane.xlu0 %3053 }
0x1f11   :  { %vm3055_vm11 = vcmp.eq.f32.partialorder %v3052_v43, %v3054_v20  ;;  %v3060_v37 = vcvt.f32.s32 %v3054_v20  ;;  %v7418_v43 = vld [vmem:[%s7936_s3] ss:$8 sps:$4 sm:$0xff]  }
0x1f12   :  { %v3056_v35 = vsel %vm3055_vm11, %v3051_v9, inf }
0x1f13   :  { %3057 = vmin.xlane.f32.xlu0 %v3056_v35  ;;  %v3061_v11 = vshll.u32 %v3060_v37, 16 }
0x1f9c   :  { %v3058_v57 = vpop.xlane.xlu0 %3057 }
0x1f9d   :  { %v3059_v18 = vcvt.f32.s32 %v3058_v57 }
0x1f9f   :  { %v3062_v14 = vadd.s32 %v3061_v11, %v3059_v18 }
0x1fa1   :  { %vm3063_vm12 = vcmp.eq.s32.totalorder %v6360_v4, %v3062_v14 }
0x1fa2   :  { %v5587_v58 = vsel %vm3063_vm12, 1.0, %v6272_v0 }
0x1fa3   :  { %v3066_v53 = vpack.c.bf16 %v5587_v58, %v5587_v58 }
0x1fa5   :  { %5599 = vmatmul.mubr.msk.bf16.vlgmr.msra.gmra.mxu1 %vm640_vm3, %v3066_v53 }
0x1fa6   :  { %3730 = vmatprep.mubr.bf16.mxu1 %v6271_v40 }
0x2065   :  { %v3205_v13 = vpop.f32.mrf.mxu1 }
0x2066   :  { %v3206_v42 = vadd.f32 %v3205_v13, %v7250_v17  ;;  %v5866_v17 = vld [vmem:[%s7940_s7 + $0x30] ss:$8 sps:$4 sm:$0xff]  }
0x2067   :  { %v3207_v41 = vpop.f32.mrf.mxu1  ;;  %3300 = vmatpush1.bf16.msra.mxu0 %v5866_v17 }
0x2068   :  { %v3212_v10 = vadd.f32 %v3206_v42, %v6706_v7  ;;  %v3208_v26 = vadd.f32 %v3207_v41, %v7255_v28  ;;  %v7362_v28 = vld [vmem:[%s7936_s3 + $0x30] ss:$8 sps:$4 sm:$0xff]   ;;  %3301 = vmatprep.subr.bf16.mxu0 %v5874_v12 }
0x2069   :  { %v3209_v54 = vpop.f32.mrf.mxu1  ;;  %3707 = vmatpush1.bf16.msra.mxu1 %v7362_v28 }
0x206a   :  { %v5600_v6 = vmul.f32 -1.442695, %v3212_v10  ;;  %v3213_v23 = vadd.f32 %v3208_v26, %v6713_v50  ;;  %3708 = vmatprep.subr.bf16.mxu1 %v7373_v31 }
0x206b   :  { %v3210_v61 = vpop.f32.mrf.mxu1  ;;  %3302 = vmatpush1.bf16.msra.mxu0 %v5872_v45 }
0x206c   :  { %6069 = vpow2.f32 %v5600_v6  ;;  %3303 = vmatprep.subr.bf16.mxu0 %v5880_v39  ;;  %v5601_v21 = vmul.f32 -1.442695, %v3213_v23 }
0x206d   :  { %6071 = vtanh.f32 %v3213_v23  ;;  %3709 = vmatpush1.bf16.msra.mxu1 %v7382_v5 }
0x206e   :  { %3710 = vmatprep.subr.bf16.mxu1 %v7391_v19 }
0x206f   :  { %3304 = vmatpush1.bf16.msra.mxu0 %v5878_v59 }
0x2070   :  { %3305 = vmatprep.subr.bf16.mxu0 %v5886_v24 }
0x2071   :  { %3711 = vmatpush1.bf16.msra.mxu1 %v7400_v22 }
0x2072   :  { %3712 = vmatprep.subr.bf16.mxu1 %v7409_v34 }
0x2073   :  { %3306 = vmatpush1.bf16.msra.mxu0 %v5884_v2 }
0x2074   :  { %3766 = vmatprep.subr.bf16.mxu0 %v7340_v44 }
0x2075   :  { %3713 = vmatpush1.bf16.msra.mxu1 %v7418_v43 }
0x2076   :  { %3880 = vmatprep.subr.bf16.mxu1 %v5868_v27 }
0x2079   :  { %v6070_v8 = vpop.eup %6069 }
0x207a   :  { %v3217_v63 = vadd.f32 1.0, %v6070_v8  ;;  %v6072_v62 = vpop.eup %6071 }
0x207c   :  { %6073 = vrcp.f32 %v3217_v63 }
0x207d   :  { %6075 = vpow2.f32 %v5601_v21 }
0x2089   :  { %v6074_v36 = vpop.eup %6073 }
0x208a   :  { %v3228_v33 = vmul.f32 %v6074_v36, %v6072_v62  ;;  %v6076_v20 = vpop.eup %6075  ;;  %v3227_v35 = vmul.f32 %v6074_v36, %v7242_v32 }
0x208b   :  { %v3224_v9 = vadd.f32 1.0, %v6076_v20 }
0x208c   :  { %3230 = vrot.lane.b32.xlu0 %v3228_v33, %s6273_s5 }
0x208d   :  { %6077 = vrcp.f32 %v3224_v9 }
0x209a   :  { %v6078_v11 = vpop.eup %6077 }
0x20fe   :  { %v3231_v37 = vpop.permute.xlu0 %3230 }
0x20ff   :  { %v7424_v57 = vadd.f32 %v3231_v37, %v3227_v35 }
0x2101   :  { %6079 = vtanh.f32 %v7424_v57 }
0x210e   :  { %v6080_v18 = vpop.eup %6079 }
0x210f   :  { %v3235_v14 = vmul.f32 %v6080_v18, %v6078_v11 }
0x2111   :  { %v3236_v58 = vpack.c.bf16 %v3235_v14, %v3235_v14 }
0x2113   :  { %3246 = vrot.lane.b32.xlu1 %v3236_v58, %s6273_s5 }
0x2185   :  { %v3247_v44 = vpop.permute.xlu1 %3246 }
0x2186   :  { %5610 = vmatmul.mubr.msk.bf16.vlgmr.msra.gmra.mxu0 %vm741_vm5, %v3247_v44  ;;  %5621 = vmatmul.mubr.msk.bf16.vlgmr.msra.gmra.mxu1 %vm741_vm5, %v3247_v44 }
0x2187   :  { %3767 = vmatpush1.bf16.msra.mxu0 %v7335_v29  ;;  %3784 = vmatprep.mubr.bf16.mxu0 %v6271_v40 }
0x2188   :  { %4287 = vmatprep.subr.bf16.mxu0 %v5871_v25  ;;  %3881 = vmatpush1.bf16.msra.mxu1 %v5866_v17 }
0x2189   :  { %3882 = vmatprep.subr.bf16.mxu1 %v5874_v12  ;;  %3904 = vmatprep.mubr.bf16.mxu1 %v6271_v40 }
0x218c   :  { %3883 = vmatpush1.bf16.msra.mxu1 %v5872_v45 }
0x218d   :  { %3884 = vmatprep.subr.bf16.mxu1 %v5880_v39 }
0x2190   :  { %3885 = vmatpush1.bf16.msra.mxu1 %v5878_v59  ;;  %v7454_v59 = vld [vmem:[%s7942_s9] ss:$0 sm:$0xff] }
0x2191   :  { %3886 = vmatprep.subr.bf16.mxu1 %v5886_v24 }
0x2194   :  { %3887 = vmatpush1.bf16.msra.mxu1 %v5884_v2 }
0x2246   :  { %v3325_v32 = vpop.f32.mrf.mxu0  ;;  %v7433_v53 = vpop.f32.mrf.mxu1 }
0x2247   :  { %v3326_v13 = vadd.f32 %v3325_v32, %v6759_v16 }
0x2248   :  { %v7436_v42 = vpop.f32.mrf.mxu0  ;;  %v7438_v29 = vpop.f32.mrf.mxu1 }
0x2249   :  { %v3339_v41 = vrot.slane %v3326_v13, %v6762_v30 }
0x224a   :  { %v3329_v10 = vpop.f32.mrf.mxu0  ;;  %v3736_v54 = vpop.f32.mrf.mxu1 }
0x224b   :  { %v3340_v6 = vcombine.high %v3339_v41, %v3339_v41  ;;  %v3347_v61 = vrot.slane %v3339_v41, %v6762_v30 }
0x224c   :  { %v3330_v26 = vpop.f32.mrf.mxu0  ;;  %v3737_v23 = vpop.f32.mrf.mxu1 }
0x224d   :  { %v3354_v8 = vrot.slane %v3340_v6, %v6762_v30  ;;  %v3364_v63 = vrot.slane %v3347_v61, %v6700_v38 }
0x224f   :  { %v3368_v62 = vrot.slane %v3354_v8, %v6700_v38  ;;  %v3371_v36 = vadd.f32 %v3364_v63, %v6783_v52  ;;  %v3372_v33 = vadd.f32 %v3364_v63, %v6786_v55  ;;  %v3373_v17 = vadd.f32 %v3364_v63, %v6789_v56 }
0x2251   :  { %6081 = vtanh.f32 %v3371_v36  ;;  %v3374_v27 = vadd.f32 %v3368_v62, %v6801_v48  ;;  %v3375_v25 = vadd.f32 %v3368_v62, %v6794_v60  ;;  %v3376_v12 = vadd.f32 %v3368_v62, %v6805_v1 }
0x2252   :  { %6083 = vtanh.f32 %v3372_v33 }
0x2253   :  { %6085 = vtanh.f32 %v3373_v17 }
0x2254   :  { %6087 = vtanh.f32 %v3374_v27 }
0x2255   :  { %6089 = vtanh.f32 %v3375_v25 }
0x2256   :  { %6091 = vtanh.f32 %v3376_v12 }
0x225e   :  { %v6082_v45 = vpop.eup %6081 }
0x225f   :  { %v6084_v39 = vpop.eup %6083  ;;  %v3383_v24 = vmul.f32 %v7454_v59, %v6082_v45 }
0x2260   :  { %v6086_v2 = vpop.eup %6085  ;;  %v3384_v21 = vmul.f32 %v7454_v59, %v6084_v39 }
0x2261   :  { %3389 = vadd.xlane.f32.xlu0 %v3383_v24  ;;  %v3385_v20 = vmul.f32 %v7454_v59, %v6086_v2  ;;  %v6088_v9 = vpop.eup %6087 }
0x2262   :  { %3391 = vadd.xlane.f32.xlu1 %v3384_v21  ;;  %v3386_v35 = vmul.f32 %v7454_v59, %v6088_v9  ;;  %v6090_v37 = vpop.eup %6089 }
0x2263   :  { %v3387_v11 = vmul.f32 %v7454_v59, %v6090_v37  ;;  %v6092_v18 = vpop.eup %6091 }
0x2264   :  { %v3388_v14 = vmul.f32 %v7454_v59, %v6092_v18 }
0x2265   :  { %3393 = vadd.xlane.f32.xlu0 %v3385_v20 }
0x2269   :  { %3395 = vadd.xlane.f32.xlu0 %v3386_v35 }
0x226d   :  { %3397 = vadd.xlane.f32.xlu0 %v3387_v11 }
0x2271   :  { %3399 = vadd.xlane.f32.xlu0 %v3388_v14 }
0x22ea   :  { %v3390_v58 = vpop.xlane.xlu0 %3389 }
0x22eb   :  { %v3392_v13 = vpop.xlane.xlu1 %3391  ;;  %v3401_v10 = vadd.f32 %v3390_v58, %v6832_v51 }
0x22ec   :  { %v3402_v41 = vadd.f32 %v3392_v13, %v6832_v51 }
0x22ed   :  { %v3416_v8 = vrot.slane %v3401_v10, %v6824_v46 }
0x22ee   :  { %v3394_v44 = vpop.xlane.xlu0 %3393  ;;  %v3420_v23 = vrot.slane %v3402_v41, %v6827_v47 }
0x22ef   :  { %v3403_v6 = vadd.f32 %v3394_v44, %v6832_v51 }
0x22f0   :  { %v3421_v25 = vsel %vm1087_vm6, %v3420_v23, %v3416_v8 }
0x22f1   :  { %v3425_v36 = vrot.slane %v3403_v6, %v6830_v49 }
0x22f2   :  { %v3396_v32 = vpop.xlane.xlu0 %3395 }
0x22f3   :  { %v3404_v26 = vadd.f32 %v3396_v32, %v6832_v51  ;;  %v3426_v45 = vsel %vm1094_vm7, %v3425_v36, %v3421_v25 }
0x22f5   :  { %v3430_v17 = vrot.slane %v3404_v26, %v6824_v46 }
0x22f6   :  { %v3398_v54 = vpop.xlane.xlu0 %3397 }
0x22f7   :  { %v3405_v61 = vadd.f32 %v3398_v54, %v6832_v51 }
0x22f9   :  { %v3434_v63 = vrot.slane %v3405_v61, %v6827_v47 }
0x22fa   :  { %v3400_v62 = vpop.xlane.xlu0 %3399 }
0x22fb   :  { %v3406_v33 = vadd.f32 %v3400_v62, %v6832_v51  ;;  %v3435_v12 = vsel %vm1087_vm6, %v3434_v63, %v3430_v17 }
0x22fd   :  { %v3439_v27 = vrot.slane %v3406_v33, %v6830_v49 }
0x22ff   :  { %v3440_v39 = vsel %vm1094_vm7, %v3439_v27, %v3435_v12 }
0x2300   :  { %v3441_v24 = vsel %vm1110_vm8, %v3440_v39, %v3426_v45 }
0x2301   :  { %v3443_v2 = vsel %vm1113_vm9, %v3441_v24, -inf }
0x2302   :  { %3444 = vmax.xlane.f32.xlu0 %v3443_v2 }
0x238b   :  { %v3445_v21 = vpop.xlane.xlu0 %3444 }
0x238c   :  { %v3450_v20 = vrot.slane %v3445_v21, %v6700_v38  ;;  %v3454_v9 = vrot.slane %v3445_v21, %v6710_v3 }
0x238e   :  { %v3457_v35 = vsub.f32 %v3401_v10, %v3450_v20  ;;  %v3458_v37 = vsub.f32 %v3402_v41, %v3450_v20  ;;  %v3460_v11 = vsub.f32 %v3404_v26, %v3454_v9  ;;  %v3461_v18 = vsub.f32 %v3405_v61, %v3454_v9 }
0x238f   :  { %v3462_v44 = vsub.f32 %v3406_v33, %v3454_v9  ;;  %v3459_v13 = vsub.f32 %v3403_v6, %v3450_v20 }
0x2390   :  { %v3463_v14 = vmul.f32 1.442695, %v3457_v35  ;;  %v3465_v58 = vmul.f32 1.442695, %v3458_v37  ;;  %v3471_v32 = vmul.f32 1.442695, %v3461_v18 }
0x2391   :  { %v3469_v54 = vmul.f32 1.442695, %v3460_v11  ;;  %v3473_v23 = vmul.f32 1.442695, %v3462_v44  ;;  %v3467_v8 = vmul.f32 1.442695, %v3459_v13 }
0x2392   :  { %6093 = vpow2.f32 %v3463_v14 }
0x2393   :  { %6095 = vpow2.f32 %v3465_v58 }
0x2394   :  { %6097 = vpow2.f32 %v3471_v32 }
0x2395   :  { %6099 = vpow2.f32 %v3469_v54 }
0x2396   :  { %6101 = vpow2.f32 %v3473_v23 }
0x2397   :  { %6103 = vpow2.f32 %v3467_v8 }
0x239f   :  { %v6094_v63 = vpop.eup %6093 }
0x23a0   :  { %v6096_v62 = vpop.eup %6095  ;;  %3482 = vperm.xlu0 %5694, %v6094_v63  }
0x23a1   :  { %3485 = vperm.xlu1 %5693, %v6096_v62   ;;  %v6098_v41 = vpop.eup %6097 }
0x23a2   :  { %v6100_v10 = vpop.eup %6099 }
0x23a3   :  { %v6102_v61 = vpop.eup %6101 }
0x23a4   :  { %3494 = vperm.xlu0 %5694, %v6098_v41   ;;  %v6104_v26 = vpop.eup %6103 }
0x23a5   :  { %3491 = vperm.xlu1 %5693, %v6100_v10  }
0x23a8   :  { %3497 = vperm.xlu0 %5694, %v6102_v61  }
0x23a9   :  { %3488 = vperm.xlu1 %5693, %v6104_v26  }
0x241b   :  { %v3483_v6 = vpop.permute.xlu0 %3482 }
0x241c   :  { %v3486_v36 = vpop.permute.xlu1 %3485  ;;  %v3502_v45 = vrot.slane %v3483_v6, %v6824_v46 }
0x241d   :  { %v3506_v12 = vrot.slane %v3486_v36, %v6827_v47 }
0x241f   :  { %v3495_v33 = vpop.permute.xlu0 %3494  ;;  %v3507_v9 = vsel %vm1087_vm6, %v3506_v12, %v3502_v45  ;;  %v7499_v12 = vld [vmem:[#allocation3 + $0x18] sm:$0xff] }
0x2420   :  { %v3492_v17 = vpop.permute.xlu1 %3491  ;;  %v3520_v25 = vrot.slane %v3495_v33, %v6827_v47 }
0x2421   :  { %v3516_v27 = vrot.slane %v3492_v17, %v6824_v46 }
0x2423   :  { %v3498_v39 = vpop.permute.xlu0 %3497  ;;  %v3521_v21 = vsel %vm1087_vm6, %v3520_v25, %v3516_v27  ;;  %v7496_v25 = vld [vmem:[#allocation3 + $0x20] sm:$0xff] }
0x2424   :  { %v3489_v24 = vpop.permute.xlu1 %3488  ;;  %v3525_v2 = vrot.slane %v3498_v39, %v6830_v49  ;;  %v7508_v39 = vld [vmem:[#allocation3 + $0x28] sm:$0xff] }
0x2425   :  { %v3511_v20 = vrot.slane %v3489_v24, %v6830_v49 }
0x2426   :  { %v3526_v35 = vsel %vm1094_vm7, %v3525_v2, %v3521_v21 }
0x2427   :  { %v3512_v37 = vsel %vm1094_vm7, %v3511_v20, %v3507_v9 }
0x2428   :  { %v3527_v11 = vsel %vm1110_vm8, %v3526_v35, %v3512_v37 }
0x2429   :  { %v3529_v18 = vsel %vm1113_vm9, %v3527_v11, 0.0 }
0x242a   :  { %3530 = vadd.xlane.f32.xlu1 %v3529_v18  ;;  %v7515_v18 = vld [vmem:[#allocation3 + $0x10] sm:$0xff] }
0x24b3   :  { %v3531_v14 = vpop.xlane.xlu1 %3530 }
0x24b4   :  { %6105 = vrcp.f32 %v3531_v14 }
0x24c1   :  { %v6106_v58 = vpop.eup %6105 }
0x24c2   :  { %v3541_v44 = vrot.slane %v6106_v58, %v6710_v3  ;;  %v3537_v54 = vrot.slane %v6106_v58, %v6700_v38 }
0x24c4   :  { %v3547_v32 = vmul.f32 %v6100_v10, %v3541_v44  ;;  %v3548_v13 = vmul.f32 %v6098_v41, %v3541_v44  ;;  %v3544_v23 = vmul.f32 %v6094_v63, %v3537_v54  ;;  %v3545_v8 = vmul.f32 %v6096_v62, %v3537_v54  ;;  %v7502_v63 = vld [vmem:[#allocation3 + $0x8] sm:$0xff] }
0x24c5   :  { %v3549_v6 = vmul.f32 %v6102_v61, %v3541_v44  ;;  %v3546_v36 = vmul.f32 %v6104_v26, %v3537_v54  ;;  %v7506_v26 = vld [vmem:[#allocation3] sm:$0xff] }
0x24c6   :  { %3573 = vperm.xlu0 %5694, %v3547_v32  }
0x24ca   :  { %3578 = vperm.xlu0 %5694, %v3548_v13  }
0x24ce   :  { %3558 = vperm.xlu0 %5694, %v3544_v23  }
0x24d2   :  { %3563 = vperm.xlu0 %5694, %v3545_v8  }
0x24d6   :  { %3583 = vperm.xlu0 %5694, %v3549_v6  }
0x24da   :  { %3568 = vperm.xlu0 %5694, %v3546_v36  }
0x2541   :  { %v3574_v33 = vpop.permute.xlu0 %3573 }
0x2542   :  { %v3589_v45 = vmul.f32 %v3574_v33, %v7499_v12 }
0x2544   :  { %v3603_v2 = vsel %vm640_vm3, %v3589_v45, 0.0 }
0x2545   :  { %v3579_v17 = vpop.permute.xlu0 %3578 }
0x2546   :  { %v3590_v10 = vmul.f32 %v3579_v17, %v7496_v25 }
0x2548   :  { %v3604_v62 = vsel %vm640_vm3, %v3590_v10, 0.0 }
0x2549   :  { %v3559_v27 = vpop.permute.xlu0 %3558  ;;  %v3605_v9 = vadd.f32 %v3604_v62, %v3603_v2  ;;  %v7523_v62 = vld [vmem:[%s7944_s11] ss:$0 sm:$0xff] }
0x254a   :  { %v3586_v21 = vmul.f32 %v3559_v27, %v7506_v26 }
0x254c   :  { %v3592_v58 = vsel %vm640_vm3, %v3586_v21, 0.0 }
0x254d   :  { %v3564_v41 = vpop.permute.xlu0 %3563 }
0x254e   :  { %v3587_v61 = vmul.f32 %v3564_v41, %v7502_v63 }
0x2550   :  { %v3593_v35 = vsel %vm640_vm3, %v3587_v61, 0.0 }
0x2551   :  { %v3584_v24 = vpop.permute.xlu0 %3583  ;;  %v3594_v32 = vadd.f32 %v3593_v35, %v3592_v58 }
0x2552   :  { %v3591_v20 = vmul.f32 %v3584_v24, %v7508_v39 }
0x2554   :  { %v3606_v37 = vsel %vm640_vm3, %v3591_v20, 0.0 }
0x2555   :  { %v3607_v11 = vadd.f32 %v3606_v37, %v3605_v9  ;;  %v3569_v14 = vpop.permute.xlu0 %3568  ;;  %v3328_v9 = vadd.f32 %v7436_v42, %v6900_v15 }
0x2556   :  { %v3588_v44 = vmul.f32 %v3569_v14, %v7515_v18 }
0x2557   :  { %v3608_v13 = vrot.slane %v3607_v11, 4 }
0x2558   :  { %v3595_v54 = vsel %vm640_vm3, %v3588_v44, 0.0 }
0x2559   :  { %v3609_v23 = vadd.f32 %v3608_v13, %v3607_v11  ;;  %v3596_v8 = vadd.f32 %v3595_v54, %v3594_v32 }
0x255b   :  { %v3610_v6 = vrot.slane %v3609_v23, 2  ;;  %v3597_v36 = vrot.slane %v3596_v8, 4 }
0x255d   :  { %v3611_v33 = vadd.f32 %v3610_v6, %v3609_v23  ;;  %v3598_v17 = vadd.f32 %v3597_v36, %v3596_v8 }
0x255f   :  { %v3612_v27 = vrot.slane %v3611_v33, 1  ;;  %v3599_v10 = vrot.slane %v3598_v17, 2 }
0x2561   :  { %v3613_v41 = vadd.f32 %v3612_v27, %v3611_v33  ;;  %v3600_v45 = vadd.f32 %v3599_v10, %v3598_v17 }
0x2563   :  { %v3615_v61 = vadd.f32 %v7523_v62, %v3613_v41  ;;  %v3601_v24 = vrot.slane %v3600_v45, 1 }
0x2565   :  { %v3602_v2 = vadd.f32 %v3601_v24, %v3600_v45  ;;  %v3618_v20 = vrot.slane %v3615_v61, 7 }
0x2567   :  { %v3614_v21 = vadd.f32 %v7523_v62, %v3602_v2 }
0x2569   :  { %v3619_v35 = vsel %vm1110_vm8, %v3618_v20, %v3614_v21 }
0x256a   :  { %v3621_v37 = vadd.f32 %v3619_v35, %v3328_v9 }
0x256c   :  { %v3624_v11 = vsel %vm666_vm0, %v3621_v37, -inf  ;;  %5611 = vst.msk [vmem:[%s7945_s12 + $0x8] sm:$0x3] %vm666_vm0, %v3621_v37 }
0x256d   :  { %3625 = vmax.xlane.f32.xlu0 %v3624_v11 }
0x25f6   :  { %v3626_v14 = vpop.xlane.xlu0 %3625 }
0x25f7   :  { %vm3627_vm13 = vcmp.ge.f32.partialorder %v3621_v37, %v3626_v14 }
0x25f8   :  { %v3628_v58 = vsel %vm3627_vm13, %v6360_v4, 16 }
0x25f9   :  { %v3629_v44 = vsel %vm666_vm0, %v3628_v58, 2147483647 }
0x25fa   :  { %v3631_v32 = vshra.s32 %v3629_v44, 16  ;;  %v3630_v42 = vand.u32 65535, %v3629_v44 }
0x25fc   :  { %v3633_v13 = vcvt.s32.f32 %v3631_v32  ;;  %v3632_v23 = vcvt.s32.f32 %v3630_v42 }
0x25fe   :  { %3634 = vmin.xlane.f32.xlu1 %v3633_v13 }
0x2687   :  { %v3635_v54 = vpop.xlane.xlu1 %3634 }
0x2688   :  { %vm3636_vm14 = vcmp.eq.f32.partialorder %v3633_v13, %v3635_v54  ;;  %v3641_v6 = vcvt.f32.s32 %v3635_v54 }
0x2689   :  { %v3637_v8 = vsel %vm3636_vm14, %v3632_v23, inf }
0x268a   :  { %3638 = vmin.xlane.f32.xlu1 %v3637_v8  ;;  %v3642_v33 = vshll.u32 %v3641_v6, 16 }
0x2713   :  { %v3639_v36 = vpop.xlane.xlu1 %3638 }
0x2714   :  { %v3640_v17 = vcvt.f32.s32 %v3639_v36 }
0x2716   :  { %v3643_v27 = vadd.s32 %v3642_v33, %v3640_v17 }
0x2718   :  { %vm3644_vm15 = vcmp.eq.s32.totalorder %v6360_v4, %v3643_v27 }
0x2719   :  { %v5612_v10 = vsel %vm3644_vm15, 1.0, %v6272_v0 }
0x271a   :  { %v3647_v41 = vpack.c.bf16 %v5612_v10, %v5612_v10 }
0x271c   :  { %5624 = vmatmul.mubr.msk.bf16.vlgmr.msra.gmra.mxu0 %vm640_vm3, %v3647_v41 }
0x271d   :  { %4288 = vmatpush1.bf16.msra.mxu0 %v7362_v28  ;;  %4311 = vmatprep.mubr.bf16.mxu0 %v6271_v40 }
0x271e   :  { %4289 = vmatprep.subr.bf16.mxu0 %v7373_v31 }
0x2721   :  { %4290 = vmatpush1.bf16.msra.mxu0 %v7382_v5 }
0x2722   :  { %4291 = vmatprep.subr.bf16.mxu0 %v7391_v19 }
0x2725   :  { %4292 = vmatpush1.bf16.msra.mxu0 %v7400_v22 }
0x2726   :  { %4293 = vmatprep.subr.bf16.mxu0 %v7409_v34 }
0x2729   :  { %4294 = vmatpush1.bf16.msra.mxu0 %v7418_v43 }
0x27dc   :  { %v3786_v45 = vpop.f32.mrf.mxu0 }
0x27dd   :  { %v3787_v61 = vadd.f32 %v3786_v45, %v7433_v53 }
0x27de   :  { %v3788_v24 = vpop.f32.mrf.mxu0 }
0x27df   :  { %v3793_v28 = vadd.f32 %v3787_v61, %v6706_v7  ;;  %v3789_v31 = vadd.f32 %v3788_v24, %v7438_v29 }
0x27e0   :  { %v3790_v2 = vpop.f32.mrf.mxu0 }
0x27e1   :  { %v5625_v21 = vmul.f32 -1.442695, %v3793_v28  ;;  %v3794_v5 = vadd.f32 %v3789_v31, %v6713_v50 }
0x27e2   :  { %v3791_v20 = vpop.f32.mrf.mxu0 }
0x27e3   :  { %6107 = vpow2.f32 %v5625_v21  ;;  %v5626_v53 = vmul.f32 -1.442695, %v3794_v5 }
0x27e4   :  { %6109 = vtanh.f32 %v3794_v5 }
0x27f0   :  { %v6108_v19 = vpop.eup %6107 }
0x27f1   :  { %v3798_v22 = vadd.f32 1.0, %v6108_v19  ;;  %v6110_v34 = vpop.eup %6109 }
0x27f3   :  { %6111 = vrcp.f32 %v3798_v22 }
0x27f4   :  { %6113 = vpow2.f32 %v5626_v53 }
0x2800   :  { %v6112_v43 = vpop.eup %6111 }
0x2801   :  { %v3809_v9 = vmul.f32 %v6112_v43, %v6110_v34  ;;  %v6114_v35 = vpop.eup %6113  ;;  %v3808_v11 = vmul.f32 %v6112_v43, %v7424_v57 }
0x2802   :  { %v3805_v37 = vadd.f32 1.0, %v6114_v35 }
0x2803   :  { %3811 = vrot.lane.b32.xlu1 %v3809_v9, %s6273_s5 }
0x2804   :  { %6115 = vrcp.f32 %v3805_v37 }
0x2811   :  { %v6116_v29 = vpop.eup %6115 }
0x2875   :  { %v3812_v14 = vpop.permute.xlu1 %3811 }
0x2876   :  { %v7554_v58 = vadd.f32 %v3812_v14, %v3808_v11 }
0x2878   :  { %6117 = vtanh.f32 %v7554_v58 }
0x2885   :  { %v6118_v44 = vpop.eup %6117 }
0x2886   :  { %v3816_v32 = vmul.f32 %v6118_v44, %v6116_v29 }
0x2888   :  { %v3817_v13 = vpack.c.bf16 %v3816_v32, %v3816_v32 }
0x288a   :  { %3827 = vrot.lane.b32.xlu0 %v3817_v13, %s6273_s5 }
0x28fc   :  { %v3828_v42 = vpop.permute.xlu0 %3827 }
0x28fd   :  { %5635 = vmatmul.mubr.msk.bf16.vlgmr.msra.gmra.mxu1 %vm741_vm5, %v3828_v42  ;;  %5646 = vmatmul.mubr.msk.bf16.vlgmr.msra.gmra.mxu0 %vm741_vm5, %v3828_v42 }
0x28fe   :  { %4365 = vmatprep.mubr.bf16.mxu1 %v6271_v40  ;;  %4485 = vmatprep.mubr.bf16.mxu0 %v6271_v40 }
0x29bd   :  { %v3906_v57 = vpop.f32.mrf.mxu1  ;;  %v7562_v54 = vpop.f32.mrf.mxu0 }
0x29be   :  { %v3907_v23 = vadd.f32 %v3906_v57, %v6759_v16 }
0x29bf   :  { %v7565_v8 = vpop.f32.mrf.mxu1  ;;  %v7567_v6 = vpop.f32.mrf.mxu0 }
0x29c0   :  { %v3920_v36 = vrot.slane %v3907_v23, %v6762_v30 }
0x29c1   :  { %v3910_v33 = vpop.f32.mrf.mxu1  ;;  %v4317_v17 = vpop.f32.mrf.mxu0 }
0x29c2   :  { %v3921_v27 = vcombine.high %v3920_v36, %v3920_v36  ;;  %v3928_v10 = vrot.slane %v3920_v36, %v6762_v30 }
0x29c3   :  { %v3911_v41 = vpop.f32.mrf.mxu1  ;;  %v4318_v45 = vpop.f32.mrf.mxu0 }
0x29c4   :  { %v3935_v61 = vrot.slane %v3921_v27, %v6762_v30  ;;  %v3945_v24 = vrot.slane %v3928_v10, %v6700_v38 }
0x29c6   :  { %v3949_v28 = vrot.slane %v3935_v61, %v6700_v38  ;;  %v3952_v2 = vadd.f32 %v3945_v24, %v6783_v52  ;;  %v3953_v21 = vadd.f32 %v3945_v24, %v6786_v55  ;;  %v3954_v20 = vadd.f32 %v3945_v24, %v6789_v56 }
0x29c8   :  { %6119 = vtanh.f32 %v3952_v2  ;;  %v3955_v31 = vadd.f32 %v3949_v28, %v6801_v48  ;;  %v3956_v5 = vadd.f32 %v3949_v28, %v6794_v60  ;;  %v3957_v19 = vadd.f32 %v3949_v28, %v6805_v1 }
0x29c9   :  { %6121 = vtanh.f32 %v3953_v21 }
0x29ca   :  { %6123 = vtanh.f32 %v3954_v20 }
0x29cb   :  { %6125 = vtanh.f32 %v3955_v31 }
0x29cc   :  { %6127 = vtanh.f32 %v3956_v5 }
0x29cd   :  { %6129 = vtanh.f32 %v3957_v19 }
0x29d5   :  { %v6120_v22 = vpop.eup %6119 }
0x29d6   :  { %v6122_v34 = vpop.eup %6121  ;;  %v3964_v43 = vmul.f32 %v7454_v59, %v6120_v22 }
0x29d7   :  { %v6124_v9 = vpop.eup %6123  ;;  %v3965_v53 = vmul.f32 %v7454_v59, %v6122_v34 }
0x29d8   :  { %3970 = vadd.xlane.f32.xlu1 %v3964_v43  ;;  %v3966_v35 = vmul.f32 %v7454_v59, %v6124_v9  ;;  %v6126_v37 = vpop.eup %6125 }
0x29d9   :  { %3972 = vadd.xlane.f32.xlu0 %v3965_v53  ;;  %v3967_v11 = vmul.f32 %v7454_v59, %v6126_v37  ;;  %v6128_v14 = vpop.eup %6127 }
0x29da   :  { %v3968_v29 = vmul.f32 %v7454_v59, %v6128_v14  ;;  %v6130_v44 = vpop.eup %6129 }
0x29db   :  { %v3969_v32 = vmul.f32 %v7454_v59, %v6130_v44 }
0x29dc   :  { %3974 = vadd.xlane.f32.xlu1 %v3966_v35 }
0x29e0   :  { %3976 = vadd.xlane.f32.xlu1 %v3967_v11 }
0x29e4   :  { %3978 = vadd.xlane.f32.xlu1 %v3968_v29 }
0x29e8   :  { %3980 = vadd.xlane.f32.xlu1 %v3969_v32 }
0x2a61   :  { %v3971_v13 = vpop.xlane.xlu1 %3970 }
0x2a62   :  { %v3973_v23 = vpop.xlane.xlu0 %3972  ;;  %v3982_v33 = vadd.f32 %v3971_v13, %v6832_v51 }
0x2a63   :  { %v3983_v36 = vadd.f32 %v3973_v23, %v6832_v51 }
0x2a64   :  { %v3997_v59 = vrot.slane %v3982_v33, %v6824_v46 }
0x2a65   :  { %v3975_v42 = vpop.xlane.xlu1 %3974  ;;  %v4001_v45 = vrot.slane %v3983_v36, %v6827_v47 }
0x2a66   :  { %v3984_v27 = vadd.f32 %v3975_v42, %v6832_v51 }
0x2a67   :  { %v4002_v31 = vsel %vm1087_vm6, %v4001_v45, %v3997_v59 }
0x2a68   :  { %v4006_v28 = vrot.slane %v3984_v27, %v6830_v49 }
0x2a69   :  { %v3977_v57 = vpop.xlane.xlu1 %3976 }
0x2a6a   :  { %v3985_v41 = vadd.f32 %v3977_v57, %v6832_v51  ;;  %v4007_v19 = vsel %vm1094_vm7, %v4006_v28, %v4002_v31 }
0x2a6c   :  { %v4011_v21 = vrot.slane %v3985_v41, %v6824_v46 }
0x2a6d   :  { %v3979_v17 = vpop.xlane.xlu1 %3978 }
0x2a6e   :  { %v3986_v10 = vadd.f32 %v3979_v17, %v6832_v51 }
0x2a70   :  { %v4015_v61 = vrot.slane %v3986_v10, %v6827_v47 }
0x2a71   :  { %v3981_v24 = vpop.xlane.xlu1 %3980 }
0x2a72   :  { %v3987_v2 = vadd.f32 %v3981_v24, %v6832_v51  ;;  %v4016_v5 = vsel %vm1087_vm6, %v4015_v61, %v4011_v21 }
0x2a74   :  { %v4020_v20 = vrot.slane %v3987_v2, %v6830_v49 }
0x2a76   :  { %v4021_v22 = vsel %vm1094_vm7, %v4020_v20, %v4016_v5 }
0x2a77   :  { %v4022_v34 = vsel %vm1110_vm8, %v4021_v22, %v4007_v19 }
0x2a78   :  { %v4024_v43 = vsel %vm1113_vm9, %v4022_v34, -inf }
0x2a79   :  { %4025 = vmax.xlane.f32.xlu0 %v4024_v43 }
0x2b02   :  { %v4026_v9 = vpop.xlane.xlu0 %4025 }
0x2b03   :  { %v4031_v53 = vrot.slane %v4026_v9, %v6700_v38  ;;  %v4035_v35 = vrot.slane %v4026_v9, %v6710_v3 }
0x2b05   :  { %v4038_v37 = vsub.f32 %v3982_v33, %v4031_v53  ;;  %v4039_v11 = vsub.f32 %v3983_v36, %v4031_v53  ;;  %v4041_v14 = vsub.f32 %v3985_v41, %v4035_v35  ;;  %v4040_v29 = vsub.f32 %v3984_v27, %v4031_v53 }
0x2b06   :  { %v4042_v13 = vsub.f32 %v3986_v10, %v4035_v35  ;;  %v4043_v23 = vsub.f32 %v3987_v2, %v4035_v35 }
0x2b07   :  { %v4044_v44 = vmul.f32 1.442695, %v4038_v37  ;;  %v4046_v32 = vmul.f32 1.442695, %v4039_v11  ;;  %v4050_v42 = vmul.f32 1.442695, %v4041_v14 }
0x2b08   :  { %v4048_v57 = vmul.f32 1.442695, %v4040_v29  ;;  %v4052_v17 = vmul.f32 1.442695, %v4042_v13  ;;  %v4054_v45 = vmul.f32 1.442695, %v4043_v23 }
0x2b09   :  { %6131 = vpow2.f32 %v4044_v44 }
0x2b0a   :  { %6133 = vpow2.f32 %v4046_v32 }
0x2b0b   :  { %6135 = vpow2.f32 %v4050_v42 }
0x2b0c   :  { %6137 = vpow2.f32 %v4048_v57 }
0x2b0d   :  { %6139 = vpow2.f32 %v4052_v17 }
0x2b0e   :  { %6141 = vpow2.f32 %v4054_v45 }
0x2b16   :  { %v6132_v59 = vpop.eup %6131 }
0x2b17   :  { %v6134_v61 = vpop.eup %6133  ;;  %4063 = vperm.xlu1 %5693, %v6132_v59  }
0x2b18   :  { %4066 = vperm.xlu0 %5694, %v6134_v61   ;;  %v6136_v36 = vpop.eup %6135 }
0x2b19   :  { %v6138_v33 = vpop.eup %6137 }
0x2b1a   :  { %v6140_v27 = vpop.eup %6139 }
0x2b1b   :  { %4072 = vperm.xlu1 %5693, %v6136_v36   ;;  %v6142_v10 = vpop.eup %6141 }
0x2b1c   :  { %4069 = vperm.xlu0 %5694, %v6138_v33  }
0x2b1f   :  { %4075 = vperm.xlu1 %5693, %v6140_v27  }
0x2b23   :  { %4078 = vperm.xlu1 %5693, %v6142_v10  }
0x2b92   :  { %v4064_v41 = vpop.permute.xlu1 %4063 }
0x2b93   :  { %v4067_v24 = vpop.permute.xlu0 %4066  ;;  %v4083_v31 = vrot.slane %v4064_v41, %v6824_v46 }
0x2b94   :  { %v4087_v20 = vrot.slane %v4067_v24, %v6827_v47 }
0x2b96   :  { %v4073_v28 = vpop.permute.xlu1 %4072  ;;  %v4088_v9 = vsel %vm1087_vm6, %v4087_v20, %v4083_v31 }
0x2b97   :  { %v4070_v2 = vpop.permute.xlu0 %4069  ;;  %v4097_v22 = vrot.slane %v4073_v28, %v6824_v46 }
0x2b98   :  { %v4092_v19 = vrot.slane %v4070_v2, %v6830_v49 }
0x2b9a   :  { %v4076_v21 = vpop.permute.xlu1 %4075  ;;  %v4093_v35 = vsel %vm1094_vm7, %v4092_v19, %v4088_v9 }
0x2b9b   :  { %v4101_v5 = vrot.slane %v4076_v21, %v6827_v47 }
0x2b9d   :  { %v4102_v53 = vsel %vm1087_vm6, %v4101_v5, %v4097_v22 }
0x2b9e   :  { %v4079_v34 = vpop.permute.xlu1 %4078 }
0x2b9f   :  { %v4106_v43 = vrot.slane %v4079_v34, %v6830_v49 }
0x2ba1   :  { %v4107_v37 = vsel %vm1094_vm7, %v4106_v43, %v4102_v53 }
0x2ba2   :  { %v4108_v11 = vsel %vm1110_vm8, %v4107_v37, %v4093_v35 }
0x2ba3   :  { %v4110_v14 = vsel %vm1113_vm9, %v4108_v11, 0.0 }
0x2ba4   :  { %4111 = vadd.xlane.f32.xlu0 %v4110_v14 }
0x2c2d   :  { %v4112_v29 = vpop.xlane.xlu0 %4111 }
0x2c2e   :  { %6143 = vrcp.f32 %v4112_v29 }
0x2c3b   :  { %v6144_v44 = vpop.eup %6143 }
0x2c3c   :  { %v4122_v32 = vrot.slane %v6144_v44, %v6710_v3  ;;  %v4118_v57 = vrot.slane %v6144_v44, %v6700_v38 }
0x2c3e   :  { %v4128_v13 = vmul.f32 %v6136_v36, %v4122_v32  ;;  %v4129_v42 = vmul.f32 %v6140_v27, %v4122_v32  ;;  %v4125_v23 = vmul.f32 %v6132_v59, %v4118_v57  ;;  %v4126_v17 = vmul.f32 %v6134_v61, %v4118_v57 }
0x2c3f   :  { %v4130_v45 = vmul.f32 %v6142_v10, %v4122_v32  ;;  %v4127_v41 = vmul.f32 %v6138_v33, %v4118_v57 }
0x2c40   :  { %4154 = vperm.xlu1 %5693, %v4128_v13  }
0x2c44   :  { %4159 = vperm.xlu1 %5693, %v4129_v42  }
0x2c48   :  { %4139 = vperm.xlu1 %5693, %v4125_v23  }
0x2c4c   :  { %4144 = vperm.xlu1 %5693, %v4126_v17  }
0x2c50   :  { %4164 = vperm.xlu1 %5693, %v4130_v45   ;;  %v3909_v45 = vadd.f32 %v7565_v8, %v6900_v15  ;;  %v7647_v8 = vld [vmem:[%s7937_s4] ss:$8 sps:$4 sm:$0xff]  }
0x2c54   :  { %4149 = vperm.xlu1 %5693, %v4127_v41  }
0x2cbb   :  { %v4155_v24 = vpop.permute.xlu1 %4154 }
0x2cbc   :  { %v4170_v36 = vmul.f32 %v4155_v24, %v7499_v12 }
0x2cbe   :  { %v4184_v61 = vsel %vm640_vm3, %v4170_v36, 0.0 }
0x2cbf   :  { %v4160_v28 = vpop.permute.xlu1 %4159 }
0x2cc0   :  { %v4171_v21 = vmul.f32 %v4160_v28, %v7496_v25 }
0x2cc2   :  { %v4185_v27 = vsel %vm640_vm3, %v4171_v21, 0.0 }
0x2cc3   :  { %v4140_v2 = vpop.permute.xlu1 %4139  ;;  %v4186_v5 = vadd.f32 %v4185_v27, %v4184_v61  ;;  %v7652_v27 = vld [vmem:[%s7937_s4 + $0x4] ss:$8 sps:$4 sm:$0xff]  }
0x2cc4   :  { %v4167_v10 = vmul.f32 %v4140_v2, %v7506_v26  ;;  %4347 = vmatprep.subr.bf16.mxu1 %v7652_v27 }
0x2cc5   :  { %4348 = vmatpush1.bf16.msra.mxu1 %v7647_v8 }
0x2cc6   :  { %v4173_v12 = vsel %vm640_vm3, %v4167_v10, 0.0 }
0x2cc7   :  { %v4145_v20 = vpop.permute.xlu1 %4144 }
0x2cc8   :  { %v4168_v31 = vmul.f32 %v4145_v20, %v7502_v63 }
0x2cca   :  { %v4174_v19 = vsel %vm640_vm3, %v4168_v31, 0.0 }
0x2ccb   :  { %v4165_v59 = vpop.permute.xlu1 %4164  ;;  %v4175_v9 = vadd.f32 %v4174_v19, %v4173_v12 }
0x2ccc   :  { %v4172_v33 = vmul.f32 %v4165_v59, %v7508_v39 }
0x2cce   :  { %v4187_v22 = vsel %vm640_vm3, %v4172_v33, 0.0 }
0x2ccf   :  { %v4188_v25 = vadd.f32 %v4187_v22, %v4186_v5  ;;  %v4150_v34 = vpop.permute.xlu1 %4149 }
0x2cd0   :  { %v4169_v43 = vmul.f32 %v4150_v34, %v7515_v18 }
0x2cd1   :  { %v4189_v63 = vrot.slane %v4188_v25, 4 }
0x2cd2   :  { %v4176_v53 = vsel %vm640_vm3, %v4169_v43, 0.0 }
0x2cd3   :  { %v4190_v35 = vadd.f32 %v4189_v63, %v4188_v25  ;;  %v4177_v37 = vadd.f32 %v4176_v53, %v4175_v9 }
0x2cd5   :  { %v4191_v26 = vrot.slane %v4190_v35, 2  ;;  %v4178_v11 = vrot.slane %v4177_v37, 4 }
0x2cd7   :  { %v4192_v39 = vadd.f32 %v4191_v26, %v4190_v35  ;;  %v4179_v14 = vadd.f32 %v4178_v11, %v4177_v37 }
0x2cd9   :  { %v4193_v29 = vrot.slane %v4192_v39, 1  ;;  %v4180_v44 = vrot.slane %v4179_v14, 2 }
0x2cdb   :  { %v4194_v32 = vadd.f32 %v4193_v29, %v4192_v39  ;;  %v4181_v13 = vadd.f32 %v4180_v44, %v4179_v14 }
0x2cdd   :  { %v4196_v42 = vadd.f32 %v7523_v62, %v4194_v32  ;;  %v4182_v57 = vrot.slane %v4181_v13, 1 }
0x2cdf   :  { %v4183_v23 = vadd.f32 %v4182_v57, %v4181_v13  ;;  %v4199_v17 = vrot.slane %v4196_v42, 7  ;;  %v5895_v42 = vld [vmem:[%s7940_s7 + $0x34] ss:$8 sps:$4 sm:$0xff]  }
0x2ce0   :  { %v5898_v57 = vld [vmem:[%s7936_s3 + $0x34] ss:$8 sps:$4 sm:$0xff]   ;;  %4461 = vmatprep.subr.bf16.mxu0 %v5895_v42 }
0x2ce1   :  { %v4195_v18 = vadd.f32 %v7523_v62, %v4183_v23  ;;  %v5901_v23 = vld [vmem:[%s7940_s7 + $0x24] ss:$8 sps:$4 sm:$0xff]   ;;  %4868 = vmatprep.subr.bf16.mxu1 %v5898_v57 }
0x2ce3   :  { %v4200_v41 = vsel %vm1110_vm8, %v4199_v17, %v4195_v18  ;;  %v5904_v18 = vld [vmem:[%s7936_s3 + $0x24] ss:$8 sps:$4 sm:$0xff]   ;;  %v5899_v17 = vld [vmem:[%s7940_s7 + $0x20] ss:$8 sps:$4 sm:$0xff]  }
0x2ce4   :  { %v4202_v24 = vadd.f32 %v4200_v41, %v3909_v45  ;;  %v5902_v45 = vld [vmem:[%s7936_s3 + $0x20] ss:$8 sps:$4 sm:$0xff]   ;;  %v5907_v41 = vld [vmem:[%s7940_s7 + $0x14] ss:$8 sps:$4 sm:$0xff]  }
0x2ce6   :  { %v4205_v28 = vsel %vm666_vm0, %v4202_v24, -inf  ;;  %5636 = vst.msk [vmem:[%s7945_s12 + $0xa] sm:$0x3] %vm666_vm0, %v4202_v24 }
0x2ce7   :  { %4206 = vmax.xlane.f32.xlu1 %v4205_v28  ;;  %v5905_v28 = vld [vmem:[%s7940_s7 + $0x10] ss:$8 sps:$4 sm:$0xff]  }
0x2d70   :  { %v4207_v2 = vpop.xlane.xlu1 %4206 }
0x2d71   :  { %vm4208_vm1 = vcmp.ge.f32.partialorder %v4202_v24, %v4207_v2  ;;  %v5910_v24 = vld [vmem:[%s7936_s3 + $0x14] ss:$8 sps:$4 sm:$0xff]   ;;  %v5908_v2 = vld [vmem:[%s7936_s3 + $0x10] ss:$8 sps:$4 sm:$0xff]  }
0x2d72   :  { %v4209_v21 = vsel %vm4208_vm1, %v6360_v4, 16 }
0x2d73   :  { %v4210_v62 = vsel %vm666_vm0, %v4209_v21, 2147483647  ;;  %v5913_v21 = vld [vmem:[%s7940_s7 + $0x4] ss:$8 sps:$4 sm:$0xff]  }
0x2d74   :  { %v4212_v20 = vshra.s32 %v4210_v62, 16  ;;  %v4211_v31 = vand.u32 65535, %v4210_v62  ;;  %v5916_v62 = vld [vmem:[%s7936_s3 + $0x4] ss:$8 sps:$4 sm:$0xff]  }
0x2d76   :  { %v4214_v36 = vcvt.s32.f32 %v4212_v20  ;;  %v4213_v61 = vcvt.s32.f32 %v4211_v31  ;;  %v5911_v20 = vld [vmem:[%s7940_s7] ss:$8 sps:$4 sm:$0xff]  }
0x2d78   :  { %4215 = vmin.xlane.f32.xlu0 %v4214_v36 }
0x2e01   :  { %v4216_v59 = vpop.xlane.xlu0 %4215 }
0x2e02   :  { %vm4217_vm2 = vcmp.eq.f32.partialorder %v4214_v36, %v4216_v59  ;;  %v4222_v33 = vcvt.f32.s32 %v4216_v59  ;;  %v5914_v36 = vld [vmem:[%s7936_s3] ss:$8 sps:$4 sm:$0xff]  }
0x2e03   :  { %v4218_v10 = vsel %vm4217_vm2, %v4213_v61, inf }
0x2e04   :  { %4219 = vmin.xlane.f32.xlu0 %v4218_v10  ;;  %v4223_v19 = vshll.u32 %v4222_v33, 16 }
0x2e8d   :  { %v4220_v5 = vpop.xlane.xlu0 %4219 }
0x2e8e   :  { %v4221_v22 = vcvt.f32.s32 %v4220_v5 }
0x2e90   :  { %v4224_v25 = vadd.s32 %v4223_v19, %v4221_v22 }
0x2e92   :  { %vm4225_vm4 = vcmp.eq.s32.totalorder %v6360_v4, %v4224_v25 }
0x2e93   :  { %v5637_v34 = vsel %vm4225_vm4, 1.0, %v6272_v0 }
0x2e94   :  { %v4228_v12 = vpack.c.bf16 %v5637_v34, %v5637_v34 }
0x2e96   :  { %5649 = vmatmul.mubr.msk.bf16.vlgmr.msra.gmra.mxu1 %vm640_vm3, %v4228_v12 }
0x2e97   :  { %4892 = vmatprep.mubr.bf16.mxu1 %v6271_v40 }
0x2f56   :  { %v4367_v43 = vpop.f32.mrf.mxu1 }
0x2f57   :  { %v4368_v9 = vadd.f32 %v4367_v43, %v7562_v54  ;;  %v5893_v54 = vld [vmem:[%s7940_s7 + $0x30] ss:$8 sps:$4 sm:$0xff]  }
0x2f58   :  { %v4369_v63 = vpop.f32.mrf.mxu1  ;;  %4462 = vmatpush1.bf16.msra.mxu0 %v5893_v54 }
0x2f59   :  { %v4374_v53 = vadd.f32 %v4368_v9, %v6706_v7  ;;  %v4370_v11 = vadd.f32 %v4369_v63, %v7567_v6  ;;  %v5896_v6 = vld [vmem:[%s7936_s3 + $0x30] ss:$8 sps:$4 sm:$0xff]   ;;  %4463 = vmatprep.subr.bf16.mxu0 %v5901_v23 }
0x2f5a   :  { %v4371_v35 = vpop.f32.mrf.mxu1  ;;  %4869 = vmatpush1.bf16.msra.mxu1 %v5896_v6 }
0x2f5b   :  { %v5650_v37 = vmul.f32 -1.442695, %v4374_v53  ;;  %v4375_v39 = vadd.f32 %v4370_v11, %v6713_v50  ;;  %4870 = vmatprep.subr.bf16.mxu1 %v5904_v18  ;;  %v7745_v18 = vld [vmem:[%s7942_s9] ss:$0 sm:$0xff] }
0x2f5c   :  { %v4372_v26 = vpop.f32.mrf.mxu1  ;;  %4464 = vmatpush1.bf16.msra.mxu0 %v5899_v17 }
0x2f5d   :  { %6145 = vpow2.f32 %v5650_v37  ;;  %4465 = vmatprep.subr.bf16.mxu0 %v5907_v41  ;;  %v5651_v31 = vmul.f32 -1.442695, %v4375_v39 }
0x2f5e   :  { %6147 = vtanh.f32 %v4375_v39  ;;  %4871 = vmatpush1.bf16.msra.mxu1 %v5902_v45 }
0x2f5f   :  { %4872 = vmatprep.subr.bf16.mxu1 %v5910_v24 }
0x2f60   :  { %4466 = vmatpush1.bf16.msra.mxu0 %v5905_v28 }
0x2f61   :  { %4467 = vmatprep.subr.bf16.mxu0 %v5913_v21 }
0x2f62   :  { %4873 = vmatpush1.bf16.msra.mxu1 %v5908_v2 }
0x2f63   :  { %4874 = vmatprep.subr.bf16.mxu1 %v5916_v62 }
0x2f64   :  { %4468 = vmatpush1.bf16.msra.mxu0 %v5911_v20 }
0x2f65   :  { %4928 = vmatprep.subr.bf16.mxu0 %v7652_v27 }
0x2f66   :  { %4875 = vmatpush1.bf16.msra.mxu1 %v5914_v36 }
0x2f67   :  { %5042 = vmatprep.subr.bf16.mxu1 %v5895_v42 }
0x2f6a   :  { %v6146_v14 = vpop.eup %6145 }
0x2f6b   :  { %v4379_v29 = vadd.f32 1.0, %v6146_v14  ;;  %v6148_v44 = vpop.eup %6147 }
0x2f6d   :  { %6149 = vrcp.f32 %v4379_v29 }
0x2f6e   :  { %6151 = vpow2.f32 %v5651_v31 }
0x2f7a   :  { %v6150_v32 = vpop.eup %6149 }
0x2f7b   :  { %v4390_v13 = vmul.f32 %v6150_v32, %v6148_v44  ;;  %v6152_v59 = vpop.eup %6151  ;;  %v4389_v10 = vmul.f32 %v6150_v32, %v7554_v58 }
0x2f7c   :  { %v4386_v61 = vadd.f32 1.0, %v6152_v59 }
0x2f7d   :  { %4392 = vrot.lane.b32.xlu0 %v4390_v13, %s6273_s5 }
0x2f7e   :  { %6153 = vrcp.f32 %v4386_v61 }
0x2f8b   :  { %v6154_v19 = vpop.eup %6153 }
0x2fef   :  { %v4393_v33 = vpop.permute.xlu0 %4392 }
0x2ff0   :  { %v7715_v5 = vadd.f32 %v4393_v33, %v4389_v10 }
0x2ff2   :  { %6155 = vtanh.f32 %v7715_v5 }
0x2fff   :  { %v6156_v22 = vpop.eup %6155 }
0x3000   :  { %v4397_v25 = vmul.f32 %v6156_v22, %v6154_v19 }
0x3002   :  { %v4398_v34 = vpack.c.bf16 %v4397_v25, %v4397_v25 }
0x3004   :  { %4408 = vrot.lane.b32.xlu1 %v4398_v34, %s6273_s5 }
0x3076   :  { %v4409_v27 = vpop.permute.xlu1 %4408 }
0x3077   :  { %5660 = vmatmul.mubr.msk.bf16.vlgmr.msra.gmra.mxu0 %vm741_vm5, %v4409_v27  ;;  %5671 = vmatmul.mubr.msk.bf16.vlgmr.msra.gmra.mxu1 %vm741_vm5, %v4409_v27 }
0x3078   :  { %4929 = vmatpush1.bf16.msra.mxu0 %v7647_v8  ;;  %4946 = vmatprep.mubr.bf16.mxu0 %v6271_v40 }
0x3079   :  { %5043 = vmatpush1.bf16.msra.mxu1 %v5893_v54  ;;  %5066 = vmatprep.mubr.bf16.mxu1 %v6271_v40 }
0x307a   :  { %5044 = vmatprep.subr.bf16.mxu1 %v5901_v23 }
0x307d   :  { %5045 = vmatpush1.bf16.msra.mxu1 %v5899_v17 }
0x307e   :  { %5046 = vmatprep.subr.bf16.mxu1 %v5907_v41 }
0x3081   :  { %5047 = vmatpush1.bf16.msra.mxu1 %v5905_v28 }
0x3082   :  { %5048 = vmatprep.subr.bf16.mxu1 %v5913_v21 }
0x3085   :  { %5049 = vmatpush1.bf16.msra.mxu1 %v5911_v20 }
0x3137   :  { %v4487_v58 = vpop.f32.mrf.mxu0  ;;  %v7724_v12 = vpop.f32.mrf.mxu1 }
0x3138   :  { %v4488_v43 = vadd.f32 %v4487_v58, %v6759_v16 }
0x3139   :  { %v7727_v9 = vpop.f32.mrf.mxu0  ;;  %v7729_v63 = vpop.f32.mrf.mxu1 }
0x313a   :  { %v4501_v8 = vrot.slane %v4488_v43, %v6762_v30 }
0x313b   :  { %v4491_v53 = vpop.f32.mrf.mxu0  ;;  %v4898_v35 = vpop.f32.mrf.mxu1 }
0x313c   :  { %v4502_v40 = vcombine.high %v4501_v8, %v4501_v8  ;;  %v4509_v37 = vrot.slane %v4501_v8, %v6762_v30 }
0x313d   :  { %v4492_v26 = vpop.f32.mrf.mxu0  ;;  %v4899_v11 = vpop.f32.mrf.mxu1 }
0x313e   :  { %v4516_v39 = vrot.slane %v4502_v40, %v6762_v30  ;;  %v4526_v14 = vrot.slane %v4509_v37, %v6700_v38 }
0x3140   :  { %v4530_v29 = vrot.slane %v4516_v39, %v6700_v38  ;;  %v4533_v44 = vadd.f32 %v4526_v14, %v6783_v52  ;;  %v4534_v32 = vadd.f32 %v4526_v14, %v6786_v55  ;;  %v4535_v13 = vadd.f32 %v4526_v14, %v6789_v56 }
0x3142   :  { %6157 = vtanh.f32 %v4533_v44  ;;  %v4536_v54 = vadd.f32 %v4530_v29, %v6801_v48  ;;  %v4537_v42 = vadd.f32 %v4530_v29, %v6794_v60  ;;  %v4538_v6 = vadd.f32 %v4530_v29, %v6805_v1 }
0x3143   :  { %6159 = vtanh.f32 %v4534_v32 }
0x3144   :  { %6161 = vtanh.f32 %v4535_v13 }
0x3145   :  { %6163 = vtanh.f32 %v4536_v54 }
0x3146   :  { %6165 = vtanh.f32 %v4537_v42 }
0x3147   :  { %6167 = vtanh.f32 %v4538_v6 }
0x314f   :  { %v6158_v57 = vpop.eup %6157 }
0x3150   :  { %v6160_v23 = vpop.eup %6159  ;;  %v4545_v17 = vmul.f32 %v7745_v18, %v6158_v57 }
0x3151   :  { %v6162_v45 = vpop.eup %6161  ;;  %v4546_v41 = vmul.f32 %v7745_v18, %v6160_v23 }
0x3152   :  { %4551 = vadd.xlane.f32.xlu0 %v4545_v17  ;;  %v4547_v24 = vmul.f32 %v7745_v18, %v6162_v45  ;;  %v6164_v28 = vpop.eup %6163 }
0x3153   :  { %4553 = vadd.xlane.f32.xlu1 %v4546_v41  ;;  %v4548_v2 = vmul.f32 %v7745_v18, %v6164_v28  ;;  %v6166_v21 = vpop.eup %6165 }
0x3154   :  { %v4549_v62 = vmul.f32 %v7745_v18, %v6166_v21  ;;  %v6168_v20 = vpop.eup %6167 }
0x3155   :  { %v4550_v36 = vmul.f32 %v7745_v18, %v6168_v20 }
0x3156   :  { %4555 = vadd.xlane.f32.xlu0 %v4547_v24 }
0x315a   :  { %4557 = vadd.xlane.f32.xlu0 %v4548_v2 }
0x315e   :  { %4559 = vadd.xlane.f32.xlu0 %v4549_v62 }
0x3162   :  { %4561 = vadd.xlane.f32.xlu0 %v4550_v36 }
0x31db   :  { %v4552_v31 = vpop.xlane.xlu0 %4551 }
0x31dc   :  { %v4554_v10 = vpop.xlane.xlu1 %4553  ;;  %v4563_v19 = vadd.f32 %v4552_v31, %v6832_v51 }
0x31dd   :  { %v4564_v33 = vadd.f32 %v4554_v10, %v6832_v51 }
0x31de   :  { %v4578_v43 = vrot.slane %v4563_v19, %v6824_v46 }
0x31df   :  { %v4556_v59 = vpop.xlane.xlu0 %4555  ;;  %v4582_v58 = vrot.slane %v4564_v33, %v6827_v47 }
0x31e0   :  { %v4565_v25 = vadd.f32 %v4556_v59, %v6832_v51 }
0x31e1   :  { %v4583_v11 = vsel %vm1087_vm6, %v4582_v58, %v4578_v43 }
0x31e2   :  { %v4587_v35 = vrot.slane %v4565_v25, %v6830_v49 }
0x31e3   :  { %v4558_v61 = vpop.xlane.xlu0 %4557 }
0x31e4   :  { %v4566_v27 = vadd.f32 %v4558_v61, %v6832_v51  ;;  %v4588_v14 = vsel %vm1094_vm7, %v4587_v35, %v4583_v11 }
0x31e6   :  { %v4592_v37 = vrot.slane %v4566_v27, %v6824_v46 }
0x31e7   :  { %v4560_v22 = vpop.xlane.xlu0 %4559 }
0x31e8   :  { %v4567_v34 = vadd.f32 %v4560_v22, %v6832_v51 }
0x31ea   :  { %v4596_v8 = vrot.slane %v4567_v34, %v6827_v47 }
0x31eb   :  { %v4562_v53 = vpop.xlane.xlu0 %4561 }
0x31ec   :  { %v4568_v40 = vadd.f32 %v4562_v53, %v6832_v51  ;;  %v4597_v39 = vsel %vm1087_vm6, %v4596_v8, %v4592_v37 }
0x31ee   :  { %v4601_v26 = vrot.slane %v4568_v40, %v6830_v49 }
0x31f0   :  { %v4602_v29 = vsel %vm1094_vm7, %v4601_v26, %v4597_v39 }
0x31f1   :  { %v4603_v44 = vsel %vm1110_vm8, %v4602_v29, %v4588_v14 }
0x31f2   :  { %v4605_v32 = vsel %vm1113_vm9, %v4603_v44, -inf }
0x31f3   :  { %4606 = vmax.xlane.f32.xlu0 %v4605_v32 }
0x327c   :  { %v4607_v13 = vpop.xlane.xlu0 %4606 }
0x327d   :  { %v4612_v54 = vrot.slane %v4607_v13, %v6700_v38  ;;  %v4616_v42 = vrot.slane %v4607_v13, %v6710_v3 }
0x327f   :  { %v4619_v6 = vsub.f32 %v4563_v19, %v4612_v54  ;;  %v4620_v57 = vsub.f32 %v4564_v33, %v4612_v54  ;;  %v4622_v23 = vsub.f32 %v4566_v27, %v4616_v42  ;;  %v4623_v17 = vsub.f32 %v4567_v34, %v4616_v42 }
0x3280   :  { %v4624_v24 = vsub.f32 %v4568_v40, %v4616_v42  ;;  %v4621_v2 = vsub.f32 %v4565_v25, %v4612_v54 }
0x3281   :  { %v4625_v45 = vmul.f32 1.442695, %v4619_v6  ;;  %v4627_v41 = vmul.f32 1.442695, %v4620_v57  ;;  %v4633_v28 = vmul.f32 1.442695, %v4623_v17 }
0x3282   :  { %v4631_v21 = vmul.f32 1.442695, %v4622_v23  ;;  %v4635_v62 = vmul.f32 1.442695, %v4624_v24  ;;  %v4629_v20 = vmul.f32 1.442695, %v4621_v2 }
0x3283   :  { %6169 = vpow2.f32 %v4625_v45 }
0x3284   :  { %6171 = vpow2.f32 %v4627_v41 }
0x3285   :  { %6173 = vpow2.f32 %v4633_v28 }
0x3286   :  { %6175 = vpow2.f32 %v4631_v21  ;;  %v7787_v21 = vld [vmem:[#allocation3 + $0x20] sm:$0xff] }
0x3287   :  { %6177 = vpow2.f32 %v4635_v62 }
0x3288   :  { %6179 = vpow2.f32 %v4629_v20  ;;  %v7790_v20 = vld [vmem:[#allocation3 + $0x18] sm:$0xff] }
0x3290   :  { %v6170_v36 = vpop.eup %6169 }
0x3291   :  { %v6172_v31 = vpop.eup %6171  ;;  %4644 = vperm.xlu0 %5694, %v6170_v36  }
0x3292   :  { %4647 = vperm.xlu1 %5693, %v6172_v31   ;;  %v6174_v59 = vpop.eup %6173 }
0x3293   :  { %v6176_v61 = vpop.eup %6175 }
0x3294   :  { %v6178_v10 = vpop.eup %6177 }
0x3295   :  { %4656 = vperm.xlu0 %5694, %v6174_v59   ;;  %v6180_v33 = vpop.eup %6179 }
0x3296   :  { %4653 = vperm.xlu1 %5693, %v6176_v61  }
0x3299   :  { %4659 = vperm.xlu0 %5694, %v6178_v10  }
0x329a   :  { %4650 = vperm.xlu1 %5693, %v6180_v33  }
0x330c   :  { %v4645_v19 = vpop.permute.xlu0 %4644 }
0x330d   :  { %v4648_v22 = vpop.permute.xlu1 %4647  ;;  %v4664_v8 = vrot.slane %v4645_v19, %v6824_v46  ;;  %v7799_v19 = vld [vmem:[#allocation3 + $0x28] sm:$0xff] }
0x330e   :  { %v4668_v43 = vrot.slane %v4648_v22, %v6827_v47 }
0x3310   :  { %v4657_v25 = vpop.permute.xlu0 %4656  ;;  %v4669_v11 = vsel %vm1087_vm6, %v4668_v43, %v4664_v8 }
0x3311   :  { %v4654_v34 = vpop.permute.xlu1 %4653  ;;  %v4682_v58 = vrot.slane %v4657_v25, %v6827_v47 }
0x3312   :  { %v4678_v27 = vrot.slane %v4654_v34, %v6824_v46 }
0x3314   :  { %v4660_v53 = vpop.permute.xlu0 %4659  ;;  %v4683_v37 = vsel %vm1087_vm6, %v4682_v58, %v4678_v27 }
0x3315   :  { %v4651_v35 = vpop.permute.xlu1 %4650  ;;  %v4687_v40 = vrot.slane %v4660_v53, %v6830_v49 }
0x3316   :  { %v4673_v26 = vrot.slane %v4651_v35, %v6830_v49  ;;  %v7806_v35 = vld [vmem:[#allocation3 + $0x10] sm:$0xff] }
0x3317   :  { %v4688_v39 = vsel %vm1094_vm7, %v4687_v40, %v4683_v37 }
0x3318   :  { %v4674_v14 = vsel %vm1094_vm7, %v4673_v26, %v4669_v11 }
0x3319   :  { %v4689_v29 = vsel %vm1110_vm8, %v4688_v39, %v4674_v14 }
0x331a   :  { %v4691_v44 = vsel %vm1113_vm9, %v4689_v29, 0.0 }
0x331b   :  { %4692 = vadd.xlane.f32.xlu1 %v4691_v44 }
0x33a4   :  { %v4693_v32 = vpop.xlane.xlu1 %4692 }
0x33a5   :  { %6181 = vrcp.f32 %v4693_v32 }
0x33b2   :  { %v6182_v13 = vpop.eup %6181 }
0x33b3   :  { %v4703_v54 = vrot.slane %v6182_v13, %v6710_v3  ;;  %v4699_v57 = vrot.slane %v6182_v13, %v6700_v38 }
0x33b5   :  { %v4709_v42 = vmul.f32 %v6176_v61, %v4703_v54  ;;  %v4710_v6 = vmul.f32 %v6174_v59, %v4703_v54  ;;  %v4706_v23 = vmul.f32 %v6170_v36, %v4699_v57  ;;  %v4707_v17 = vmul.f32 %v6172_v31, %v4699_v57  ;;  %v7793_v36 = vld [vmem:[#allocation3 + $0x8] sm:$0xff] }
0x33b6   :  { %v4711_v45 = vmul.f32 %v6178_v10, %v4703_v54  ;;  %v4708_v41 = vmul.f32 %v6180_v33, %v4699_v57  ;;  %v7797_v33 = vld [vmem:[#allocation3] sm:$0xff] }
0x33b7   :  { %4735 = vperm.xlu0 %5694, %v4709_v42  }
0x33bb   :  { %4740 = vperm.xlu0 %5694, %v4710_v6  }
0x33bf   :  { %4720 = vperm.xlu0 %5694, %v4706_v23  }
0x33c3   :  { %4725 = vperm.xlu0 %5694, %v4707_v17  }
0x33c7   :  { %4745 = vperm.xlu0 %5694, %v4711_v45   ;;  %v7814_v45 = vld [vmem:[%s7944_s11] ss:$0 sm:$0xff]  ;;  %s6275_s11 = smov [#allocation5]  }
0x33cb   :  { %4730 = vperm.xlu0 %5694, %v4708_v41  }
0x3432   :  { %v4736_v24 = vpop.permute.xlu0 %4735 }
0x3433   :  { %v4751_v61 = vmul.f32 %v4736_v24, %v7790_v20 }
0x3435   :  { %v4765_v25 = vsel %vm640_vm3, %v4751_v61, 0.0 }
0x3436   :  { %v4741_v28 = vpop.permute.xlu0 %4740 }
0x3437   :  { %v4752_v62 = vmul.f32 %v4741_v28, %v7787_v21 }
0x3439   :  { %v4766_v31 = vsel %vm640_vm3, %v4752_v62, 0.0 }
0x343a   :  { %v4721_v2 = vpop.permute.xlu0 %4720  ;;  %v4767_v58 = vadd.f32 %v4766_v31, %v4765_v25 }
0x343b   :  { %v4748_v34 = vmul.f32 %v4721_v2, %v7797_v33 }
0x343d   :  { %v4754_v37 = vsel %vm640_vm3, %v4748_v34, 0.0 }
0x343e   :  { %v4726_v59 = vpop.permute.xlu0 %4725 }
0x343f   :  { %v4749_v10 = vmul.f32 %v4726_v59, %v7793_v36  ;;  %v4490_v59 = vadd.f32 %v7727_v9, %v6900_v15 }
0x3441   :  { %v4755_v43 = vsel %vm640_vm3, %v4749_v10, 0.0 }
0x3442   :  { %v4746_v22 = vpop.permute.xlu0 %4745  ;;  %v4756_v11 = vadd.f32 %v4755_v43, %v4754_v37 }
0x3443   :  { %v4753_v27 = vmul.f32 %v4746_v22, %v7799_v19 }
0x3445   :  { %v4768_v8 = vsel %vm640_vm3, %v4753_v27, 0.0 }
0x3446   :  { %v4769_v53 = vadd.f32 %v4768_v8, %v4767_v58  ;;  %v4731_v40 = vpop.permute.xlu0 %4730 }
0x3447   :  { %v4750_v26 = vmul.f32 %v4731_v40, %v7806_v35 }
0x3448   :  { %v4770_v39 = vrot.slane %v4769_v53, 4 }
0x3449   :  { %v4757_v14 = vsel %vm640_vm3, %v4750_v26, 0.0 }
0x344a   :  { %v4771_v29 = vadd.f32 %v4770_v39, %v4769_v53  ;;  %v4758_v44 = vadd.f32 %v4757_v14, %v4756_v11 }
0x344c   :  { %v4772_v32 = vrot.slane %v4771_v29, 2  ;;  %v4759_v13 = vrot.slane %v4758_v44, 4 }
0x344e   :  { %v4773_v54 = vadd.f32 %v4772_v32, %v4771_v29  ;;  %v4760_v42 = vadd.f32 %v4759_v13, %v4758_v44 }
0x3450   :  { %v4774_v6 = vrot.slane %v4773_v54, 1  ;;  %v4761_v57 = vrot.slane %v4760_v42, 2 }
0x3452   :  { %v4775_v23 = vadd.f32 %v4774_v6, %v4773_v54  ;;  %v4762_v17 = vadd.f32 %v4761_v57, %v4760_v42 }
0x3454   :  { %v4777_v41 = vadd.f32 %v7814_v45, %v4775_v23  ;;  %v4763_v24 = vrot.slane %v4762_v17, 1 }
0x3456   :  { %v4764_v28 = vadd.f32 %v4763_v24, %v4762_v17  ;;  %v4780_v62 = vrot.slane %v4777_v41, 7 }
0x3458   :  { %v4776_v2 = vadd.f32 %v7814_v45, %v4764_v28 }
0x345a   :  { %v4781_v61 = vsel %vm1110_vm8, %v4780_v62, %v4776_v2 }
0x345b   :  { %v4783_v31 = vadd.f32 %v4781_v61, %v4490_v59 }
0x345d   :  { %v4786_v10 = vsel %vm666_vm0, %v4783_v31, -inf  ;;  %5661 = vst.msk [vmem:[%s7945_s12 + $0xc] sm:$0x3] %vm666_vm0, %v4783_v31 }
0x345e   :  { %4787 = vmax.xlane.f32.xlu0 %v4786_v10 }
0x34e7   :  { %v4788_v22 = vpop.xlane.xlu0 %4787 }
0x34e8   :  { %vm4789_vm10 = vcmp.ge.f32.partialorder %v4783_v31, %v4788_v22 }
0x34e9   :  { %v4790_v25 = vsel %vm4789_vm10, %v6360_v4, 16 }
0x34ea   :  { %v4791_v34 = vsel %vm666_vm0, %v4790_v25, 2147483647 }
0x34eb   :  { %v4793_v27 = vshra.s32 %v4791_v34, 16  ;;  %v4792_v9 = vand.u32 65535, %v4791_v34 }
0x34ed   :  { %v4795_v58 = vcvt.s32.f32 %v4793_v27  ;;  %v4794_v8 = vcvt.s32.f32 %v4792_v9 }
0x34ef   :  { %4796 = vmin.xlane.f32.xlu1 %v4795_v58 }
0x3578   :  { %v4797_v43 = vpop.xlane.xlu1 %4796 }
0x3579   :  { %vm4798_vm11 = vcmp.eq.f32.partialorder %v4795_v58, %v4797_v43  ;;  %v4803_v40 = vcvt.f32.s32 %v4797_v43 }
0x357a   :  { %v4799_v53 = vsel %vm4798_vm11, %v4794_v8, inf }
0x357b   :  { %4800 = vmin.xlane.f32.xlu1 %v4799_v53  ;;  %v4804_v26 = vshll.u32 %v4803_v40, 16 }
0x3604   :  { %v4801_v37 = vpop.xlane.xlu1 %4800 }
0x3605   :  { %v4802_v11 = vcvt.f32.s32 %v4801_v37 }
0x3607   :  { %v4805_v39 = vadd.s32 %v4804_v26, %v4802_v11 }
0x3609   :  { %vm4806_vm12 = vcmp.eq.s32.totalorder %v6360_v4, %v4805_v39 }
0x360a   :  { %v5662_v14 = vsel %vm4806_vm12, 1.0, %v6272_v0 }
0x360b   :  { %v4809_v29 = vpack.c.bf16 %v5662_v14, %v5662_v14 }
0x360d   :  { %5674 = vmatmul.mubr.msk.bf16.vlgmr.msra.gmra.mxu0 %vm640_vm3, %v4809_v29 }
0x36cd   :  { %v4948_v44 = vpop.f32.mrf.mxu0 }
0x36ce   :  { %v4949_v32 = vadd.f32 %v4948_v44, %v7724_v12 }
0x36cf   :  { %v4950_v13 = vpop.f32.mrf.mxu0 }
0x36d0   :  { %v4955_v54 = vadd.f32 %v4949_v32, %v6706_v7  ;;  %v4951_v23 = vadd.f32 %v4950_v13, %v7729_v63 }
0x36d1   :  { %v4952_v42 = vpop.f32.mrf.mxu0 }
0x36d2   :  { %v5675_v6 = vmul.f32 -1.442695, %v4955_v54  ;;  %v4956_v17 = vadd.f32 %v4951_v23, %v6713_v50 }
0x36d3   :  { %v4953_v57 = vpop.f32.mrf.mxu0 }
0x36d4   :  { %6183 = vpow2.f32 %v5675_v6  ;;  %v5676_v12 = vmul.f32 -1.442695, %v4956_v17 }
0x36d5   :  { %6185 = vtanh.f32 %v4956_v17 }
0x36e1   :  { %v6184_v4 = vpop.eup %6183 }
0x36e2   :  { %v4960_v41 = vadd.f32 1.0, %v6184_v4  ;;  %v6186_v0 = vpop.eup %6185 }
0x36e4   :  { %6187 = vrcp.f32 %v4960_v41 }
0x36e5   :  { %6189 = vpow2.f32 %v5676_v12 }
0x36f1   :  { %v6188_v24 = vpop.eup %6187 }
0x36f2   :  { %v4971_v28 = vmul.f32 %v6188_v24, %v6186_v0  ;;  %v6190_v7 = vpop.eup %6189  ;;  %v4970_v62 = vmul.f32 %v6188_v24, %v7715_v5 }
0x36f3   :  { %v4967_v2 = vadd.f32 1.0, %v6190_v7 }
0x36f4   :  { %4973 = vrot.lane.b32.xlu1 %v4971_v28, %s6273_s5 }
0x36f5   :  { %6191 = vrcp.f32 %v4967_v2 }
0x3702   :  { %v6192_v50 = vpop.eup %6191 }
0x3766   :  { %v4974_v59 = vpop.permute.xlu1 %4973 }
0x3767   :  { %v7837_v61 = vadd.f32 %v4974_v59, %v4970_v62 }
0x3769   :  { %6193 = vtanh.f32 %v7837_v61 }
0x3776   :  { %v6194_v63 = vpop.eup %6193 }
0x3777   :  { %v7840_v31 = vmul.f32 %v6194_v63, %v6192_v50 }
0x3779   :  { %v4979_v10 = vpack.c.bf16 %v7840_v31, %v7840_v31 }
0x377b   :  { %4989 = vrot.lane.b32.xlu0 %v4979_v10, %s6273_s5 }
0x37ed   :  { %v4990_v22 = vpop.permute.xlu0 %4989 }
0x37ee   :  { %5685 = vmatmul.mubr.msk.bf16.vlgmr.msra.gmra.mxu1 %vm741_vm5, %v4990_v22  ;;  %vm5371_vm5 = vcmask 517120  }
0x38ae   :  { %v5068_v25 = vpop.f32.mrf.mxu1 }
0x38af   :  { %v5069_v5 = vadd.f32 %v5068_v25, %v6759_v16 }
0x38b0   :  { %v7847_v34 = vpop.f32.mrf.mxu1 }
0x38b1   :  { %v5082_v27 = vrot.slane %v5069_v5, %v6762_v30 }
0x38b2   :  { %v5072_v58 = vpop.f32.mrf.mxu1 }
0x38b3   :  { %v5083_v9 = vcombine.high %v5082_v27, %v5082_v27  ;;  %v5090_v43 = vrot.slane %v5082_v27, %v6762_v30 }
0x38b4   :  { %v5073_v8 = vpop.f32.mrf.mxu1 }
0x38b5   :  { %v5097_v53 = vrot.slane %v5083_v9, %v6762_v30  ;;  %v5107_v40 = vrot.slane %v5090_v43, %v6700_v38 }
0x38b7   :  { %v5111_v37 = vrot.slane %v5097_v53, %v6700_v38  ;;  %v5114_v26 = vadd.f32 %v5107_v40, %v6783_v52  ;;  %v5115_v11 = vadd.f32 %v5107_v40, %v6786_v55  ;;  %v5116_v16 = vadd.f32 %v5107_v40, %v6789_v56 }
0x38b9   :  { %6195 = vtanh.f32 %v5114_v26  ;;  %v5117_v39 = vadd.f32 %v5111_v37, %v6801_v48  ;;  %v5118_v14 = vadd.f32 %v5111_v37, %v6794_v60  ;;  %v5119_v30 = vadd.f32 %v5111_v37, %v6805_v1 }
0x38ba   :  { %6197 = vtanh.f32 %v5115_v11 }
0x38bb   :  { %6199 = vtanh.f32 %v5116_v16 }
0x38bc   :  { %6201 = vtanh.f32 %v5117_v39 }
0x38bd   :  { %6203 = vtanh.f32 %v5118_v14 }
0x38be   :  { %6205 = vtanh.f32 %v5119_v30 }
0x38c6   :  { %v6196_v29 = vpop.eup %6195 }
0x38c7   :  { %v6198_v44 = vpop.eup %6197  ;;  %v5126_v52 = vmul.f32 %v7745_v18, %v6196_v29 }
0x38c8   :  { %v6200_v32 = vpop.eup %6199  ;;  %v5127_v55 = vmul.f32 %v7745_v18, %v6198_v44 }
0x38c9   :  { %5132 = vadd.xlane.f32.xlu1 %v5126_v52  ;;  %v5128_v56 = vmul.f32 %v7745_v18, %v6200_v32  ;;  %v6202_v48 = vpop.eup %6201 }
0x38ca   :  { %5134 = vadd.xlane.f32.xlu0 %v5127_v55  ;;  %v5129_v60 = vmul.f32 %v7745_v18, %v6202_v48  ;;  %v6204_v13 = vpop.eup %6203 }
0x38cb   :  { %v5130_v1 = vmul.f32 %v7745_v18, %v6204_v13  ;;  %v6206_v54 = vpop.eup %6205 }
0x38cc   :  { %v5131_v42 = vmul.f32 %v7745_v18, %v6206_v54 }
0x38cd   :  { %5136 = vadd.xlane.f32.xlu1 %v5128_v56 }
0x38d1   :  { %5138 = vadd.xlane.f32.xlu1 %v5129_v60 }
0x38d5   :  { %5140 = vadd.xlane.f32.xlu1 %v5130_v1 }
0x38d9   :  { %5142 = vadd.xlane.f32.xlu1 %v5131_v42 }
0x3952   :  { %v5133_v6 = vpop.xlane.xlu1 %5132 }
0x3953   :  { %v5135_v17 = vpop.xlane.xlu0 %5134  ;;  %v5144_v41 = vadd.f32 %v5133_v6, %v6832_v51 }
0x3954   :  { %v5145_v4 = vadd.f32 %v5135_v17, %v6832_v51 }
0x3955   :  { %v5159_v18 = vrot.slane %v5144_v41, %v6824_v46 }
0x3956   :  { %v5137_v57 = vpop.xlane.xlu1 %5136  ;;  %v5163_v7 = vrot.slane %v5145_v4, %v6827_v47 }
0x3957   :  { %v5146_v24 = vadd.f32 %v5137_v57, %v6832_v51 }
0x3958   :  { %v5164_v22 = vsel %vm1087_vm6, %v5163_v7, %v5159_v18 }
0x3959   :  { %v5168_v59 = vrot.slane %v5146_v24, %v6830_v49 }
0x395a   :  { %v5139_v23 = vpop.xlane.xlu1 %5138 }
0x395b   :  { %v5147_v12 = vadd.f32 %v5139_v23, %v6832_v51  ;;  %v5169_v5 = vsel %vm1094_vm7, %v5168_v59, %v5164_v22 }
0x395d   :  { %v5173_v63 = vrot.slane %v5147_v12, %v6824_v46 }
0x395e   :  { %v5141_v0 = vpop.xlane.xlu1 %5140 }
0x395f   :  { %v5148_v28 = vadd.f32 %v5141_v0, %v6832_v51 }
0x3961   :  { %v5177_v2 = vrot.slane %v5148_v28, %v6827_v47 }
0x3962   :  { %v5143_v62 = vpop.xlane.xlu1 %5142 }
0x3963   :  { %v5149_v50 = vadd.f32 %v5143_v62, %v6832_v51  ;;  %v5178_v25 = vsel %vm1087_vm6, %v5177_v2, %v5173_v63 }
0x3965   :  { %v5182_v10 = vrot.slane %v5149_v50, %v6830_v49 }
0x3967   :  { %v5183_v27 = vsel %vm1094_vm7, %v5182_v10, %v5178_v25 }
0x3968   :  { %v5184_v58 = vsel %vm1110_vm8, %v5183_v27, %v5169_v5 }
0x3969   :  { %v5186_v9 = vsel %vm1113_vm9, %v5184_v58, -inf }
0x396a   :  { %5187 = vmax.xlane.f32.xlu0 %v5186_v9 }
0x39f3   :  { %v5188_v43 = vpop.xlane.xlu0 %5187 }
0x39f4   :  { %v5193_v51 = vrot.slane %v5188_v43, %v6700_v38  ;;  %v5197_v8 = vrot.slane %v5188_v43, %v6710_v3 }
0x39f6   :  { %v5200_v53 = vsub.f32 %v5144_v41, %v5193_v51  ;;  %v5201_v40 = vsub.f32 %v5145_v4, %v5193_v51  ;;  %v5203_v37 = vsub.f32 %v5147_v12, %v5197_v8  ;;  %v5202_v26 = vsub.f32 %v5146_v24, %v5193_v51 }
0x39f7   :  { %v5204_v39 = vsub.f32 %v5148_v28, %v5197_v8  ;;  %v5205_v29 = vsub.f32 %v5149_v50, %v5197_v8 }
0x39f8   :  { %v5206_v11 = vmul.f32 1.442695, %v5200_v53  ;;  %v5208_v16 = vmul.f32 1.442695, %v5201_v40  ;;  %v5212_v14 = vmul.f32 1.442695, %v5203_v37 }
0x39f9   :  { %v5210_v30 = vmul.f32 1.442695, %v5202_v26  ;;  %v5214_v44 = vmul.f32 1.442695, %v5204_v39  ;;  %v5216_v52 = vmul.f32 1.442695, %v5205_v29 }
0x39fa   :  { %6207 = vpow2.f32 %v5206_v11 }
0x39fb   :  { %6209 = vpow2.f32 %v5208_v16 }
0x39fc   :  { %6211 = vpow2.f32 %v5212_v14 }
0x39fd   :  { %6213 = vpow2.f32 %v5210_v30 }
0x39fe   :  { %6215 = vpow2.f32 %v5214_v44 }
0x39ff   :  { %6217 = vpow2.f32 %v5216_v52 }
0x3a07   :  { %v6208_v32 = vpop.eup %6207 }
0x3a08   :  { %v6210_v55 = vpop.eup %6209  ;;  %5225 = vperm.xlu1 %5693, %v6208_v32  }
0x3a09   :  { %5228 = vperm.xlu0 %5694, %v6210_v55   ;;  %v6212_v56 = vpop.eup %6211 }
0x3a0a   :  { %v6214_v48 = vpop.eup %6213 }
0x3a0b   :  { %v6216_v60 = vpop.eup %6215 }
0x3a0c   :  { %5234 = vperm.xlu1 %5693, %v6212_v56   ;;  %v6218_v13 = vpop.eup %6217 }
0x3a0d   :  { %5231 = vperm.xlu0 %5694, %v6214_v48  }
0x3a10   :  { %5237 = vperm.xlu1 %5693, %v6216_v60  }
0x3a14   :  { %5240 = vperm.xlu1 %5693, %v6218_v13  }
0x3a83   :  { %v5226_v1 = vpop.permute.xlu1 %5225 }
0x3a84   :  { %v5229_v54 = vpop.permute.xlu0 %5228  ;;  %v5245_v17 = vrot.slane %v5226_v1, %v6824_v46 }
0x3a85   :  { %v5249_v23 = vrot.slane %v5229_v54, %v6827_v47 }
0x3a87   :  { %v5235_v42 = vpop.permute.xlu1 %5234  ;;  %v5250_v12 = vsel %vm1087_vm6, %v5249_v23, %v5245_v17 }
0x3a88   :  { %v5232_v6 = vpop.permute.xlu0 %5231  ;;  %v5259_v0 = vrot.slane %v5235_v42, %v6824_v46 }
0x3a89   :  { %v5254_v41 = vrot.slane %v5232_v6, %v6830_v49 }
0x3a8b   :  { %v5238_v57 = vpop.permute.xlu1 %5237  ;;  %v5255_v18 = vsel %vm1094_vm7, %v5254_v41, %v5250_v12 }
0x3a8c   :  { %v5263_v4 = vrot.slane %v5238_v57, %v6827_v47 }
0x3a8e   :  { %v5264_v7 = vsel %vm1087_vm6, %v5263_v4, %v5259_v0 }
0x3a8f   :  { %v5241_v24 = vpop.permute.xlu1 %5240 }
0x3a90   :  { %v5268_v28 = vrot.slane %v5241_v24, %v6830_v49 }
0x3a92   :  { %v5269_v2 = vsel %vm1094_vm7, %v5268_v28, %v5264_v7 }
0x3a93   :  { %v5270_v62 = vsel %vm1110_vm8, %v5269_v2, %v5255_v18 }
0x3a94   :  { %v5272_v59 = vsel %vm1113_vm9, %v5270_v62, 0.0 }
0x3a95   :  { %5273 = vadd.xlane.f32.xlu0 %v5272_v59 }
0x3b1e   :  { %v5274_v47 = vpop.xlane.xlu0 %5273 }
0x3b1f   :  { %6219 = vrcp.f32 %v5274_v47 }
0x3b2c   :  { %v6220_v50 = vpop.eup %6219 }
0x3b2d   :  { %v5284_v46 = vrot.slane %v6220_v50, %v6710_v3  ;;  %v5280_v10 = vrot.slane %v6220_v50, %v6700_v38 }
0x3b2f   :  { %v5290_v63 = vmul.f32 %v6212_v56, %v5284_v46  ;;  %v5291_v49 = vmul.f32 %v6216_v60, %v5284_v46  ;;  %v5287_v22 = vmul.f32 %v6208_v32, %v5280_v10  ;;  %v5288_v25 = vmul.f32 %v6210_v55, %v5280_v10 }
0x3b30   :  { %v5292_v5 = vmul.f32 %v6218_v13, %v5284_v46  ;;  %v5289_v27 = vmul.f32 %v6214_v48, %v5280_v10 }
0x3b31   :  { %5316 = vperm.xlu1 %5693, %v5290_v63  }
0x3b35   :  { %5321 = vperm.xlu1 %5693, %v5291_v49  }
0x3b39   :  { %5301 = vperm.xlu1 %5693, %v5287_v22  }
0x3b3d   :  { %5306 = vperm.xlu1 %5693, %v5288_v25  }
0x3b41   :  { %5326 = vperm.xlu1 %5693, %v5292_v5  }
0x3b45   :  { %5311 = vperm.xlu1 %5693, %v5289_v27  }
0x3b49   :  { %5368 = vrot.lane.b32.xlu1 %v7840_v31, %s6273_s5 }
0x3b4d   :  { %5374 = vrot.lane.b32.xlu1 %v7837_v61, %s6273_s5  ;;  %s5386_s5 = sshll.u32 %s6275_s11, 4  ;;  %s5387_s5 = int_to_ptr.vmem [resolvable:$true] %s5386_s5 }
0x3b4e   :  { %s6227_s6 = scalar_lea.vmem %s5387_s5, 32  ;;  %p6232_p1 = scmp.lt.s32.totalorder %s5387_s5, %s5387_s5 }
0x3b4f   :  { %p6228_p0 = scmp.ne.s32.totalorder %s5387_s5, %s6227_s6  ;;  %p6233_p2 = scmp.lt.s32.totalorder %s6227_s6, %s6227_s6 }
0x3b51   :  { %p6234_p3 = por %p6233_p2, %p6232_p1 }
0x3b53   :  { %p6235_p4 = pnand %p6234_p3, %p6228_p0 }
0x3bac   :  { %v5317_v3 = vpop.permute.xlu1 %5316 }
0x3bad   :  { %v5332_v51 = vmul.f32 %v5317_v3, %v7790_v20 }
0x3baf   :  { %v5346_v37 = vsel %vm640_vm3, %v5332_v51, 0.0 }
0x3bb0   :  { %v5322_v58 = vpop.permute.xlu1 %5321 }
0x3bb1   :  { %v5333_v38 = vmul.f32 %v5322_v58, %v7787_v21 }
0x3bb3   :  { %v5347_v8 = vsel %vm640_vm3, %v5333_v38, 0.0 }
0x3bb4   :  { %v5302_v9 = vpop.permute.xlu1 %5301  ;;  %v5348_v61 = vadd.f32 %v5347_v8, %v5346_v37 }
0x3bb5   :  { %v5329_v31 = vmul.f32 %v5302_v9, %v7797_v33 }
0x3bb7   :  { %v5335_v20 = vsel %vm640_vm3, %v5329_v31, 0.0 }
0x3bb8   :  { %v5307_v43 = vpop.permute.xlu1 %5306 }
0x3bb9   :  { %v5330_v53 = vmul.f32 %v5307_v43, %v7793_v36 }
0x3bbb   :  { %v5336_v11 = vsel %vm640_vm3, %v5330_v53, 0.0 }
0x3bbc   :  { %v5327_v40 = vpop.permute.xlu1 %5326  ;;  %v5337_v14 = vadd.f32 %v5336_v11, %v5335_v20 }
0x3bbd   :  { %v5334_v26 = vmul.f32 %v5327_v40, %v7799_v19 }
0x3bbf   :  { %v5349_v16 = vsel %vm640_vm3, %v5334_v26, 0.0 }
0x3bc0   :  { %v5350_v21 = vadd.f32 %v5349_v16, %v5348_v61  ;;  %v5312_v39 = vpop.permute.xlu1 %5311 }
0x3bc1   :  { %v5331_v36 = vmul.f32 %v5312_v39, %v7806_v35 }
0x3bc2   :  { %v5351_v30 = vrot.slane %v5350_v21, 4 }
0x3bc3   :  { %v5338_v33 = vsel %vm640_vm3, %v5331_v36, 0.0 }
0x3bc4   :  { %v5352_v19 = vadd.f32 %v5351_v30, %v5350_v21  ;;  %v5339_v29 = vadd.f32 %v5338_v33, %v5337_v14  ;;  %v5369_v44 = vpop.permute.xlu1 %5368 }
0x3bc5   :  { %5372 = vst.msk [vmem:[#allocation5] sm:$0x3] %vm5371_vm5, %v5369_v44 }
0x3bc6   :  { %v5353_v52 = vrot.slane %v5352_v19, 2  ;;  %v5340_v32 = vrot.slane %v5339_v29, 4 }
0x3bc7   :  { %6238 = shalt.err (!%p6235_p4)
}
0x3bc8   :  { %5389 = dma.vmem_to_hbm [thread:$0]  %s5387_s5, 32, %s7946_s13, [#allocation6]   ;;  %v5354_v35 = vadd.f32 %v5353_v52, %v5352_v19  ;;  %v5341_v55 = vadd.f32 %v5340_v32, %v5339_v29  ;;  %v5375_v56 = vpop.permute.xlu1 %5374 }
0x3bc9   :  { %5377 = vst.msk [vmem:[#allocation7] sm:$0x3] %vm5371_vm5, %v5375_v56  ;;  %s6247_s15 = scalar_lea.vmem %s5397_s28, 32  ;;  %p6252_p6 = scmp.lt.s32.totalorder %s5397_s28, %s5397_s28 }
0x3bca   :  { %v5355_v48 = vrot.slane %v5354_v35, 1  ;;  %v5342_v60 = vrot.slane %v5341_v55, 2  ;;  %p6248_p5 = scmp.ne.s32.totalorder %s5397_s28, %s6247_s15  ;;  %p6253_p7 = scmp.lt.s32.totalorder %s6247_s15, %s6247_s15 }
0x3bcc   :  { %p6254_p8 = por %p6253_p7, %p6252_p6 }
0x3bce   :  { %p6255_p9 = pnand %p6254_p8, %p6248_p5 }
0x3bd0   :  { %6258 = shalt.err (!%p6255_p9)
}
0x3bd1   :  { %5399 = dma.vmem_to_hbm [thread:$0]  %s5397_s28, 32, %s7947_s14, [#allocation8]   ;;  %v5356_v13 = vadd.f32 %v5355_v48, %v5354_v35  ;;  %v5343_v1 = vadd.f32 %v5342_v60, %v5341_v55  ;;  %v5071_v17 = vadd.f32 %v7847_v34, %v6900_v15 }
0x3bd3   :  { %v5358_v54 = vadd.f32 %v7814_v45, %v5356_v13  ;;  %v5344_v42 = vrot.slane %v5343_v1, 1 }
0x3bd5   :  { %v5345_v6 = vadd.f32 %v5344_v42, %v5343_v1  ;;  %v5361_v57 = vrot.slane %v5358_v54, 7 }
0x3bd7   :  { %v5357_v23 = vadd.f32 %v7814_v45, %v5345_v6 }
0x3bd9   :  { %v5362_v4 = vsel %vm1110_vm8, %v5361_v57, %v5357_v23 }
0x3bda   :  { %v5364_v41 = vadd.f32 %v5362_v4, %v5071_v17 }
0x3bdc   :  { %5686 = vst.msk [vmem:[%s7945_s12 + $0xe] sm:$0x3] %vm666_vm0, %v5364_v41 }
0x3bdd   :  { %6267 = dma.done.wait [#allocation6], 32  }
0x3bde   :  { %6268 = vsyncadd [#allocation6], 4294967264 }
0x3bdf   :  { %6269 = dma.done.wait [#allocation8], 32  }
0x3be0   :  { %6270 = vsyncadd [#allocation8], 4294967264 }
0x3be1   :  { %5408 = vsyncpa [#allocation6], 1 }
0x3be2   :  { %5409 = vsyncpa [#allocation8], 1 }

</bundles_post_ra>
